<compile_context>
chip_gen: v7x
topology: tpu7x:2x2x1
jax: 0.10.0
libtpu: 0.0.40
codegen_flags: <defaults>
</compile_context>

<pallas_src>
import jax
import jax.numpy as jnp
from jax import lax
from jax.experimental import pallas as pl
from jax.experimental.pallas import tpu as pltpu

# ----- small synthetic config (consistent with BiRNN(input_size, hidden, layers, classes)) -----
INPUT_SIZE = 16
HIDDEN = 32
NUM_LAYERS = 2
NUM_CLASSES = 6
BATCH = 8
SEQ = 10

FC_PAD = 128                      # lane-dense padded fc output width
H = HIDDEN
G8 = 8 * HIDDEN                   # fused gate width (2 dirs x 4 gates) = 256 columns
_HIGHEST = jax.lax.Precision.HIGHEST

# Packed gate-column layout (gate-major, fwd/bwd paired per gate, tanh-gate 'g' last) so one
# sigmoid covers a contiguous 6H block and one tanh covers the trailing 2H block:
#   [ i_f | i_b | f_f | f_b | o_f | o_b | g_f | g_b ]      (each block H lanes wide)
_PT_GATE = {"i": 0, "f": 1, "g": 2, "o": 3}                # PyTorch LSTM gate order along 4H
_PACKED_POS = {("i", "f"): 0, ("i", "b"): 1, ("f", "f"): 2, ("f", "b"): 3,
               ("o", "f"): 4, ("o", "b"): 5, ("g", "f"): 6, ("g", "b"): 7}


def _birnn_kernel(xa_ref, xb_ref, mask_ref, *refs):
    """refs = per layer [w_a(K,8H) f32, w_b(K,8H) f32, bias(1,8H) f32, w_hh(2H,8H) bf16]
            + [fc_w(2H,FC_PAD), fc_b(1,FC_PAD)] + [out(B,FC_PAD)]
            + scratch [pre(T*B,8H) f32] + [seq_i(T*B,2H), seq_rev(T*B,2H)] per ping-pong pair."""
    n_w = NUM_LAYERS * 4
    layer_refs = refs[:n_w]
    fc_w_ref, fc_b_ref = refs[n_w], refs[n_w + 1]
    out_ref = refs[n_w + 2]
    pre_ref = refs[n_w + 3]
    seq_refs = refs[n_w + 4:]
    n_pairs = max(1, len(seq_refs) // 2)

    T, B = SEQ, BATCH

    h_last = None
    for layer in range(NUM_LAYERS):
        w_a = layer_refs[4 * layer + 0][...]
        w_b = layer_refs[4 * layer + 1][...]
        bias = layer_refs[4 * layer + 2][...]
        w_hh = layer_refs[4 * layer + 3][...]           # (2H, 8H) bf16, block structure per dir

        # ---- hoisted input projection (off the serial chain -> keep f32 HIGHEST) ----
        # row i of pre = [fwd gate pre-activations at time i | bwd gate pre-activations at T-1-i]
        if layer == 0:
            lhs_a = xa_ref[...]                         # (T*B, D)   x(t)
            lhs_b = xb_ref[...]                         # (T*B, D)   x(T-1-t)
        else:
            sa = seq_refs[2 * ((layer - 1) % n_pairs)]
            sb = seq_refs[2 * ((layer - 1) % n_pairs) + 1]
            lhs_a = sa[...]                             # (T*B, 2H)  [h_f(t)     | h_b(T-1-t)]
            lhs_b = sb[...]                             # (T*B, 2H)  [h_f(T-1-t) | h_b(t)    ]
        pre_ref[...] = (
            jnp.dot(lhs_a, w_a, preferred_element_type=jnp.float32, precision=_HIGHEST)
            + jnp.dot(lhs_b, w_b, preferred_element_type=jnp.float32, precision=_HIGHEST)
            + bias)

        write_seq = layer < NUM_LAYERS - 1              # last layer's sequence is never consumed
        if write_seq:
            so_i = seq_refs[2 * (layer % n_pairs)]
            so_r = seq_refs[2 * (layer % n_pairs) + 1]
        else:
            so_i = so_r = None

        # ---- fused fwd+bwd recurrence: one (B,2H)@(2H,8H) bf16 MXU pass per step ----
        def step(i, carry, w_hh=w_hh, so_i=so_i, so_r=so_r):
            h, c = carry                                # (B, 2H) f32 state = [fwd | bwd]
            row = pl.multiple_of(i * B, B)
            pre_row = pre_ref[pl.ds(row, B), :]         # (B, 8H)
            m = mask_ref[pl.ds(row, B), :]              # (B, 2H) 0/1 validity (hoisted masks)
            gates = pre_row + jnp.dot(h.astype(jnp.bfloat16), w_hh,
                                      preferred_element_type=jnp.float32)
            sig = jax.nn.sigmoid(gates[:, :6 * H])      # [i_f|i_b|f_f|f_b|o_f|o_b]
            g_t = jnp.tanh(gates[:, 6 * H:])            # [g_f|g_b]
            i_g = sig[:, :2 * H]
            f_g = sig[:, 2 * H:4 * H]
            o_g = sig[:, 4 * H:]
            c_new = f_g * c + i_g * g_t
            h_new = o_g * jnp.tanh(c_new)
            keep = m > 0.5                              # pack_padded: freeze state on padded steps
            h = jnp.where(keep, h_new, h)
            c = jnp.where(keep, c_new, c)
            if so_i is not None:
                so_i[pl.ds(row, B), :] = h                                            # natural order
                so_r[pl.ds(pl.multiple_of((T - 1 - i) * B, B), B), :] = h             # time-reversed
            return h, c

        z = jnp.zeros((B, 2 * H), jnp.float32)
        h_last, _ = lax.fori_loop(0, T, step, (z, z), unroll=True)

    # fc on ht[-1] (= last layer's backward-direction final hidden = h_last[:, H:]); the fc weight
    # rows for the fwd half are zero-padded in the wrapper. F.dropout(p=0.4) is identity at eval.
    out_ref[...] = (jnp.dot(h_last, fc_w_ref[...], preferred_element_type=jnp.float32,
                            precision=_HIGHEST) + fc_b_ref[...])


def _pack_gate_cols(w_rows, direction):
    """w_rows: (K, 4H) = rows of w.T with PyTorch gate column order [i|f|g|o].
       Places each gate block at its packed (gate, direction) column; other columns zero."""
    K = w_rows.shape[0]
    out = jnp.zeros((K, G8), jnp.float32)
    for g in ("i", "f", "g", "o"):
        blk = w_rows[:, _PT_GATE[g] * H:(_PT_GATE[g] + 1) * H]
        p = _PACKED_POS[(g, direction)]
        out = out.at[:, p * H:(p + 1) * H].set(blk)
    return out


def birnn_forward(params, x_btd, lengths):
    """Pallas-backed forward. Returns (logits, alpha=None) like the PyTorch module."""
    x_tbd = jnp.transpose(x_btd, (1, 0, 2)).astype(jnp.float32)   # (T, B, D) time-major
    T, B, D = x_tbd.shape
    x_flat = x_tbd.reshape(T * B, D)                              # row t*B+b = x(t)
    x_rev_flat = x_tbd[::-1].reshape(T * B, D)                    # row t*B+b = x(T-1-t)

    # per-(step, direction) validity, packed to the fused state layout [fwd-half | bwd-half]
    t_idx = jnp.arange(T, dtype=jnp.int32)[:, None]
    len_row = lengths.astype(jnp.int32)[None, :]
    valid_f = (t_idx < len_row).astype(jnp.float32)               # fwd updates time i at step i
    valid_b = ((T - 1 - t_idx) < len_row).astype(jnp.float32)     # bwd updates time T-1-i at step i
    mask = jnp.concatenate(
        [jnp.broadcast_to(valid_f[:, :, None], (T, B, H)),
         jnp.broadcast_to(valid_b[:, :, None], (T, B, H))], axis=-1).reshape(T * B, 2 * H)

    def full_spec(shape):
        nd = len(shape)
        return pl.BlockSpec(shape, lambda i, nd=nd: (0,) * nd)

    args = [x_flat, x_rev_flat, mask]
    in_specs = [full_spec(a.shape) for a in args]

    for layer in range(NUM_LAYERS):
        w_ih_f, w_hh_f, b_ih_f, b_hh_f = params[(layer, "fwd")]
        w_ih_b, w_hh_b, b_ih_b, b_hh_b = params[(layer, "bwd")]
        wiF, wiB = w_ih_f.T, w_ih_b.T                             # (Din, 4H)
        if layer == 0:
            w_a = _pack_gate_cols(wiF, "f")                       # x(t)     -> fwd gate columns
            w_b = _pack_gate_cols(wiB, "b")                       # x(T-1-t) -> bwd gate columns
        else:
            # lhs_a rows = [h_f(t) | h_b(T-1-t)],  lhs_b rows = [h_f(T-1-t) | h_b(t)]
            w_a = jnp.concatenate([_pack_gate_cols(wiF[:H], "f"),
                                   _pack_gate_cols(wiB[H:], "b")], axis=0)
            w_b = jnp.concatenate([_pack_gate_cols(wiB[:H], "b"),
                                   _pack_gate_cols(wiF[H:], "f")], axis=0)
        bias = (_pack_gate_cols((b_ih_f + b_hh_f).reshape(1, -1), "f")
                + _pack_gate_cols((b_ih_b + b_hh_b).reshape(1, -1), "b"))
        # block-structured recurrence weight: bf16 -> single MXU pass on the serial chain
        w_hh = jnp.concatenate([_pack_gate_cols(w_hh_f.T, "f"),
                                _pack_gate_cols(w_hh_b.T, "b")], axis=0).astype(jnp.bfloat16)
        for a in (w_a, w_b, bias, w_hh):
            args.append(a)
            in_specs.append(full_spec(a.shape))

    # fc consumes the fused final state (B, 2H); fwd rows zeroed so only ht[-1] (bwd half) counts.
    # Lane-padded to 128 output columns (unmasked vst); sliced outside.
    fc_w_pad = jnp.zeros((2 * H, FC_PAD), jnp.float32).at[H:, :NUM_CLASSES].set(params["fc_w"].T)
    fc_b_pad = jnp.zeros((1, FC_PAD), jnp.float32).at[:, :NUM_CLASSES].set(
        params["fc_b"].reshape(1, -1))
    for a in (fc_w_pad, fc_b_pad):
        args.append(a)
        in_specs.append(full_spec(a.shape))

    n_pairs = min(2, max(0, NUM_LAYERS - 1))          # ping-pong inter-layer buffers actually needed
    scratch_shapes = [pltpu.VMEM((T * B, G8), jnp.float32)]                 # fused pre-activations
    scratch_shapes += [pltpu.VMEM((T * B, 2 * H), jnp.float32)] * (2 * n_pairs)

    out_pad = pl.pallas_call(
        _birnn_kernel,
        out_shape=jax.ShapeDtypeStruct((B, FC_PAD), jnp.float32),
        grid=(1,),
        in_specs=in_specs,
        out_specs=pl.BlockSpec((B, FC_PAD), lambda i: (0, 0)),
        scratch_shapes=scratch_shapes,
        compiler_params=pltpu.CompilerParams(dimension_semantics=("arbitrary",)),
    )(*args)
    return out_pad[:, :NUM_CLASSES], None


# ----------------- pure-JAX f32 reference (faithful PyTorch semantics) -----------------
def birnn_reference(params, x_btd, lengths):
    x_tbd = jnp.transpose(x_btd, (1, 0, 2)).astype(jnp.float32)
    T, B, _ = x_tbd.shape
    len2d = lengths.reshape(B, 1).astype(jnp.int32)
    hp = _HIGHEST

    def run_dir(inp, w_ih, w_hh, b_ih, b_hh, reverse):
        h = jnp.zeros((B, H), jnp.float32)
        c = jnp.zeros((B, H), jnp.float32)
        outs = [None] * T
        order = range(T - 1, -1, -1) if reverse else range(T)
        for t in order:
            gates = (jnp.dot(inp[t], w_ih.T, precision=hp)
                     + jnp.dot(h, w_hh.T, precision=hp) + b_ih + b_hh)
            i_g = jax.nn.sigmoid(gates[:, :H])
            f_g = jax.nn.sigmoid(gates[:, H:2 * H])
            g_g = jnp.tanh(gates[:, 2 * H:3 * H])
            o_g = jax.nn.sigmoid(gates[:, 3 * H:])
            c_c = f_g * c + i_g * g_g
            h_c = o_g * jnp.tanh(c_c)
            valid = t < len2d
            h = jnp.where(valid, h_c, h)
            c = jnp.where(valid, c_c, c)
            outs[t] = h
        return jnp.stack(outs, 0), h

    inp = x_tbd
    h_bwd_last = None
    for layer in range(NUM_LAYERS):
        of, _ = run_dir(inp, *params[(layer, "fwd")], reverse=False)
        ob, hb = run_dir(inp, *params[(layer, "bwd")], reverse=True)
        inp = jnp.concatenate([of, ob], axis=-1)
        h_bwd_last = hb
    return jnp.dot(h_bwd_last, params["fc_w"].T, precision=hp) + params["fc_b"]


def init_params(key):
    """Deterministic init mimicking PyTorch LSTM / Linear uniform(-1/sqrt(fan), 1/sqrt(fan))."""
    params = {}
    k = 1.0 / (HIDDEN ** 0.5)
    keys = jax.random.split(key, NUM_LAYERS * 2 * 4 + 2)
    idx = 0
    for layer in range(NUM_LAYERS):
        din = INPUT_SIZE if layer == 0 else 2 * HIDDEN
        for d in ("fwd", "bwd"):
            w_ih = jax.random.uniform(keys[idx], (4 * HIDDEN, din), jnp.float32, -k, k); idx += 1
            w_hh = jax.random.uniform(keys[idx], (4 * HIDDEN, HIDDEN), jnp.float32, -k, k); idx += 1
            b_ih = jax.random.uniform(keys[idx], (4 * HIDDEN,), jnp.float32, -k, k); idx += 1
            b_hh = jax.random.uniform(keys[idx], (4 * HIDDEN,), jnp.float32, -k, k); idx += 1
            params[(layer, d)] = (w_ih, w_hh, b_ih, b_hh)
    params["fc_w"] = jax.random.uniform(keys[idx], (NUM_CLASSES, HIDDEN), jnp.float32, -k, k); idx += 1
    params["fc_b"] = jax.random.uniform(keys[idx], (NUM_CLASSES,), jnp.float32, -k, k)
    return params


if __name__ == "__main__":
    root = jax.random.PRNGKey(0)
    kp, kx = jax.random.split(root)
    params = init_params(kp)

    x = jax.random.normal(kx, (BATCH, SEQ, INPUT_SIZE), jnp.float32)          # input[1]
    lengths = jnp.array([10, 9, 8, 8, 7, 6, 5, 4], dtype=jnp.int32)           # input[2], sorted desc

    logits, alpha = birnn_forward(params, x, lengths)
    logits = jax.block_until_ready(logits)

    ref = jax.block_until_ready(birnn_reference(params, x, lengths))
    assert logits.shape == (BATCH, NUM_CLASSES)
    assert alpha is None
    # Tolerance loosened vs f32 reference: the recurrence matmul now runs as a single bf16 MXU
    # pass (the review's biggest latency lever); expected logit error is O(1e-3..1e-2).
    max_err = jnp.max(jnp.abs(logits - ref))
    assert jnp.allclose(logits, ref, atol=3e-2, rtol=3e-2), (logits, ref, max_err)

    print("KERNEL_OK")
</pallas_src>

<mosaic_0001>
module attributes {stable_mosaic.version = 11 : i64} {
  func.func @_birnn_kernel(%arg0: i32, %arg1: memref<80x16xf32, #tpu.memory_space<vmem>>, %arg2: memref<80x16xf32, #tpu.memory_space<vmem>>, %arg3: memref<80x64xf32, #tpu.memory_space<vmem>>, %arg4: memref<16x256xf32, #tpu.memory_space<vmem>>, %arg5: memref<16x256xf32, #tpu.memory_space<vmem>>, %arg6: memref<1x256xf32, #tpu.memory_space<vmem>>, %arg7: memref<64x256xbf16, #tpu.memory_space<vmem>>, %arg8: memref<64x256xf32, #tpu.memory_space<vmem>>, %arg9: memref<64x256xf32, #tpu.memory_space<vmem>>, %arg10: memref<1x256xf32, #tpu.memory_space<vmem>>, %arg11: memref<64x256xbf16, #tpu.memory_space<vmem>>, %arg12: memref<64x128xf32, #tpu.memory_space<vmem>>, %arg13: memref<1x128xf32, #tpu.memory_space<vmem>>, %arg14: memref<8x128xf32, #tpu.memory_space<vmem>>, %arg15: memref<80x256xf32, #tpu.memory_space<vmem>>, %arg16: memref<80x64xf32, #tpu.memory_space<vmem>>, %arg17: memref<80x64xf32, #tpu.memory_space<vmem>>) attributes {dimension_semantics = [#tpu.dimension_semantics<arbitrary>], iteration_bounds = array<i64: 1>, scalar_prefetch = 0 : i64, scratch_operands = 3 : i64, tpu.core_type = #tpu.core_type<tc>, window_params = [{pipeline_mode = #tpu.pipeline_mode<synchronous>, transform_indices = @transform_0, window_bounds = array<i64: 80, 16>}, {pipeline_mode = #tpu.pipeline_mode<synchronous>, transform_indices = @transform_1, window_bounds = array<i64: 80, 16>}, {pipeline_mode = #tpu.pipeline_mode<synchronous>, transform_indices = @transform_2, window_bounds = array<i64: 80, 64>}, {pipeline_mode = #tpu.pipeline_mode<synchronous>, transform_indices = @transform_3, window_bounds = array<i64: 16, 256>}, {pipeline_mode = #tpu.pipeline_mode<synchronous>, transform_indices = @transform_4, window_bounds = array<i64: 16, 256>}, {pipeline_mode = #tpu.pipeline_mode<synchronous>, transform_indices = @transform_5, window_bounds = array<i64: 1, 256>}, {pipeline_mode = #tpu.pipeline_mode<synchronous>, transform_indices = @transform_6, window_bounds = array<i64: 64, 256>}, {pipeline_mode = #tpu.pipeline_mode<synchronous>, transform_indices = @transform_7, window_bounds = array<i64: 64, 256>}, {pipeline_mode = #tpu.pipeline_mode<synchronous>, transform_indices = @transform_8, window_bounds = array<i64: 64, 256>}, {pipeline_mode = #tpu.pipeline_mode<synchronous>, transform_indices = @transform_9, window_bounds = array<i64: 1, 256>}, {pipeline_mode = #tpu.pipeline_mode<synchronous>, transform_indices = @transform_10, window_bounds = array<i64: 64, 256>}, {pipeline_mode = #tpu.pipeline_mode<synchronous>, transform_indices = @transform_11, window_bounds = array<i64: 64, 128>}, {pipeline_mode = #tpu.pipeline_mode<synchronous>, transform_indices = @transform_12, window_bounds = array<i64: 1, 128>}, {pipeline_mode = #tpu.pipeline_mode<synchronous>, transform_indices = @transform_13, window_bounds = array<i64: 8, 128>}]} {
    %c0 = arith.constant 0 : index
    %c0_0 = arith.constant 0 : index
    %0 = vector.load %arg4[%c0, %c0_0] : memref<16x256xf32, #tpu.memory_space<vmem>>, vector<16x256xf32>
    %c0_1 = arith.constant 0 : index
    %c0_2 = arith.constant 0 : index
    %1 = vector.load %arg5[%c0_1, %c0_2] : memref<16x256xf32, #tpu.memory_space<vmem>>, vector<16x256xf32>
    %c0_3 = arith.constant 0 : index
    %c0_4 = arith.constant 0 : index
    %2 = vector.load %arg6[%c0_3, %c0_4] : memref<1x256xf32, #tpu.memory_space<vmem>>, vector<1x256xf32>
    %c0_5 = arith.constant 0 : index
    %c0_6 = arith.constant 0 : index
    %3 = vector.load %arg7[%c0_5, %c0_6] : memref<64x256xbf16, #tpu.memory_space<vmem>>, vector<64x256xbf16>
    %c0_7 = arith.constant 0 : index
    %c0_8 = arith.constant 0 : index
    %4 = vector.load %arg1[%c0_7, %c0_8] : memref<80x16xf32, #tpu.memory_space<vmem>>, vector<80x16xf32>
    %c0_9 = arith.constant 0 : index
    %c0_10 = arith.constant 0 : index
    %5 = vector.load %arg2[%c0_9, %c0_10] : memref<80x16xf32, #tpu.memory_space<vmem>>, vector<80x16xf32>
    %cst = arith.constant dense<0.000000e+00> : vector<80x256xf32>
    %6 = tpu.matmul %4, %0, %cst {dimension_numbers = #tpu.dot_dimension_numbers<[1], [0], [0], [1], [0, 0, 1, 1], [], []>, precision = #tpu.contract_precision<fp32>} : vector<80x16xf32>, vector<16x256xf32>, vector<80x256xf32> -> vector<80x256xf32>
    %cst_11 = arith.constant dense<0.000000e+00> : vector<80x256xf32>
    %7 = tpu.matmul %5, %1, %cst_11 {dimension_numbers = #tpu.dot_dimension_numbers<[1], [0], [0], [1], [0, 0, 1, 1], [], []>, precision = #tpu.contract_precision<fp32>} : vector<80x16xf32>, vector<16x256xf32>, vector<80x256xf32> -> vector<80x256xf32>
    %8 = arith.addf %6, %7 : vector<80x256xf32>
    %9 = vector.broadcast %2 : vector<1x256xf32> to vector<80x256xf32>
    %10 = arith.addf %8, %9 : vector<80x256xf32>
    %c0_12 = arith.constant 0 : index
    %c0_13 = arith.constant 0 : index
    %11 = vector.load %arg15[%c0_12, %c0_13] : memref<80x256xf32, #tpu.memory_space<vmem>>, vector<80x256xf32>
    tpu.vector_store %arg15[%c0_12, %c0_13], %10 {strides = array<i32>} : memref<80x256xf32, #tpu.memory_space<vmem>>, vector<80x256xf32>,
    %cst_14 = arith.constant 0.000000e+00 : f32
    %12 = vector.broadcast %cst_14 : f32 to vector<8x64xf32>
    %c0_i32 = arith.constant 0 : i32
    %c8_i32 = arith.constant 8 : i32
    %13 = arith.muli %c0_i32, %c8_i32 : i32
    %14 = tpu.assume_multiple %13, 8 : i32
    %15 = arith.index_cast %14 : i32 to index
    %c0_15 = arith.constant 0 : index
    %16 = vector.load %arg15[%15, %c0_15] : memref<80x256xf32, #tpu.memory_space<vmem>>, vector<8x256xf32>
    %17 = arith.index_cast %14 : i32 to index
    %c0_16 = arith.constant 0 : index
    %18 = vector.load %arg3[%17, %c0_16] : memref<80x64xf32, #tpu.memory_space<vmem>>, vector<8x64xf32>
    %19 = arith.truncf %12 : vector<8x64xf32> to vector<8x64xbf16>
    %cst_17 = arith.constant dense<0.000000e+00> : vector<8x256xf32>
    %20 = tpu.matmul %19, %3, %cst_17 {dimension_numbers = #tpu.dot_dimension_numbers<[1], [0], [0], [1], [0, 0, 1, 1], [], []>} : vector<8x64xbf16>, vector<64x256xbf16>, vector<8x256xf32> -> vector<8x256xf32>
    %21 = arith.addf %16, %20 : vector<8x256xf32>
    %22 = vector.extract_strided_slice %21 {offsets = [0, 0], sizes = [8, 192], strides = [1, 1]} : vector<8x256xf32> to vector<8x192xf32>
    %23 = arith.negf %22 : vector<8x192xf32>
    %24 = math.exp %23 : vector<8x192xf32>
    %cst_18 = arith.constant 1.000000e+00 : f32
    %25 = vector.broadcast %cst_18 : f32 to vector<8x192xf32>
    %26 = arith.addf %25, %24 : vector<8x192xf32>
    %27 = arith.divf %25, %26 : vector<8x192xf32>
    %28 = vector.extract_strided_slice %21 {offsets = [0, 192], sizes = [8, 64], strides = [1, 1]} : vector<8x256xf32> to vector<8x64xf32>
    %29 = math.tanh %28 : vector<8x64xf32>
    %30 = vector.extract_strided_slice %27 {offsets = [0, 0], sizes = [8, 64], strides = [1, 1]} : vector<8x192xf32> to vector<8x64xf32>
    %31 = vector.extract_strided_slice %27 {offsets = [0, 64], sizes = [8, 64], strides = [1, 1]} : vector<8x192xf32> to vector<8x64xf32>
    %32 = vector.extract_strided_slice %27 {offsets = [0, 128], sizes = [8, 64], strides = [1, 1]} : vector<8x192xf32> to vector<8x64xf32>
    %33 = arith.mulf %31, %12 : vector<8x64xf32>
    %34 = arith.mulf %30, %29 : vector<8x64xf32>
    %35 = arith.addf %33, %34 : vector<8x64xf32>
    %36 = math.tanh %35 : vector<8x64xf32>
    %37 = arith.mulf %32, %36 : vector<8x64xf32>
    %cst_19 = arith.constant 5.000000e-01 : f32
    %38 = vector.broadcast %cst_19 : f32 to vector<8x64xf32>
    %39 = arith.cmpf ogt, %18, %38 : vector<8x64xf32>
    %40 = arith.select %39, %37, %12 : vector<8x64xi1>, vector<8x64xf32>
    %41 = arith.select %39, %35, %12 : vector<8x64xi1>, vector<8x64xf32>
    %42 = arith.index_cast %14 : i32 to index
    %c0_20 = arith.constant 0 : index
    %43 = vector.load %arg16[%42, %c0_20] : memref<80x64xf32, #tpu.memory_space<vmem>>, vector<8x64xf32>
    tpu.vector_store %arg16[%42, %c0_20], %40 {strides = array<i32>} : memref<80x64xf32, #tpu.memory_space<vmem>>, vector<8x64xf32>,
    %c9_i32 = arith.constant 9 : i32
    %44 = arith.subi %c9_i32, %c0_i32 : i32
    %c8_i32_21 = arith.constant 8 : i32
    %45 = arith.muli %44, %c8_i32_21 : i32
    %46 = tpu.assume_multiple %45, 8 : i32
    %47 = arith.index_cast %46 : i32 to index
    %c0_22 = arith.constant 0 : index
    %48 = vector.load %arg17[%47, %c0_22] : memref<80x64xf32, #tpu.memory_space<vmem>>, vector<8x64xf32>
    tpu.vector_store %arg17[%47, %c0_22], %40 {strides = array<i32>} : memref<80x64xf32, #tpu.memory_space<vmem>>, vector<8x64xf32>,
    %c1_i32 = arith.constant 1 : i32
    %c8_i32_23 = arith.constant 8 : i32
    %49 = arith.muli %c1_i32, %c8_i32_23 : i32
    %50 = tpu.assume_multiple %49, 8 : i32
    %51 = arith.index_cast %50 : i32 to index
    %c0_24 = arith.constant 0 : index
    %52 = vector.load %arg15[%51, %c0_24] : memref<80x256xf32, #tpu.memory_space<vmem>>, vector<8x256xf32>
    %53 = arith.index_cast %50 : i32 to index
    %c0_25 = arith.constant 0 : index
    %54 = vector.load %arg3[%53, %c0_25] : memref<80x64xf32, #tpu.memory_space<vmem>>, vector<8x64xf32>
    %55 = arith.truncf %40 : vector<8x64xf32> to vector<8x64xbf16>
    %cst_26 = arith.constant dense<0.000000e+00> : vector<8x256xf32>
    %56 = tpu.matmul %55, %3, %cst_26 {dimension_numbers = #tpu.dot_dimension_numbers<[1], [0], [0], [1], [0, 0, 1, 1], [], []>} : vector<8x64xbf16>, vector<64x256xbf16>, vector<8x256xf32> -> vector<8x256xf32>
    %57 = arith.addf %52, %56 : vector<8x256xf32>
    %58 = vector.extract_strided_slice %57 {offsets = [0, 0], sizes = [8, 192], strides = [1, 1]} : vector<8x256xf32> to vector<8x192xf32>
    %59 = arith.negf %58 : vector<8x192xf32>
    %60 = math.exp %59 : vector<8x192xf32>
    %cst_27 = arith.constant 1.000000e+00 : f32
    %61 = vector.broadcast %cst_27 : f32 to vector<8x192xf32>
    %62 = arith.addf %61, %60 : vector<8x192xf32>
    %63 = arith.divf %61, %62 : vector<8x192xf32>
    %64 = vector.extract_strided_slice %57 {offsets = [0, 192], sizes = [8, 64], strides = [1, 1]} : vector<8x256xf32> to vector<8x64xf32>
    %65 = math.tanh %64 : vector<8x64xf32>
    %66 = vector.extract_strided_slice %63 {offsets = [0, 0], sizes = [8, 64], strides = [1, 1]} : vector<8x192xf32> to vector<8x64xf32>
    %67 = vector.extract_strided_slice %63 {offsets = [0, 64], sizes = [8, 64], strides = [1, 1]} : vector<8x192xf32> to vector<8x64xf32>
    %68 = vector.extract_strided_slice %63 {offsets = [0, 128], sizes = [8, 64], strides = [1, 1]} : vector<8x192xf32> to vector<8x64xf32>
    %69 = arith.mulf %67, %41 : vector<8x64xf32>
    %70 = arith.mulf %66, %65 : vector<8x64xf32>
    %71 = arith.addf %69, %70 : vector<8x64xf32>
    %72 = math.tanh %71 : vector<8x64xf32>
    %73 = arith.mulf %68, %72 : vector<8x64xf32>
    %cst_28 = arith.constant 5.000000e-01 : f32
    %74 = vector.broadcast %cst_28 : f32 to vector<8x64xf32>
    %75 = arith.cmpf ogt, %54, %74 : vector<8x64xf32>
    %76 = arith.select %75, %73, %40 : vector<8x64xi1>, vector<8x64xf32>
    %77 = arith.select %75, %71, %41 : vector<8x64xi1>, vector<8x64xf32>
    %78 = arith.index_cast %50 : i32 to index
    %c0_29 = arith.constant 0 : index
    %79 = vector.load %arg16[%78, %c0_29] : memref<80x64xf32, #tpu.memory_space<vmem>>, vector<8x64xf32>
    tpu.vector_store %arg16[%78, %c0_29], %76 {strides = array<i32>} : memref<80x64xf32, #tpu.memory_space<vmem>>, vector<8x64xf32>,
    %c9_i32_30 = arith.constant 9 : i32
    %80 = arith.subi %c9_i32_30, %c1_i32 : i32
    %c8_i32_31 = arith.constant 8 : i32
    %81 = arith.muli %80, %c8_i32_31 : i32
    %82 = tpu.assume_multiple %81, 8 : i32
    %83 = arith.index_cast %82 : i32 to index
    %c0_32 = arith.constant 0 : index
    %84 = vector.load %arg17[%83, %c0_32] : memref<80x64xf32, #tpu.memory_space<vmem>>, vector<8x64xf32>
    tpu.vector_store %arg17[%83, %c0_32], %76 {strides = array<i32>} : memref<80x64xf32, #tpu.memory_space<vmem>>, vector<8x64xf32>,
    %c2_i32 = arith.constant 2 : i32
    %c8_i32_33 = arith.constant 8 : i32
    %85 = arith.muli %c2_i32, %c8_i32_33 : i32
    %86 = tpu.assume_multiple %85, 8 : i32
    %87 = arith.index_cast %86 : i32 to index
    %c0_34 = arith.constant 0 : index
    %88 = vector.load %arg15[%87, %c0_34] : memref<80x256xf32, #tpu.memory_space<vmem>>, vector<8x256xf32>
    %89 = arith.index_cast %86 : i32 to index
    %c0_35 = arith.constant 0 : index
    %90 = vector.load %arg3[%89, %c0_35] : memref<80x64xf32, #tpu.memory_space<vmem>>, vector<8x64xf32>
    %91 = arith.truncf %76 : vector<8x64xf32> to vector<8x64xbf16>
    %cst_36 = arith.constant dense<0.000000e+00> : vector<8x256xf32>
    %92 = tpu.matmul %91, %3, %cst_36 {dimension_numbers = #tpu.dot_dimension_numbers<[1], [0], [0], [1], [0, 0, 1, 1], [], []>} : vector<8x64xbf16>, vector<64x256xbf16>, vector<8x256xf32> -> vector<8x256xf32>
    %93 = arith.addf %88, %92 : vector<8x256xf32>
    %94 = vector.extract_strided_slice %93 {offsets = [0, 0], sizes = [8, 192], strides = [1, 1]} : vector<8x256xf32> to vector<8x192xf32>
    %95 = arith.negf %94 : vector<8x192xf32>
    %96 = math.exp %95 : vector<8x192xf32>
    %cst_37 = arith.constant 1.000000e+00 : f32
    %97 = vector.broadcast %cst_37 : f32 to vector<8x192xf32>
    %98 = arith.addf %97, %96 : vector<8x192xf32>
    %99 = arith.divf %97, %98 : vector<8x192xf32>
    %100 = vector.extract_strided_slice %93 {offsets = [0, 192], sizes = [8, 64], strides = [1, 1]} : vector<8x256xf32> to vector<8x64xf32>
    %101 = math.tanh %100 : vector<8x64xf32>
    %102 = vector.extract_strided_slice %99 {offsets = [0, 0], sizes = [8, 64], strides = [1, 1]} : vector<8x192xf32> to vector<8x64xf32>
    %103 = vector.extract_strided_slice %99 {offsets = [0, 64], sizes = [8, 64], strides = [1, 1]} : vector<8x192xf32> to vector<8x64xf32>
    %104 = vector.extract_strided_slice %99 {offsets = [0, 128], sizes = [8, 64], strides = [1, 1]} : vector<8x192xf32> to vector<8x64xf32>
    %105 = arith.mulf %103, %77 : vector<8x64xf32>
    %106 = arith.mulf %102, %101 : vector<8x64xf32>
    %107 = arith.addf %105, %106 : vector<8x64xf32>
    %108 = math.tanh %107 : vector<8x64xf32>
    %109 = arith.mulf %104, %108 : vector<8x64xf32>
    %cst_38 = arith.constant 5.000000e-01 : f32
    %110 = vector.broadcast %cst_38 : f32 to vector<8x64xf32>
    %111 = arith.cmpf ogt, %90, %110 : vector<8x64xf32>
    %112 = arith.select %111, %109, %76 : vector<8x64xi1>, vector<8x64xf32>
    %113 = arith.select %111, %107, %77 : vector<8x64xi1>, vector<8x64xf32>
    %114 = arith.index_cast %86 : i32 to index
    %c0_39 = arith.constant 0 : index
    %115 = vector.load %arg16[%114, %c0_39] : memref<80x64xf32, #tpu.memory_space<vmem>>, vector<8x64xf32>
    tpu.vector_store %arg16[%114, %c0_39], %112 {strides = array<i32>} : memref<80x64xf32, #tpu.memory_space<vmem>>, vector<8x64xf32>,
    %c9_i32_40 = arith.constant 9 : i32
    %116 = arith.subi %c9_i32_40, %c2_i32 : i32
    %c8_i32_41 = arith.constant 8 : i32
    %117 = arith.muli %116, %c8_i32_41 : i32
    %118 = tpu.assume_multiple %117, 8 : i32
    %119 = arith.index_cast %118 : i32 to index
    %c0_42 = arith.constant 0 : index
    %120 = vector.load %arg17[%119, %c0_42] : memref<80x64xf32, #tpu.memory_space<vmem>>, vector<8x64xf32>
    tpu.vector_store %arg17[%119, %c0_42], %112 {strides = array<i32>} : memref<80x64xf32, #tpu.memory_space<vmem>>, vector<8x64xf32>,
    %c3_i32 = arith.constant 3 : i32
    %c8_i32_43 = arith.constant 8 : i32
    %121 = arith.muli %c3_i32, %c8_i32_43 : i32
    %122 = tpu.assume_multiple %121, 8 : i32
    %123 = arith.index_cast %122 : i32 to index
    %c0_44 = arith.constant 0 : index
    %124 = vector.load %arg15[%123, %c0_44] : memref<80x256xf32, #tpu.memory_space<vmem>>, vector<8x256xf32>
    %125 = arith.index_cast %122 : i32 to index
    %c0_45 = arith.constant 0 : index
    %126 = vector.load %arg3[%125, %c0_45] : memref<80x64xf32, #tpu.memory_space<vmem>>, vector<8x64xf32>
    %127 = arith.truncf %112 : vector<8x64xf32> to vector<8x64xbf16>
    %cst_46 = arith.constant dense<0.000000e+00> : vector<8x256xf32>
    %128 = tpu.matmul %127, %3, %cst_46 {dimension_numbers = #tpu.dot_dimension_numbers<[1], [0], [0], [1], [0, 0, 1, 1], [], []>} : vector<8x64xbf16>, vector<64x256xbf16>, vector<8x256xf32> -> vector<8x256xf32>
    %129 = arith.addf %124, %128 : vector<8x256xf32>
    %130 = vector.extract_strided_slice %129 {offsets = [0, 0], sizes = [8, 192], strides = [1, 1]} : vector<8x256xf32> to vector<8x192xf32>
    %131 = arith.negf %130 : vector<8x192xf32>
    %132 = math.exp %131 : vector<8x192xf32>
    %cst_47 = arith.constant 1.000000e+00 : f32
    %133 = vector.broadcast %cst_47 : f32 to vector<8x192xf32>
    %134 = arith.addf %133, %132 : vector<8x192xf32>
    %135 = arith.divf %133, %134 : vector<8x192xf32>
    %136 = vector.extract_strided_slice %129 {offsets = [0, 192], sizes = [8, 64], strides = [1, 1]} : vector<8x256xf32> to vector<8x64xf32>
    %137 = math.tanh %136 : vector<8x64xf32>
    %138 = vector.extract_strided_slice %135 {offsets = [0, 0], sizes = [8, 64], strides = [1, 1]} : vector<8x192xf32> to vector<8x64xf32>
    %139 = vector.extract_strided_slice %135 {offsets = [0, 64], sizes = [8, 64], strides = [1, 1]} : vector<8x192xf32> to vector<8x64xf32>
    %140 = vector.extract_strided_slice %135 {offsets = [0, 128], sizes = [8, 64], strides = [1, 1]} : vector<8x192xf32> to vector<8x64xf32>
    %141 = arith.mulf %139, %113 : vector<8x64xf32>
    %142 = arith.mulf %138, %137 : vector<8x64xf32>
    %143 = arith.addf %141, %142 : vector<8x64xf32>
    %144 = math.tanh %143 : vector<8x64xf32>
    %145 = arith.mulf %140, %144 : vector<8x64xf32>
    %cst_48 = arith.constant 5.000000e-01 : f32
    %146 = vector.broadcast %cst_48 : f32 to vector<8x64xf32>
    %147 = arith.cmpf ogt, %126, %146 : vector<8x64xf32>
    %148 = arith.select %147, %145, %112 : vector<8x64xi1>, vector<8x64xf32>
    %149 = arith.select %147, %143, %113 : vector<8x64xi1>, vector<8x64xf32>
    %150 = arith.index_cast %122 : i32 to index
    %c0_49 = arith.constant 0 : index
    %151 = vector.load %arg16[%150, %c0_49] : memref<80x64xf32, #tpu.memory_space<vmem>>, vector<8x64xf32>
    tpu.vector_store %arg16[%150, %c0_49], %148 {strides = array<i32>} : memref<80x64xf32, #tpu.memory_space<vmem>>, vector<8x64xf32>,
    %c9_i32_50 = arith.constant 9 : i32
    %152 = arith.subi %c9_i32_50, %c3_i32 : i32
    %c8_i32_51 = arith.constant 8 : i32
    %153 = arith.muli %152, %c8_i32_51 : i32
    %154 = tpu.assume_multiple %153, 8 : i32
    %155 = arith.index_cast %154 : i32 to index
    %c0_52 = arith.constant 0 : index
    %156 = vector.load %arg17[%155, %c0_52] : memref<80x64xf32, #tpu.memory_space<vmem>>, vector<8x64xf32>
    tpu.vector_store %arg17[%155, %c0_52], %148 {strides = array<i32>} : memref<80x64xf32, #tpu.memory_space<vmem>>, vector<8x64xf32>,
    %c4_i32 = arith.constant 4 : i32
    %c8_i32_53 = arith.constant 8 : i32
    %157 = arith.muli %c4_i32, %c8_i32_53 : i32
    %158 = tpu.assume_multiple %157, 8 : i32
    %159 = arith.index_cast %158 : i32 to index
    %c0_54 = arith.constant 0 : index
    %160 = vector.load %arg15[%159, %c0_54] : memref<80x256xf32, #tpu.memory_space<vmem>>, vector<8x256xf32>
    %161 = arith.index_cast %158 : i32 to index
    %c0_55 = arith.constant 0 : index
    %162 = vector.load %arg3[%161, %c0_55] : memref<80x64xf32, #tpu.memory_space<vmem>>, vector<8x64xf32>
    %163 = arith.truncf %148 : vector<8x64xf32> to vector<8x64xbf16>
    %cst_56 = arith.constant dense<0.000000e+00> : vector<8x256xf32>
    %164 = tpu.matmul %163, %3, %cst_56 {dimension_numbers = #tpu.dot_dimension_numbers<[1], [0], [0], [1], [0, 0, 1, 1], [], []>} : vector<8x64xbf16>, vector<64x256xbf16>, vector<8x256xf32> -> vector<8x256xf32>
    %165 = arith.addf %160, %164 : vector<8x256xf32>
    %166 = vector.extract_strided_slice %165 {offsets = [0, 0], sizes = [8, 192], strides = [1, 1]} : vector<8x256xf32> to vector<8x192xf32>
    %167 = arith.negf %166 : vector<8x192xf32>
    %168 = math.exp %167 : vector<8x192xf32>
    %cst_57 = arith.constant 1.000000e+00 : f32
    %169 = vector.broadcast %cst_57 : f32 to vector<8x192xf32>
    %170 = arith.addf %169, %168 : vector<8x192xf32>
    %171 = arith.divf %169, %170 : vector<8x192xf32>
    %172 = vector.extract_strided_slice %165 {offsets = [0, 192], sizes = [8, 64], strides = [1, 1]} : vector<8x256xf32> to vector<8x64xf32>
    %173 = math.tanh %172 : vector<8x64xf32>
    %174 = vector.extract_strided_slice %171 {offsets = [0, 0], sizes = [8, 64], strides = [1, 1]} : vector<8x192xf32> to vector<8x64xf32>
    %175 = vector.extract_strided_slice %171 {offsets = [0, 64], sizes = [8, 64], strides = [1, 1]} : vector<8x192xf32> to vector<8x64xf32>
    %176 = vector.extract_strided_slice %171 {offsets = [0, 128], sizes = [8, 64], strides = [1, 1]} : vector<8x192xf32> to vector<8x64xf32>
    %177 = arith.mulf %175, %149 : vector<8x64xf32>
    %178 = arith.mulf %174, %173 : vector<8x64xf32>
    %179 = arith.addf %177, %178 : vector<8x64xf32>
    %180 = math.tanh %179 : vector<8x64xf32>
    %181 = arith.mulf %176, %180 : vector<8x64xf32>
    %cst_58 = arith.constant 5.000000e-01 : f32
    %182 = vector.broadcast %cst_58 : f32 to vector<8x64xf32>
    %183 = arith.cmpf ogt, %162, %182 : vector<8x64xf32>
    %184 = arith.select %183, %181, %148 : vector<8x64xi1>, vector<8x64xf32>
    %185 = arith.select %183, %179, %149 : vector<8x64xi1>, vector<8x64xf32>
    %186 = arith.index_cast %158 : i32 to index
    %c0_59 = arith.constant 0 : index
    %187 = vector.load %arg16[%186, %c0_59] : memref<80x64xf32, #tpu.memory_space<vmem>>, vector<8x64xf32>
    tpu.vector_store %arg16[%186, %c0_59], %184 {strides = array<i32>} : memref<80x64xf32, #tpu.memory_space<vmem>>, vector<8x64xf32>,
    %c9_i32_60 = arith.constant 9 : i32
    %188 = arith.subi %c9_i32_60, %c4_i32 : i32
    %c8_i32_61 = arith.constant 8 : i32
    %189 = arith.muli %188, %c8_i32_61 : i32
    %190 = tpu.assume_multiple %189, 8 : i32
    %191 = arith.index_cast %190 : i32 to index
    %c0_62 = arith.constant 0 : index
    %192 = vector.load %arg17[%191, %c0_62] : memref<80x64xf32, #tpu.memory_space<vmem>>, vector<8x64xf32>
    tpu.vector_store %arg17[%191, %c0_62], %184 {strides = array<i32>} : memref<80x64xf32, #tpu.memory_space<vmem>>, vector<8x64xf32>,
    %c5_i32 = arith.constant 5 : i32
    %c8_i32_63 = arith.constant 8 : i32
    %193 = arith.muli %c5_i32, %c8_i32_63 : i32
    %194 = tpu.assume_multiple %193, 8 : i32
    %195 = arith.index_cast %194 : i32 to index
    %c0_64 = arith.constant 0 : index
    %196 = vector.load %arg15[%195, %c0_64] : memref<80x256xf32, #tpu.memory_space<vmem>>, vector<8x256xf32>
    %197 = arith.index_cast %194 : i32 to index
    %c0_65 = arith.constant 0 : index
    %198 = vector.load %arg3[%197, %c0_65] : memref<80x64xf32, #tpu.memory_space<vmem>>, vector<8x64xf32>
    %199 = arith.truncf %184 : vector<8x64xf32> to vector<8x64xbf16>
    %cst_66 = arith.constant dense<0.000000e+00> : vector<8x256xf32>
    %200 = tpu.matmul %199, %3, %cst_66 {dimension_numbers = #tpu.dot_dimension_numbers<[1], [0], [0], [1], [0, 0, 1, 1], [], []>} : vector<8x64xbf16>, vector<64x256xbf16>, vector<8x256xf32> -> vector<8x256xf32>
    %201 = arith.addf %196, %200 : vector<8x256xf32>
    %202 = vector.extract_strided_slice %201 {offsets = [0, 0], sizes = [8, 192], strides = [1, 1]} : vector<8x256xf32> to vector<8x192xf32>
    %203 = arith.negf %202 : vector<8x192xf32>
    %204 = math.exp %203 : vector<8x192xf32>
    %cst_67 = arith.constant 1.000000e+00 : f32
    %205 = vector.broadcast %cst_67 : f32 to vector<8x192xf32>
    %206 = arith.addf %205, %204 : vector<8x192xf32>
    %207 = arith.divf %205, %206 : vector<8x192xf32>
    %208 = vector.extract_strided_slice %201 {offsets = [0, 192], sizes = [8, 64], strides = [1, 1]} : vector<8x256xf32> to vector<8x64xf32>
    %209 = math.tanh %208 : vector<8x64xf32>
    %210 = vector.extract_strided_slice %207 {offsets = [0, 0], sizes = [8, 64], strides = [1, 1]} : vector<8x192xf32> to vector<8x64xf32>
    %211 = vector.extract_strided_slice %207 {offsets = [0, 64], sizes = [8, 64], strides = [1, 1]} : vector<8x192xf32> to vector<8x64xf32>
    %212 = vector.extract_strided_slice %207 {offsets = [0, 128], sizes = [8, 64], strides = [1, 1]} : vector<8x192xf32> to vector<8x64xf32>
    %213 = arith.mulf %211, %185 : vector<8x64xf32>
    %214 = arith.mulf %210, %209 : vector<8x64xf32>
    %215 = arith.addf %213, %214 : vector<8x64xf32>
    %216 = math.tanh %215 : vector<8x64xf32>
    %217 = arith.mulf %212, %216 : vector<8x64xf32>
    %cst_68 = arith.constant 5.000000e-01 : f32
    %218 = vector.broadcast %cst_68 : f32 to vector<8x64xf32>
    %219 = arith.cmpf ogt, %198, %218 : vector<8x64xf32>
    %220 = arith.select %219, %217, %184 : vector<8x64xi1>, vector<8x64xf32>
    %221 = arith.select %219, %215, %185 : vector<8x64xi1>, vector<8x64xf32>
    %222 = arith.index_cast %194 : i32 to index
    %c0_69 = arith.constant 0 : index
    %223 = vector.load %arg16[%222, %c0_69] : memref<80x64xf32, #tpu.memory_space<vmem>>, vector<8x64xf32>
    tpu.vector_store %arg16[%222, %c0_69], %220 {strides = array<i32>} : memref<80x64xf32, #tpu.memory_space<vmem>>, vector<8x64xf32>,
    %c9_i32_70 = arith.constant 9 : i32
    %224 = arith.subi %c9_i32_70, %c5_i32 : i32
    %c8_i32_71 = arith.constant 8 : i32
    %225 = arith.muli %224, %c8_i32_71 : i32
    %226 = tpu.assume_multiple %225, 8 : i32
    %227 = arith.index_cast %226 : i32 to index
    %c0_72 = arith.constant 0 : index
    %228 = vector.load %arg17[%227, %c0_72] : memref<80x64xf32, #tpu.memory_space<vmem>>, vector<8x64xf32>
    tpu.vector_store %arg17[%227, %c0_72], %220 {strides = array<i32>} : memref<80x64xf32, #tpu.memory_space<vmem>>, vector<8x64xf32>,
    %c6_i32 = arith.constant 6 : i32
    %c8_i32_73 = arith.constant 8 : i32
    %229 = arith.muli %c6_i32, %c8_i32_73 : i32
    %230 = tpu.assume_multiple %229, 8 : i32
    %231 = arith.index_cast %230 : i32 to index
    %c0_74 = arith.constant 0 : index
    %232 = vector.load %arg15[%231, %c0_74] : memref<80x256xf32, #tpu.memory_space<vmem>>, vector<8x256xf32>
    %233 = arith.index_cast %230 : i32 to index
    %c0_75 = arith.constant 0 : index
    %234 = vector.load %arg3[%233, %c0_75] : memref<80x64xf32, #tpu.memory_space<vmem>>, vector<8x64xf32>
    %235 = arith.truncf %220 : vector<8x64xf32> to vector<8x64xbf16>
    %cst_76 = arith.constant dense<0.000000e+00> : vector<8x256xf32>
    %236 = tpu.matmul %235, %3, %cst_76 {dimension_numbers = #tpu.dot_dimension_numbers<[1], [0], [0], [1], [0, 0, 1, 1], [], []>} : vector<8x64xbf16>, vector<64x256xbf16>, vector<8x256xf32> -> vector<8x256xf32>
    %237 = arith.addf %232, %236 : vector<8x256xf32>
    %238 = vector.extract_strided_slice %237 {offsets = [0, 0], sizes = [8, 192], strides = [1, 1]} : vector<8x256xf32> to vector<8x192xf32>
    %239 = arith.negf %238 : vector<8x192xf32>
    %240 = math.exp %239 : vector<8x192xf32>
    %cst_77 = arith.constant 1.000000e+00 : f32
    %241 = vector.broadcast %cst_77 : f32 to vector<8x192xf32>
    %242 = arith.addf %241, %240 : vector<8x192xf32>
    %243 = arith.divf %241, %242 : vector<8x192xf32>
    %244 = vector.extract_strided_slice %237 {offsets = [0, 192], sizes = [8, 64], strides = [1, 1]} : vector<8x256xf32> to vector<8x64xf32>
    %245 = math.tanh %244 : vector<8x64xf32>
    %246 = vector.extract_strided_slice %243 {offsets = [0, 0], sizes = [8, 64], strides = [1, 1]} : vector<8x192xf32> to vector<8x64xf32>
    %247 = vector.extract_strided_slice %243 {offsets = [0, 64], sizes = [8, 64], strides = [1, 1]} : vector<8x192xf32> to vector<8x64xf32>
    %248 = vector.extract_strided_slice %243 {offsets = [0, 128], sizes = [8, 64], strides = [1, 1]} : vector<8x192xf32> to vector<8x64xf32>
    %249 = arith.mulf %247, %221 : vector<8x64xf32>
    %250 = arith.mulf %246, %245 : vector<8x64xf32>
    %251 = arith.addf %249, %250 : vector<8x64xf32>
    %252 = math.tanh %251 : vector<8x64xf32>
    %253 = arith.mulf %248, %252 : vector<8x64xf32>
    %cst_78 = arith.constant 5.000000e-01 : f32
    %254 = vector.broadcast %cst_78 : f32 to vector<8x64xf32>
    %255 = arith.cmpf ogt, %234, %254 : vector<8x64xf32>
    %256 = arith.select %255, %253, %220 : vector<8x64xi1>, vector<8x64xf32>
    %257 = arith.select %255, %251, %221 : vector<8x64xi1>, vector<8x64xf32>
    %258 = arith.index_cast %230 : i32 to index
    %c0_79 = arith.constant 0 : index
    %259 = vector.load %arg16[%258, %c0_79] : memref<80x64xf32, #tpu.memory_space<vmem>>, vector<8x64xf32>
    tpu.vector_store %arg16[%258, %c0_79], %256 {strides = array<i32>} : memref<80x64xf32, #tpu.memory_space<vmem>>, vector<8x64xf32>,
    %c9_i32_80 = arith.constant 9 : i32
    %260 = arith.subi %c9_i32_80, %c6_i32 : i32
    %c8_i32_81 = arith.constant 8 : i32
    %261 = arith.muli %260, %c8_i32_81 : i32
    %262 = tpu.assume_multiple %261, 8 : i32
    %263 = arith.index_cast %262 : i32 to index
    %c0_82 = arith.constant 0 : index
    %264 = vector.load %arg17[%263, %c0_82] : memref<80x64xf32, #tpu.memory_space<vmem>>, vector<8x64xf32>
    tpu.vector_store %arg17[%263, %c0_82], %256 {strides = array<i32>} : memref<80x64xf32, #tpu.memory_space<vmem>>, vector<8x64xf32>,
    %c7_i32 = arith.constant 7 : i32
    %c8_i32_83 = arith.constant 8 : i32
    %265 = arith.muli %c7_i32, %c8_i32_83 : i32
    %266 = tpu.assume_multiple %265, 8 : i32
    %267 = arith.index_cast %266 : i32 to index
    %c0_84 = arith.constant 0 : index
    %268 = vector.load %arg15[%267, %c0_84] : memref<80x256xf32, #tpu.memory_space<vmem>>, vector<8x256xf32>
    %269 = arith.index_cast %266 : i32 to index
    %c0_85 = arith.constant 0 : index
    %270 = vector.load %arg3[%269, %c0_85] : memref<80x64xf32, #tpu.memory_space<vmem>>, vector<8x64xf32>
    %271 = arith.truncf %256 : vector<8x64xf32> to vector<8x64xbf16>
    %cst_86 = arith.constant dense<0.000000e+00> : vector<8x256xf32>
    %272 = tpu.matmul %271, %3, %cst_86 {dimension_numbers = #tpu.dot_dimension_numbers<[1], [0], [0], [1], [0, 0, 1, 1], [], []>} : vector<8x64xbf16>, vector<64x256xbf16>, vector<8x256xf32> -> vector<8x256xf32>
    %273 = arith.addf %268, %272 : vector<8x256xf32>
    %274 = vector.extract_strided_slice %273 {offsets = [0, 0], sizes = [8, 192], strides = [1, 1]} : vector<8x256xf32> to vector<8x192xf32>
    %275 = arith.negf %274 : vector<8x192xf32>
    %276 = math.exp %275 : vector<8x192xf32>
    %cst_87 = arith.constant 1.000000e+00 : f32
    %277 = vector.broadcast %cst_87 : f32 to vector<8x192xf32>
    %278 = arith.addf %277, %276 : vector<8x192xf32>
    %279 = arith.divf %277, %278 : vector<8x192xf32>
    %280 = vector.extract_strided_slice %273 {offsets = [0, 192], sizes = [8, 64], strides = [1, 1]} : vector<8x256xf32> to vector<8x64xf32>
    %281 = math.tanh %280 : vector<8x64xf32>
    %282 = vector.extract_strided_slice %279 {offsets = [0, 0], sizes = [8, 64], strides = [1, 1]} : vector<8x192xf32> to vector<8x64xf32>
    %283 = vector.extract_strided_slice %279 {offsets = [0, 64], sizes = [8, 64], strides = [1, 1]} : vector<8x192xf32> to vector<8x64xf32>
    %284 = vector.extract_strided_slice %279 {offsets = [0, 128], sizes = [8, 64], strides = [1, 1]} : vector<8x192xf32> to vector<8x64xf32>
    %285 = arith.mulf %283, %257 : vector<8x64xf32>
    %286 = arith.mulf %282, %281 : vector<8x64xf32>
    %287 = arith.addf %285, %286 : vector<8x64xf32>
    %288 = math.tanh %287 : vector<8x64xf32>
    %289 = arith.mulf %284, %288 : vector<8x64xf32>
    %cst_88 = arith.constant 5.000000e-01 : f32
    %290 = vector.broadcast %cst_88 : f32 to vector<8x64xf32>
    %291 = arith.cmpf ogt, %270, %290 : vector<8x64xf32>
    %292 = arith.select %291, %289, %256 : vector<8x64xi1>, vector<8x64xf32>
    %293 = arith.select %291, %287, %257 : vector<8x64xi1>, vector<8x64xf32>
    %294 = arith.index_cast %266 : i32 to index
    %c0_89 = arith.constant 0 : index
    %295 = vector.load %arg16[%294, %c0_89] : memref<80x64xf32, #tpu.memory_space<vmem>>, vector<8x64xf32>
    tpu.vector_store %arg16[%294, %c0_89], %292 {strides = array<i32>} : memref<80x64xf32, #tpu.memory_space<vmem>>, vector<8x64xf32>,
    %c9_i32_90 = arith.constant 9 : i32
    %296 = arith.subi %c9_i32_90, %c7_i32 : i32
    %c8_i32_91 = arith.constant 8 : i32
    %297 = arith.muli %296, %c8_i32_91 : i32
    %298 = tpu.assume_multiple %297, 8 : i32
    %299 = arith.index_cast %298 : i32 to index
    %c0_92 = arith.constant 0 : index
    %300 = vector.load %arg17[%299, %c0_92] : memref<80x64xf32, #tpu.memory_space<vmem>>, vector<8x64xf32>
    tpu.vector_store %arg17[%299, %c0_92], %292 {strides = array<i32>} : memref<80x64xf32, #tpu.memory_space<vmem>>, vector<8x64xf32>,
    %c8_i32_93 = arith.constant 8 : i32
    %c8_i32_94 = arith.constant 8 : i32
    %301 = arith.muli %c8_i32_93, %c8_i32_94 : i32
    %302 = tpu.assume_multiple %301, 8 : i32
    %303 = arith.index_cast %302 : i32 to index
    %c0_95 = arith.constant 0 : index
    %304 = vector.load %arg15[%303, %c0_95] : memref<80x256xf32, #tpu.memory_space<vmem>>, vector<8x256xf32>
    %305 = arith.index_cast %302 : i32 to index
    %c0_96 = arith.constant 0 : index
    %306 = vector.load %arg3[%305, %c0_96] : memref<80x64xf32, #tpu.memory_space<vmem>>, vector<8x64xf32>
    %307 = arith.truncf %292 : vector<8x64xf32> to vector<8x64xbf16>
    %cst_97 = arith.constant dense<0.000000e+00> : vector<8x256xf32>
    %308 = tpu.matmul %307, %3, %cst_97 {dimension_numbers = #tpu.dot_dimension_numbers<[1], [0], [0], [1], [0, 0, 1, 1], [], []>} : vector<8x64xbf16>, vector<64x256xbf16>, vector<8x256xf32> -> vector<8x256xf32>
    %309 = arith.addf %304, %308 : vector<8x256xf32>
    %310 = vector.extract_strided_slice %309 {offsets = [0, 0], sizes = [8, 192], strides = [1, 1]} : vector<8x256xf32> to vector<8x192xf32>
    %311 = arith.negf %310 : vector<8x192xf32>
    %312 = math.exp %311 : vector<8x192xf32>
    %cst_98 = arith.constant 1.000000e+00 : f32
    %313 = vector.broadcast %cst_98 : f32 to vector<8x192xf32>
    %314 = arith.addf %313, %312 : vector<8x192xf32>
    %315 = arith.divf %313, %314 : vector<8x192xf32>
    %316 = vector.extract_strided_slice %309 {offsets = [0, 192], sizes = [8, 64], strides = [1, 1]} : vector<8x256xf32> to vector<8x64xf32>
    %317 = math.tanh %316 : vector<8x64xf32>
    %318 = vector.extract_strided_slice %315 {offsets = [0, 0], sizes = [8, 64], strides = [1, 1]} : vector<8x192xf32> to vector<8x64xf32>
    %319 = vector.extract_strided_slice %315 {offsets = [0, 64], sizes = [8, 64], strides = [1, 1]} : vector<8x192xf32> to vector<8x64xf32>
    %320 = vector.extract_strided_slice %315 {offsets = [0, 128], sizes = [8, 64], strides = [1, 1]} : vector<8x192xf32> to vector<8x64xf32>
    %321 = arith.mulf %319, %293 : vector<8x64xf32>
    %322 = arith.mulf %318, %317 : vector<8x64xf32>
    %323 = arith.addf %321, %322 : vector<8x64xf32>
    %324 = math.tanh %323 : vector<8x64xf32>
    %325 = arith.mulf %320, %324 : vector<8x64xf32>
    %cst_99 = arith.constant 5.000000e-01 : f32
    %326 = vector.broadcast %cst_99 : f32 to vector<8x64xf32>
    %327 = arith.cmpf ogt, %306, %326 : vector<8x64xf32>
    %328 = arith.select %327, %325, %292 : vector<8x64xi1>, vector<8x64xf32>
    %329 = arith.select %327, %323, %293 : vector<8x64xi1>, vector<8x64xf32>
    %330 = arith.index_cast %302 : i32 to index
    %c0_100 = arith.constant 0 : index
    %331 = vector.load %arg16[%330, %c0_100] : memref<80x64xf32, #tpu.memory_space<vmem>>, vector<8x64xf32>
    tpu.vector_store %arg16[%330, %c0_100], %328 {strides = array<i32>} : memref<80x64xf32, #tpu.memory_space<vmem>>, vector<8x64xf32>,
    %c9_i32_101 = arith.constant 9 : i32
    %332 = arith.subi %c9_i32_101, %c8_i32_93 : i32
    %c8_i32_102 = arith.constant 8 : i32
    %333 = arith.muli %332, %c8_i32_102 : i32
    %334 = tpu.assume_multiple %333, 8 : i32
    %335 = arith.index_cast %334 : i32 to index
    %c0_103 = arith.constant 0 : index
    %336 = vector.load %arg17[%335, %c0_103] : memref<80x64xf32, #tpu.memory_space<vmem>>, vector<8x64xf32>
    tpu.vector_store %arg17[%335, %c0_103], %328 {strides = array<i32>} : memref<80x64xf32, #tpu.memory_space<vmem>>, vector<8x64xf32>,
    %c9_i32_104 = arith.constant 9 : i32
    %c8_i32_105 = arith.constant 8 : i32
    %337 = arith.muli %c9_i32_104, %c8_i32_105 : i32
    %338 = tpu.assume_multiple %337, 8 : i32
    %339 = arith.index_cast %338 : i32 to index
    %c0_106 = arith.constant 0 : index
    %340 = vector.load %arg15[%339, %c0_106] : memref<80x256xf32, #tpu.memory_space<vmem>>, vector<8x256xf32>
    %341 = arith.index_cast %338 : i32 to index
    %c0_107 = arith.constant 0 : index
    %342 = vector.load %arg3[%341, %c0_107] : memref<80x64xf32, #tpu.memory_space<vmem>>, vector<8x64xf32>
    %343 = arith.truncf %328 : vector<8x64xf32> to vector<8x64xbf16>
    %cst_108 = arith.constant dense<0.000000e+00> : vector<8x256xf32>
    %344 = tpu.matmul %343, %3, %cst_108 {dimension_numbers = #tpu.dot_dimension_numbers<[1], [0], [0], [1], [0, 0, 1, 1], [], []>} : vector<8x64xbf16>, vector<64x256xbf16>, vector<8x256xf32> -> vector<8x256xf32>
    %345 = arith.addf %340, %344 : vector<8x256xf32>
    %346 = vector.extract_strided_slice %345 {offsets = [0, 0], sizes = [8, 192], strides = [1, 1]} : vector<8x256xf32> to vector<8x192xf32>
    %347 = arith.negf %346 : vector<8x192xf32>
    %348 = math.exp %347 : vector<8x192xf32>
    %cst_109 = arith.constant 1.000000e+00 : f32
    %349 = vector.broadcast %cst_109 : f32 to vector<8x192xf32>
    %350 = arith.addf %349, %348 : vector<8x192xf32>
    %351 = arith.divf %349, %350 : vector<8x192xf32>
    %352 = vector.extract_strided_slice %345 {offsets = [0, 192], sizes = [8, 64], strides = [1, 1]} : vector<8x256xf32> to vector<8x64xf32>
    %353 = math.tanh %352 : vector<8x64xf32>
    %354 = vector.extract_strided_slice %351 {offsets = [0, 0], sizes = [8, 64], strides = [1, 1]} : vector<8x192xf32> to vector<8x64xf32>
    %355 = vector.extract_strided_slice %351 {offsets = [0, 64], sizes = [8, 64], strides = [1, 1]} : vector<8x192xf32> to vector<8x64xf32>
    %356 = vector.extract_strided_slice %351 {offsets = [0, 128], sizes = [8, 64], strides = [1, 1]} : vector<8x192xf32> to vector<8x64xf32>
    %357 = arith.mulf %355, %329 : vector<8x64xf32>
    %358 = arith.mulf %354, %353 : vector<8x64xf32>
    %359 = arith.addf %357, %358 : vector<8x64xf32>
    %360 = math.tanh %359 : vector<8x64xf32>
    %361 = arith.mulf %356, %360 : vector<8x64xf32>
    %cst_110 = arith.constant 5.000000e-01 : f32
    %362 = vector.broadcast %cst_110 : f32 to vector<8x64xf32>
    %363 = arith.cmpf ogt, %342, %362 : vector<8x64xf32>
    %364 = arith.select %363, %361, %328 : vector<8x64xi1>, vector<8x64xf32>
    %365 = arith.select %363, %359, %329 : vector<8x64xi1>, vector<8x64xf32>
    %366 = arith.index_cast %338 : i32 to index
    %c0_111 = arith.constant 0 : index
    %367 = vector.load %arg16[%366, %c0_111] : memref<80x64xf32, #tpu.memory_space<vmem>>, vector<8x64xf32>
    tpu.vector_store %arg16[%366, %c0_111], %364 {strides = array<i32>} : memref<80x64xf32, #tpu.memory_space<vmem>>, vector<8x64xf32>,
    %c9_i32_112 = arith.constant 9 : i32
    %368 = arith.subi %c9_i32_112, %c9_i32_104 : i32
    %c8_i32_113 = arith.constant 8 : i32
    %369 = arith.muli %368, %c8_i32_113 : i32
    %370 = tpu.assume_multiple %369, 8 : i32
    %371 = arith.index_cast %370 : i32 to index
    %c0_114 = arith.constant 0 : index
    %372 = vector.load %arg17[%371, %c0_114] : memref<80x64xf32, #tpu.memory_space<vmem>>, vector<8x64xf32>
    tpu.vector_store %arg17[%371, %c0_114], %364 {strides = array<i32>} : memref<80x64xf32, #tpu.memory_space<vmem>>, vector<8x64xf32>,
    %c10_i32 = arith.constant 10 : i32
    %c0_115 = arith.constant 0 : index
    %c0_116 = arith.constant 0 : index
    %373 = vector.load %arg8[%c0_115, %c0_116] : memref<64x256xf32, #tpu.memory_space<vmem>>, vector<64x256xf32>
    %c0_117 = arith.constant 0 : index
    %c0_118 = arith.constant 0 : index
    %374 = vector.load %arg9[%c0_117, %c0_118] : memref<64x256xf32, #tpu.memory_space<vmem>>, vector<64x256xf32>
    %c0_119 = arith.constant 0 : index
    %c0_120 = arith.constant 0 : index
    %375 = vector.load %arg10[%c0_119, %c0_120] : memref<1x256xf32, #tpu.memory_space<vmem>>, vector<1x256xf32>
    %c0_121 = arith.constant 0 : index
    %c0_122 = arith.constant 0 : index
    %376 = vector.load %arg11[%c0_121, %c0_122] : memref<64x256xbf16, #tpu.memory_space<vmem>>, vector<64x256xbf16>
    %c0_123 = arith.constant 0 : index
    %c0_124 = arith.constant 0 : index
    %377 = vector.load %arg16[%c0_123, %c0_124] : memref<80x64xf32, #tpu.memory_space<vmem>>, vector<80x64xf32>
    %c0_125 = arith.constant 0 : index
    %c0_126 = arith.constant 0 : index
    %378 = vector.load %arg17[%c0_125, %c0_126] : memref<80x64xf32, #tpu.memory_space<vmem>>, vector<80x64xf32>
    %cst_127 = arith.constant dense<0.000000e+00> : vector<80x256xf32>
    %379 = tpu.matmul %377, %373, %cst_127 {dimension_numbers = #tpu.dot_dimension_numbers<[1], [0], [0], [1], [0, 0, 1, 1], [], []>, precision = #tpu.contract_precision<fp32>} : vector<80x64xf32>, vector<64x256xf32>, vector<80x256xf32> -> vector<80x256xf32>
    %cst_128 = arith.constant dense<0.000000e+00> : vector<80x256xf32>
    %380 = tpu.matmul %378, %374, %cst_128 {dimension_numbers = #tpu.dot_dimension_numbers<[1], [0], [0], [1], [0, 0, 1, 1], [], []>, precision = #tpu.contract_precision<fp32>} : vector<80x64xf32>, vector<64x256xf32>, vector<80x256xf32> -> vector<80x256xf32>
    %381 = arith.addf %379, %380 : vector<80x256xf32>
    %382 = vector.broadcast %375 : vector<1x256xf32> to vector<80x256xf32>
    %383 = arith.addf %381, %382 : vector<80x256xf32>
    %c0_129 = arith.constant 0 : index
    %c0_130 = arith.constant 0 : index
    %384 = vector.load %arg15[%c0_129, %c0_130] : memref<80x256xf32, #tpu.memory_space<vmem>>, vector<80x256xf32>
    tpu.vector_store %arg15[%c0_129, %c0_130], %383 {strides = array<i32>} : memref<80x256xf32, #tpu.memory_space<vmem>>, vector<80x256xf32>,
    %cst_131 = arith.constant 0.000000e+00 : f32
    %385 = vector.broadcast %cst_131 : f32 to vector<8x64xf32>
    %c0_i32_132 = arith.constant 0 : i32
    %c8_i32_133 = arith.constant 8 : i32
    %386 = arith.muli %c0_i32_132, %c8_i32_133 : i32
    %387 = tpu.assume_multiple %386, 8 : i32
    %388 = arith.index_cast %387 : i32 to index
    %c0_134 = arith.constant 0 : index
    %389 = vector.load %arg15[%388, %c0_134] : memref<80x256xf32, #tpu.memory_space<vmem>>, vector<8x256xf32>
    %390 = arith.index_cast %387 : i32 to index
    %c0_135 = arith.constant 0 : index
    %391 = vector.load %arg3[%390, %c0_135] : memref<80x64xf32, #tpu.memory_space<vmem>>, vector<8x64xf32>
    %392 = arith.truncf %385 : vector<8x64xf32> to vector<8x64xbf16>
    %cst_136 = arith.constant dense<0.000000e+00> : vector<8x256xf32>
    %393 = tpu.matmul %392, %376, %cst_136 {dimension_numbers = #tpu.dot_dimension_numbers<[1], [0], [0], [1], [0, 0, 1, 1], [], []>} : vector<8x64xbf16>, vector<64x256xbf16>, vector<8x256xf32> -> vector<8x256xf32>
    %394 = arith.addf %389, %393 : vector<8x256xf32>
    %395 = vector.extract_strided_slice %394 {offsets = [0, 0], sizes = [8, 192], strides = [1, 1]} : vector<8x256xf32> to vector<8x192xf32>
    %396 = arith.negf %395 : vector<8x192xf32>
    %397 = math.exp %396 : vector<8x192xf32>
    %cst_137 = arith.constant 1.000000e+00 : f32
    %398 = vector.broadcast %cst_137 : f32 to vector<8x192xf32>
    %399 = arith.addf %398, %397 : vector<8x192xf32>
    %400 = arith.divf %398, %399 : vector<8x192xf32>
    %401 = vector.extract_strided_slice %394 {offsets = [0, 192], sizes = [8, 64], strides = [1, 1]} : vector<8x256xf32> to vector<8x64xf32>
    %402 = math.tanh %401 : vector<8x64xf32>
    %403 = vector.extract_strided_slice %400 {offsets = [0, 0], sizes = [8, 64], strides = [1, 1]} : vector<8x192xf32> to vector<8x64xf32>
    %404 = vector.extract_strided_slice %400 {offsets = [0, 64], sizes = [8, 64], strides = [1, 1]} : vector<8x192xf32> to vector<8x64xf32>
    %405 = vector.extract_strided_slice %400 {offsets = [0, 128], sizes = [8, 64], strides = [1, 1]} : vector<8x192xf32> to vector<8x64xf32>
    %406 = arith.mulf %404, %385 : vector<8x64xf32>
    %407 = arith.mulf %403, %402 : vector<8x64xf32>
    %408 = arith.addf %406, %407 : vector<8x64xf32>
    %409 = math.tanh %408 : vector<8x64xf32>
    %410 = arith.mulf %405, %409 : vector<8x64xf32>
    %cst_138 = arith.constant 5.000000e-01 : f32
    %411 = vector.broadcast %cst_138 : f32 to vector<8x64xf32>
    %412 = arith.cmpf ogt, %391, %411 : vector<8x64xf32>
    %413 = arith.select %412, %410, %385 : vector<8x64xi1>, vector<8x64xf32>
    %414 = arith.select %412, %408, %385 : vector<8x64xi1>, vector<8x64xf32>
    %c1_i32_139 = arith.constant 1 : i32
    %c8_i32_140 = arith.constant 8 : i32
    %415 = arith.muli %c1_i32_139, %c8_i32_140 : i32
    %416 = tpu.assume_multiple %415, 8 : i32
    %417 = arith.index_cast %416 : i32 to index
    %c0_141 = arith.constant 0 : index
    %418 = vector.load %arg15[%417, %c0_141] : memref<80x256xf32, #tpu.memory_space<vmem>>, vector<8x256xf32>
    %419 = arith.index_cast %416 : i32 to index
    %c0_142 = arith.constant 0 : index
    %420 = vector.load %arg3[%419, %c0_142] : memref<80x64xf32, #tpu.memory_space<vmem>>, vector<8x64xf32>
    %421 = arith.truncf %413 : vector<8x64xf32> to vector<8x64xbf16>
    %cst_143 = arith.constant dense<0.000000e+00> : vector<8x256xf32>
    %422 = tpu.matmul %421, %376, %cst_143 {dimension_numbers = #tpu.dot_dimension_numbers<[1], [0], [0], [1], [0, 0, 1, 1], [], []>} : vector<8x64xbf16>, vector<64x256xbf16>, vector<8x256xf32> -> vector<8x256xf32>
    %423 = arith.addf %418, %422 : vector<8x256xf32>
    %424 = vector.extract_strided_slice %423 {offsets = [0, 0], sizes = [8, 192], strides = [1, 1]} : vector<8x256xf32> to vector<8x192xf32>
    %425 = arith.negf %424 : vector<8x192xf32>
    %426 = math.exp %425 : vector<8x192xf32>
    %cst_144 = arith.constant 1.000000e+00 : f32
    %427 = vector.broadcast %cst_144 : f32 to vector<8x192xf32>
    %428 = arith.addf %427, %426 : vector<8x192xf32>
    %429 = arith.divf %427, %428 : vector<8x192xf32>
    %430 = vector.extract_strided_slice %423 {offsets = [0, 192], sizes = [8, 64], strides = [1, 1]} : vector<8x256xf32> to vector<8x64xf32>
    %431 = math.tanh %430 : vector<8x64xf32>
    %432 = vector.extract_strided_slice %429 {offsets = [0, 0], sizes = [8, 64], strides = [1, 1]} : vector<8x192xf32> to vector<8x64xf32>
    %433 = vector.extract_strided_slice %429 {offsets = [0, 64], sizes = [8, 64], strides = [1, 1]} : vector<8x192xf32> to vector<8x64xf32>
    %434 = vector.extract_strided_slice %429 {offsets = [0, 128], sizes = [8, 64], strides = [1, 1]} : vector<8x192xf32> to vector<8x64xf32>
    %435 = arith.mulf %433, %414 : vector<8x64xf32>
    %436 = arith.mulf %432, %431 : vector<8x64xf32>
    %437 = arith.addf %435, %436 : vector<8x64xf32>
    %438 = math.tanh %437 : vector<8x64xf32>
    %439 = arith.mulf %434, %438 : vector<8x64xf32>
    %cst_145 = arith.constant 5.000000e-01 : f32
    %440 = vector.broadcast %cst_145 : f32 to vector<8x64xf32>
    %441 = arith.cmpf ogt, %420, %440 : vector<8x64xf32>
    %442 = arith.select %441, %439, %413 : vector<8x64xi1>, vector<8x64xf32>
    %443 = arith.select %441, %437, %414 : vector<8x64xi1>, vector<8x64xf32>
    %c2_i32_146 = arith.constant 2 : i32
    %c8_i32_147 = arith.constant 8 : i32
    %444 = arith.muli %c2_i32_146, %c8_i32_147 : i32
    %445 = tpu.assume_multiple %444, 8 : i32
    %446 = arith.index_cast %445 : i32 to index
    %c0_148 = arith.constant 0 : index
    %447 = vector.load %arg15[%446, %c0_148] : memref<80x256xf32, #tpu.memory_space<vmem>>, vector<8x256xf32>
    %448 = arith.index_cast %445 : i32 to index
    %c0_149 = arith.constant 0 : index
    %449 = vector.load %arg3[%448, %c0_149] : memref<80x64xf32, #tpu.memory_space<vmem>>, vector<8x64xf32>
    %450 = arith.truncf %442 : vector<8x64xf32> to vector<8x64xbf16>
    %cst_150 = arith.constant dense<0.000000e+00> : vector<8x256xf32>
    %451 = tpu.matmul %450, %376, %cst_150 {dimension_numbers = #tpu.dot_dimension_numbers<[1], [0], [0], [1], [0, 0, 1, 1], [], []>} : vector<8x64xbf16>, vector<64x256xbf16>, vector<8x256xf32> -> vector<8x256xf32>
    %452 = arith.addf %447, %451 : vector<8x256xf32>
    %453 = vector.extract_strided_slice %452 {offsets = [0, 0], sizes = [8, 192], strides = [1, 1]} : vector<8x256xf32> to vector<8x192xf32>
    %454 = arith.negf %453 : vector<8x192xf32>
    %455 = math.exp %454 : vector<8x192xf32>
    %cst_151 = arith.constant 1.000000e+00 : f32
    %456 = vector.broadcast %cst_151 : f32 to vector<8x192xf32>
    %457 = arith.addf %456, %455 : vector<8x192xf32>
    %458 = arith.divf %456, %457 : vector<8x192xf32>
    %459 = vector.extract_strided_slice %452 {offsets = [0, 192], sizes = [8, 64], strides = [1, 1]} : vector<8x256xf32> to vector<8x64xf32>
    %460 = math.tanh %459 : vector<8x64xf32>
    %461 = vector.extract_strided_slice %458 {offsets = [0, 0], sizes = [8, 64], strides = [1, 1]} : vector<8x192xf32> to vector<8x64xf32>
    %462 = vector.extract_strided_slice %458 {offsets = [0, 64], sizes = [8, 64], strides = [1, 1]} : vector<8x192xf32> to vector<8x64xf32>
    %463 = vector.extract_strided_slice %458 {offsets = [0, 128], sizes = [8, 64], strides = [1, 1]} : vector<8x192xf32> to vector<8x64xf32>
    %464 = arith.mulf %462, %443 : vector<8x64xf32>
    %465 = arith.mulf %461, %460 : vector<8x64xf32>
    %466 = arith.addf %464, %465 : vector<8x64xf32>
    %467 = math.tanh %466 : vector<8x64xf32>
    %468 = arith.mulf %463, %467 : vector<8x64xf32>
    %cst_152 = arith.constant 5.000000e-01 : f32
    %469 = vector.broadcast %cst_152 : f32 to vector<8x64xf32>
    %470 = arith.cmpf ogt, %449, %469 : vector<8x64xf32>
    %471 = arith.select %470, %468, %442 : vector<8x64xi1>, vector<8x64xf32>
    %472 = arith.select %470, %466, %443 : vector<8x64xi1>, vector<8x64xf32>
    %c3_i32_153 = arith.constant 3 : i32
    %c8_i32_154 = arith.constant 8 : i32
    %473 = arith.muli %c3_i32_153, %c8_i32_154 : i32
    %474 = tpu.assume_multiple %473, 8 : i32
    %475 = arith.index_cast %474 : i32 to index
    %c0_155 = arith.constant 0 : index
    %476 = vector.load %arg15[%475, %c0_155] : memref<80x256xf32, #tpu.memory_space<vmem>>, vector<8x256xf32>
    %477 = arith.index_cast %474 : i32 to index
    %c0_156 = arith.constant 0 : index
    %478 = vector.load %arg3[%477, %c0_156] : memref<80x64xf32, #tpu.memory_space<vmem>>, vector<8x64xf32>
    %479 = arith.truncf %471 : vector<8x64xf32> to vector<8x64xbf16>
    %cst_157 = arith.constant dense<0.000000e+00> : vector<8x256xf32>
    %480 = tpu.matmul %479, %376, %cst_157 {dimension_numbers = #tpu.dot_dimension_numbers<[1], [0], [0], [1], [0, 0, 1, 1], [], []>} : vector<8x64xbf16>, vector<64x256xbf16>, vector<8x256xf32> -> vector<8x256xf32>
    %481 = arith.addf %476, %480 : vector<8x256xf32>
    %482 = vector.extract_strided_slice %481 {offsets = [0, 0], sizes = [8, 192], strides = [1, 1]} : vector<8x256xf32> to vector<8x192xf32>
    %483 = arith.negf %482 : vector<8x192xf32>
    %484 = math.exp %483 : vector<8x192xf32>
    %cst_158 = arith.constant 1.000000e+00 : f32
    %485 = vector.broadcast %cst_158 : f32 to vector<8x192xf32>
    %486 = arith.addf %485, %484 : vector<8x192xf32>
    %487 = arith.divf %485, %486 : vector<8x192xf32>
    %488 = vector.extract_strided_slice %481 {offsets = [0, 192], sizes = [8, 64], strides = [1, 1]} : vector<8x256xf32> to vector<8x64xf32>
    %489 = math.tanh %488 : vector<8x64xf32>
    %490 = vector.extract_strided_slice %487 {offsets = [0, 0], sizes = [8, 64], strides = [1, 1]} : vector<8x192xf32> to vector<8x64xf32>
    %491 = vector.extract_strided_slice %487 {offsets = [0, 64], sizes = [8, 64], strides = [1, 1]} : vector<8x192xf32> to vector<8x64xf32>
    %492 = vector.extract_strided_slice %487 {offsets = [0, 128], sizes = [8, 64], strides = [1, 1]} : vector<8x192xf32> to vector<8x64xf32>
    %493 = arith.mulf %491, %472 : vector<8x64xf32>
    %494 = arith.mulf %490, %489 : vector<8x64xf32>
    %495 = arith.addf %493, %494 : vector<8x64xf32>
    %496 = math.tanh %495 : vector<8x64xf32>
    %497 = arith.mulf %492, %496 : vector<8x64xf32>
    %cst_159 = arith.constant 5.000000e-01 : f32
    %498 = vector.broadcast %cst_159 : f32 to vector<8x64xf32>
    %499 = arith.cmpf ogt, %478, %498 : vector<8x64xf32>
    %500 = arith.select %499, %497, %471 : vector<8x64xi1>, vector<8x64xf32>
    %501 = arith.select %499, %495, %472 : vector<8x64xi1>, vector<8x64xf32>
    %c4_i32_160 = arith.constant 4 : i32
    %c8_i32_161 = arith.constant 8 : i32
    %502 = arith.muli %c4_i32_160, %c8_i32_161 : i32
    %503 = tpu.assume_multiple %502, 8 : i32
    %504 = arith.index_cast %503 : i32 to index
    %c0_162 = arith.constant 0 : index
    %505 = vector.load %arg15[%504, %c0_162] : memref<80x256xf32, #tpu.memory_space<vmem>>, vector<8x256xf32>
    %506 = arith.index_cast %503 : i32 to index
    %c0_163 = arith.constant 0 : index
    %507 = vector.load %arg3[%506, %c0_163] : memref<80x64xf32, #tpu.memory_space<vmem>>, vector<8x64xf32>
    %508 = arith.truncf %500 : vector<8x64xf32> to vector<8x64xbf16>
    %cst_164 = arith.constant dense<0.000000e+00> : vector<8x256xf32>
    %509 = tpu.matmul %508, %376, %cst_164 {dimension_numbers = #tpu.dot_dimension_numbers<[1], [0], [0], [1], [0, 0, 1, 1], [], []>} : vector<8x64xbf16>, vector<64x256xbf16>, vector<8x256xf32> -> vector<8x256xf32>
    %510 = arith.addf %505, %509 : vector<8x256xf32>
    %511 = vector.extract_strided_slice %510 {offsets = [0, 0], sizes = [8, 192], strides = [1, 1]} : vector<8x256xf32> to vector<8x192xf32>
    %512 = arith.negf %511 : vector<8x192xf32>
    %513 = math.exp %512 : vector<8x192xf32>
    %cst_165 = arith.constant 1.000000e+00 : f32
    %514 = vector.broadcast %cst_165 : f32 to vector<8x192xf32>
    %515 = arith.addf %514, %513 : vector<8x192xf32>
    %516 = arith.divf %514, %515 : vector<8x192xf32>
    %517 = vector.extract_strided_slice %510 {offsets = [0, 192], sizes = [8, 64], strides = [1, 1]} : vector<8x256xf32> to vector<8x64xf32>
    %518 = math.tanh %517 : vector<8x64xf32>
    %519 = vector.extract_strided_slice %516 {offsets = [0, 0], sizes = [8, 64], strides = [1, 1]} : vector<8x192xf32> to vector<8x64xf32>
    %520 = vector.extract_strided_slice %516 {offsets = [0, 64], sizes = [8, 64], strides = [1, 1]} : vector<8x192xf32> to vector<8x64xf32>
    %521 = vector.extract_strided_slice %516 {offsets = [0, 128], sizes = [8, 64], strides = [1, 1]} : vector<8x192xf32> to vector<8x64xf32>
    %522 = arith.mulf %520, %501 : vector<8x64xf32>
    %523 = arith.mulf %519, %518 : vector<8x64xf32>
    %524 = arith.addf %522, %523 : vector<8x64xf32>
    %525 = math.tanh %524 : vector<8x64xf32>
    %526 = arith.mulf %521, %525 : vector<8x64xf32>
    %cst_166 = arith.constant 5.000000e-01 : f32
    %527 = vector.broadcast %cst_166 : f32 to vector<8x64xf32>
    %528 = arith.cmpf ogt, %507, %527 : vector<8x64xf32>
    %529 = arith.select %528, %526, %500 : vector<8x64xi1>, vector<8x64xf32>
    %530 = arith.select %528, %524, %501 : vector<8x64xi1>, vector<8x64xf32>
    %c5_i32_167 = arith.constant 5 : i32
    %c8_i32_168 = arith.constant 8 : i32
    %531 = arith.muli %c5_i32_167, %c8_i32_168 : i32
    %532 = tpu.assume_multiple %531, 8 : i32
    %533 = arith.index_cast %532 : i32 to index
    %c0_169 = arith.constant 0 : index
    %534 = vector.load %arg15[%533, %c0_169] : memref<80x256xf32, #tpu.memory_space<vmem>>, vector<8x256xf32>
    %535 = arith.index_cast %532 : i32 to index
    %c0_170 = arith.constant 0 : index
    %536 = vector.load %arg3[%535, %c0_170] : memref<80x64xf32, #tpu.memory_space<vmem>>, vector<8x64xf32>
    %537 = arith.truncf %529 : vector<8x64xf32> to vector<8x64xbf16>
    %cst_171 = arith.constant dense<0.000000e+00> : vector<8x256xf32>
    %538 = tpu.matmul %537, %376, %cst_171 {dimension_numbers = #tpu.dot_dimension_numbers<[1], [0], [0], [1], [0, 0, 1, 1], [], []>} : vector<8x64xbf16>, vector<64x256xbf16>, vector<8x256xf32> -> vector<8x256xf32>
    %539 = arith.addf %534, %538 : vector<8x256xf32>
    %540 = vector.extract_strided_slice %539 {offsets = [0, 0], sizes = [8, 192], strides = [1, 1]} : vector<8x256xf32> to vector<8x192xf32>
    %541 = arith.negf %540 : vector<8x192xf32>
    %542 = math.exp %541 : vector<8x192xf32>
    %cst_172 = arith.constant 1.000000e+00 : f32
    %543 = vector.broadcast %cst_172 : f32 to vector<8x192xf32>
    %544 = arith.addf %543, %542 : vector<8x192xf32>
    %545 = arith.divf %543, %544 : vector<8x192xf32>
    %546 = vector.extract_strided_slice %539 {offsets = [0, 192], sizes = [8, 64], strides = [1, 1]} : vector<8x256xf32> to vector<8x64xf32>
    %547 = math.tanh %546 : vector<8x64xf32>
    %548 = vector.extract_strided_slice %545 {offsets = [0, 0], sizes = [8, 64], strides = [1, 1]} : vector<8x192xf32> to vector<8x64xf32>
    %549 = vector.extract_strided_slice %545 {offsets = [0, 64], sizes = [8, 64], strides = [1, 1]} : vector<8x192xf32> to vector<8x64xf32>
    %550 = vector.extract_strided_slice %545 {offsets = [0, 128], sizes = [8, 64], strides = [1, 1]} : vector<8x192xf32> to vector<8x64xf32>
    %551 = arith.mulf %549, %530 : vector<8x64xf32>
    %552 = arith.mulf %548, %547 : vector<8x64xf32>
    %553 = arith.addf %551, %552 : vector<8x64xf32>
    %554 = math.tanh %553 : vector<8x64xf32>
    %555 = arith.mulf %550, %554 : vector<8x64xf32>
    %cst_173 = arith.constant 5.000000e-01 : f32
    %556 = vector.broadcast %cst_173 : f32 to vector<8x64xf32>
    %557 = arith.cmpf ogt, %536, %556 : vector<8x64xf32>
    %558 = arith.select %557, %555, %529 : vector<8x64xi1>, vector<8x64xf32>
    %559 = arith.select %557, %553, %530 : vector<8x64xi1>, vector<8x64xf32>
    %c6_i32_174 = arith.constant 6 : i32
    %c8_i32_175 = arith.constant 8 : i32
    %560 = arith.muli %c6_i32_174, %c8_i32_175 : i32
    %561 = tpu.assume_multiple %560, 8 : i32
    %562 = arith.index_cast %561 : i32 to index
    %c0_176 = arith.constant 0 : index
    %563 = vector.load %arg15[%562, %c0_176] : memref<80x256xf32, #tpu.memory_space<vmem>>, vector<8x256xf32>
    %564 = arith.index_cast %561 : i32 to index
    %c0_177 = arith.constant 0 : index
    %565 = vector.load %arg3[%564, %c0_177] : memref<80x64xf32, #tpu.memory_space<vmem>>, vector<8x64xf32>
    %566 = arith.truncf %558 : vector<8x64xf32> to vector<8x64xbf16>
    %cst_178 = arith.constant dense<0.000000e+00> : vector<8x256xf32>
    %567 = tpu.matmul %566, %376, %cst_178 {dimension_numbers = #tpu.dot_dimension_numbers<[1], [0], [0], [1], [0, 0, 1, 1], [], []>} : vector<8x64xbf16>, vector<64x256xbf16>, vector<8x256xf32> -> vector<8x256xf32>
    %568 = arith.addf %563, %567 : vector<8x256xf32>
    %569 = vector.extract_strided_slice %568 {offsets = [0, 0], sizes = [8, 192], strides = [1, 1]} : vector<8x256xf32> to vector<8x192xf32>
    %570 = arith.negf %569 : vector<8x192xf32>
    %571 = math.exp %570 : vector<8x192xf32>
    %cst_179 = arith.constant 1.000000e+00 : f32
    %572 = vector.broadcast %cst_179 : f32 to vector<8x192xf32>
    %573 = arith.addf %572, %571 : vector<8x192xf32>
    %574 = arith.divf %572, %573 : vector<8x192xf32>
    %575 = vector.extract_strided_slice %568 {offsets = [0, 192], sizes = [8, 64], strides = [1, 1]} : vector<8x256xf32> to vector<8x64xf32>
    %576 = math.tanh %575 : vector<8x64xf32>
    %577 = vector.extract_strided_slice %574 {offsets = [0, 0], sizes = [8, 64], strides = [1, 1]} : vector<8x192xf32> to vector<8x64xf32>
    %578 = vector.extract_strided_slice %574 {offsets = [0, 64], sizes = [8, 64], strides = [1, 1]} : vector<8x192xf32> to vector<8x64xf32>
    %579 = vector.extract_strided_slice %574 {offsets = [0, 128], sizes = [8, 64], strides = [1, 1]} : vector<8x192xf32> to vector<8x64xf32>
    %580 = arith.mulf %578, %559 : vector<8x64xf32>
    %581 = arith.mulf %577, %576 : vector<8x64xf32>
    %582 = arith.addf %580, %581 : vector<8x64xf32>
    %583 = math.tanh %582 : vector<8x64xf32>
    %584 = arith.mulf %579, %583 : vector<8x64xf32>
    %cst_180 = arith.constant 5.000000e-01 : f32
    %585 = vector.broadcast %cst_180 : f32 to vector<8x64xf32>
    %586 = arith.cmpf ogt, %565, %585 : vector<8x64xf32>
    %587 = arith.select %586, %584, %558 : vector<8x64xi1>, vector<8x64xf32>
    %588 = arith.select %586, %582, %559 : vector<8x64xi1>, vector<8x64xf32>
    %c7_i32_181 = arith.constant 7 : i32
    %c8_i32_182 = arith.constant 8 : i32
    %589 = arith.muli %c7_i32_181, %c8_i32_182 : i32
    %590 = tpu.assume_multiple %589, 8 : i32
    %591 = arith.index_cast %590 : i32 to index
    %c0_183 = arith.constant 0 : index
    %592 = vector.load %arg15[%591, %c0_183] : memref<80x256xf32, #tpu.memory_space<vmem>>, vector<8x256xf32>
    %593 = arith.index_cast %590 : i32 to index
    %c0_184 = arith.constant 0 : index
    %594 = vector.load %arg3[%593, %c0_184] : memref<80x64xf32, #tpu.memory_space<vmem>>, vector<8x64xf32>
    %595 = arith.truncf %587 : vector<8x64xf32> to vector<8x64xbf16>
    %cst_185 = arith.constant dense<0.000000e+00> : vector<8x256xf32>
    %596 = tpu.matmul %595, %376, %cst_185 {dimension_numbers = #tpu.dot_dimension_numbers<[1], [0], [0], [1], [0, 0, 1, 1], [], []>} : vector<8x64xbf16>, vector<64x256xbf16>, vector<8x256xf32> -> vector<8x256xf32>
    %597 = arith.addf %592, %596 : vector<8x256xf32>
    %598 = vector.extract_strided_slice %597 {offsets = [0, 0], sizes = [8, 192], strides = [1, 1]} : vector<8x256xf32> to vector<8x192xf32>
    %599 = arith.negf %598 : vector<8x192xf32>
    %600 = math.exp %599 : vector<8x192xf32>
    %cst_186 = arith.constant 1.000000e+00 : f32
    %601 = vector.broadcast %cst_186 : f32 to vector<8x192xf32>
    %602 = arith.addf %601, %600 : vector<8x192xf32>
    %603 = arith.divf %601, %602 : vector<8x192xf32>
    %604 = vector.extract_strided_slice %597 {offsets = [0, 192], sizes = [8, 64], strides = [1, 1]} : vector<8x256xf32> to vector<8x64xf32>
    %605 = math.tanh %604 : vector<8x64xf32>
    %606 = vector.extract_strided_slice %603 {offsets = [0, 0], sizes = [8, 64], strides = [1, 1]} : vector<8x192xf32> to vector<8x64xf32>
    %607 = vector.extract_strided_slice %603 {offsets = [0, 64], sizes = [8, 64], strides = [1, 1]} : vector<8x192xf32> to vector<8x64xf32>
    %608 = vector.extract_strided_slice %603 {offsets = [0, 128], sizes = [8, 64], strides = [1, 1]} : vector<8x192xf32> to vector<8x64xf32>
    %609 = arith.mulf %607, %588 : vector<8x64xf32>
    %610 = arith.mulf %606, %605 : vector<8x64xf32>
    %611 = arith.addf %609, %610 : vector<8x64xf32>
    %612 = math.tanh %611 : vector<8x64xf32>
    %613 = arith.mulf %608, %612 : vector<8x64xf32>
    %cst_187 = arith.constant 5.000000e-01 : f32
    %614 = vector.broadcast %cst_187 : f32 to vector<8x64xf32>
    %615 = arith.cmpf ogt, %594, %614 : vector<8x64xf32>
    %616 = arith.select %615, %613, %587 : vector<8x64xi1>, vector<8x64xf32>
    %617 = arith.select %615, %611, %588 : vector<8x64xi1>, vector<8x64xf32>
    %c8_i32_188 = arith.constant 8 : i32
    %c8_i32_189 = arith.constant 8 : i32
    %618 = arith.muli %c8_i32_188, %c8_i32_189 : i32
    %619 = tpu.assume_multiple %618, 8 : i32
    %620 = arith.index_cast %619 : i32 to index
    %c0_190 = arith.constant 0 : index
    %621 = vector.load %arg15[%620, %c0_190] : memref<80x256xf32, #tpu.memory_space<vmem>>, vector<8x256xf32>
    %622 = arith.index_cast %619 : i32 to index
    %c0_191 = arith.constant 0 : index
    %623 = vector.load %arg3[%622, %c0_191] : memref<80x64xf32, #tpu.memory_space<vmem>>, vector<8x64xf32>
    %624 = arith.truncf %616 : vector<8x64xf32> to vector<8x64xbf16>
    %cst_192 = arith.constant dense<0.000000e+00> : vector<8x256xf32>
    %625 = tpu.matmul %624, %376, %cst_192 {dimension_numbers = #tpu.dot_dimension_numbers<[1], [0], [0], [1], [0, 0, 1, 1], [], []>} : vector<8x64xbf16>, vector<64x256xbf16>, vector<8x256xf32> -> vector<8x256xf32>
    %626 = arith.addf %621, %625 : vector<8x256xf32>
    %627 = vector.extract_strided_slice %626 {offsets = [0, 0], sizes = [8, 192], strides = [1, 1]} : vector<8x256xf32> to vector<8x192xf32>
    %628 = arith.negf %627 : vector<8x192xf32>
    %629 = math.exp %628 : vector<8x192xf32>
    %cst_193 = arith.constant 1.000000e+00 : f32
    %630 = vector.broadcast %cst_193 : f32 to vector<8x192xf32>
    %631 = arith.addf %630, %629 : vector<8x192xf32>
    %632 = arith.divf %630, %631 : vector<8x192xf32>
    %633 = vector.extract_strided_slice %626 {offsets = [0, 192], sizes = [8, 64], strides = [1, 1]} : vector<8x256xf32> to vector<8x64xf32>
    %634 = math.tanh %633 : vector<8x64xf32>
    %635 = vector.extract_strided_slice %632 {offsets = [0, 0], sizes = [8, 64], strides = [1, 1]} : vector<8x192xf32> to vector<8x64xf32>
    %636 = vector.extract_strided_slice %632 {offsets = [0, 64], sizes = [8, 64], strides = [1, 1]} : vector<8x192xf32> to vector<8x64xf32>
    %637 = vector.extract_strided_slice %632 {offsets = [0, 128], sizes = [8, 64], strides = [1, 1]} : vector<8x192xf32> to vector<8x64xf32>
    %638 = arith.mulf %636, %617 : vector<8x64xf32>
    %639 = arith.mulf %635, %634 : vector<8x64xf32>
    %640 = arith.addf %638, %639 : vector<8x64xf32>
    %641 = math.tanh %640 : vector<8x64xf32>
    %642 = arith.mulf %637, %641 : vector<8x64xf32>
    %cst_194 = arith.constant 5.000000e-01 : f32
    %643 = vector.broadcast %cst_194 : f32 to vector<8x64xf32>
    %644 = arith.cmpf ogt, %623, %643 : vector<8x64xf32>
    %645 = arith.select %644, %642, %616 : vector<8x64xi1>, vector<8x64xf32>
    %646 = arith.select %644, %640, %617 : vector<8x64xi1>, vector<8x64xf32>
    %c9_i32_195 = arith.constant 9 : i32
    %c8_i32_196 = arith.constant 8 : i32
    %647 = arith.muli %c9_i32_195, %c8_i32_196 : i32
    %648 = tpu.assume_multiple %647, 8 : i32
    %649 = arith.index_cast %648 : i32 to index
    %c0_197 = arith.constant 0 : index
    %650 = vector.load %arg15[%649, %c0_197] : memref<80x256xf32, #tpu.memory_space<vmem>>, vector<8x256xf32>
    %651 = arith.index_cast %648 : i32 to index
    %c0_198 = arith.constant 0 : index
    %652 = vector.load %arg3[%651, %c0_198] : memref<80x64xf32, #tpu.memory_space<vmem>>, vector<8x64xf32>
    %653 = arith.truncf %645 : vector<8x64xf32> to vector<8x64xbf16>
    %cst_199 = arith.constant dense<0.000000e+00> : vector<8x256xf32>
    %654 = tpu.matmul %653, %376, %cst_199 {dimension_numbers = #tpu.dot_dimension_numbers<[1], [0], [0], [1], [0, 0, 1, 1], [], []>} : vector<8x64xbf16>, vector<64x256xbf16>, vector<8x256xf32> -> vector<8x256xf32>
    %655 = arith.addf %650, %654 : vector<8x256xf32>
    %656 = vector.extract_strided_slice %655 {offsets = [0, 0], sizes = [8, 192], strides = [1, 1]} : vector<8x256xf32> to vector<8x192xf32>
    %657 = arith.negf %656 : vector<8x192xf32>
    %658 = math.exp %657 : vector<8x192xf32>
    %cst_200 = arith.constant 1.000000e+00 : f32
    %659 = vector.broadcast %cst_200 : f32 to vector<8x192xf32>
    %660 = arith.addf %659, %658 : vector<8x192xf32>
    %661 = arith.divf %659, %660 : vector<8x192xf32>
    %662 = vector.extract_strided_slice %655 {offsets = [0, 192], sizes = [8, 64], strides = [1, 1]} : vector<8x256xf32> to vector<8x64xf32>
    %663 = math.tanh %662 : vector<8x64xf32>
    %664 = vector.extract_strided_slice %661 {offsets = [0, 0], sizes = [8, 64], strides = [1, 1]} : vector<8x192xf32> to vector<8x64xf32>
    %665 = vector.extract_strided_slice %661 {offsets = [0, 64], sizes = [8, 64], strides = [1, 1]} : vector<8x192xf32> to vector<8x64xf32>
    %666 = vector.extract_strided_slice %661 {offsets = [0, 128], sizes = [8, 64], strides = [1, 1]} : vector<8x192xf32> to vector<8x64xf32>
    %667 = arith.mulf %665, %646 : vector<8x64xf32>
    %668 = arith.mulf %664, %663 : vector<8x64xf32>
    %669 = arith.addf %667, %668 : vector<8x64xf32>
    %670 = math.tanh %669 : vector<8x64xf32>
    %671 = arith.mulf %666, %670 : vector<8x64xf32>
    %cst_201 = arith.constant 5.000000e-01 : f32
    %672 = vector.broadcast %cst_201 : f32 to vector<8x64xf32>
    %673 = arith.cmpf ogt, %652, %672 : vector<8x64xf32>
    %674 = arith.select %673, %671, %645 : vector<8x64xi1>, vector<8x64xf32>
    %675 = arith.select %673, %669, %646 : vector<8x64xi1>, vector<8x64xf32>
    %c10_i32_202 = arith.constant 10 : i32
    %c0_203 = arith.constant 0 : index
    %c0_204 = arith.constant 0 : index
    %676 = vector.load %arg12[%c0_203, %c0_204] : memref<64x128xf32, #tpu.memory_space<vmem>>, vector<64x128xf32>
    %cst_205 = arith.constant dense<0.000000e+00> : vector<8x128xf32>
    %677 = tpu.matmul %674, %676, %cst_205 {dimension_numbers = #tpu.dot_dimension_numbers<[1], [0], [0], [1], [0, 0, 1, 1], [], []>, precision = #tpu.contract_precision<fp32>} : vector<8x64xf32>, vector<64x128xf32>, vector<8x128xf32> -> vector<8x128xf32>
    %c0_206 = arith.constant 0 : index
    %c0_207 = arith.constant 0 : index
    %678 = vector.load %arg13[%c0_206, %c0_207] : memref<1x128xf32, #tpu.memory_space<vmem>>, vector<1x128xf32>
    %679 = vector.broadcast %678 : vector<1x128xf32> to vector<8x128xf32>
    %680 = arith.addf %677, %679 : vector<8x128xf32>
    %c0_208 = arith.constant 0 : index
    %c0_209 = arith.constant 0 : index
    %681 = vector.load %arg14[%c0_208, %c0_209] : memref<8x128xf32, #tpu.memory_space<vmem>>, vector<8x128xf32>
    tpu.vector_store %arg14[%c0_208, %c0_209], %680 {strides = array<i32>} : memref<8x128xf32, #tpu.memory_space<vmem>>, vector<8x128xf32>,
    return
  }
  func.func @transform_0(%arg0: i32) -> (i32, i32) {
    %c0_i32 = arith.constant 0 : i32
    %c0_i32_0 = arith.constant 0 : i32
    %c0_i32_1 = arith.constant 0 : i32
    return %c0_i32, %c0_i32_0 : i32, i32
  }
  func.func @transform_1(%arg0: i32) -> (i32, i32) {
    %c0_i32 = arith.constant 0 : i32
    %c0_i32_0 = arith.constant 0 : i32
    %c0_i32_1 = arith.constant 0 : i32
    return %c0_i32, %c0_i32_0 : i32, i32
  }
  func.func @transform_2(%arg0: i32) -> (i32, i32) {
    %c0_i32 = arith.constant 0 : i32
    %c0_i32_0 = arith.constant 0 : i32
    %c0_i32_1 = arith.constant 0 : i32
    return %c0_i32, %c0_i32_0 : i32, i32
  }
  func.func @transform_3(%arg0: i32) -> (i32, i32) {
    %c0_i32 = arith.constant 0 : i32
    %c0_i32_0 = arith.constant 0 : i32
    %c0_i32_1 = arith.constant 0 : i32
    return %c0_i32, %c0_i32_0 : i32, i32
  }
  func.func @transform_4(%arg0: i32) -> (i32, i32) {
    %c0_i32 = arith.constant 0 : i32
    %c0_i32_0 = arith.constant 0 : i32
    %c0_i32_1 = arith.constant 0 : i32
    return %c0_i32, %c0_i32_0 : i32, i32
  }
  func.func @transform_5(%arg0: i32) -> (i32, i32) {
    %c0_i32 = arith.constant 0 : i32
    %c0_i32_0 = arith.constant 0 : i32
    %c0_i32_1 = arith.constant 0 : i32
    return %c0_i32, %c0_i32_0 : i32, i32
  }
  func.func @transform_6(%arg0: i32) -> (i32, i32) {
    %c0_i32 = arith.constant 0 : i32
    %c0_i32_0 = arith.constant 0 : i32
    %c0_i32_1 = arith.constant 0 : i32
    return %c0_i32, %c0_i32_0 : i32, i32
  }
  func.func @transform_7(%arg0: i32) -> (i32, i32) {
    %c0_i32 = arith.constant 0 : i32
    %c0_i32_0 = arith.constant 0 : i32
    %c0_i32_1 = arith.constant 0 : i32
    return %c0_i32, %c0_i32_0 : i32, i32
  }
  func.func @transform_8(%arg0: i32) -> (i32, i32) {
    %c0_i32 = arith.constant 0 : i32
    %c0_i32_0 = arith.constant 0 : i32
    %c0_i32_1 = arith.constant 0 : i32
    return %c0_i32, %c0_i32_0 : i32, i32
  }
  func.func @transform_9(%arg0: i32) -> (i32, i32) {
    %c0_i32 = arith.constant 0 : i32
    %c0_i32_0 = arith.constant 0 : i32
    %c0_i32_1 = arith.constant 0 : i32
    return %c0_i32, %c0_i32_0 : i32, i32
  }
  func.func @transform_10(%arg0: i32) -> (i32, i32) {
    %c0_i32 = arith.constant 0 : i32
    %c0_i32_0 = arith.constant 0 : i32
    %c0_i32_1 = arith.constant 0 : i32
    return %c0_i32, %c0_i32_0 : i32, i32
  }
  func.func @transform_11(%arg0: i32) -> (i32, i32) {
    %c0_i32 = arith.constant 0 : i32
    %c0_i32_0 = arith.constant 0 : i32
    %c0_i32_1 = arith.constant 0 : i32
    return %c0_i32, %c0_i32_0 : i32, i32
  }
  func.func @transform_12(%arg0: i32) -> (i32, i32) {
    %c0_i32 = arith.constant 0 : i32
    %c0_i32_0 = arith.constant 0 : i32
    %c0_i32_1 = arith.constant 0 : i32
    return %c0_i32, %c0_i32_0 : i32, i32
  }
  func.func @transform_13(%arg0: i32) -> (i32, i32) {
    %c0_i32 = arith.constant 0 : i32
    %c0_i32_0 = arith.constant 0 : i32
    %c0_i32_1 = arith.constant 0 : i32
    return %c0_i32, %c0_i32_0 : i32, i32
  }
}

</mosaic_0001>

<bundles_post_ra>
// kernel: tpu_custom_call.1
= control target key start
LH: loop header
LB: loop body
LE: loop exit
PB: predicated region body
PF: predicated region fallthrough
CT: control target
= control target key end

     0   :  { %18 = vsyncpa [#allocation6], 0  ;;  %s10990_s0 = inlined_call_operand.vmem [shape: f32[80,16], index: 0, kind: input, shape index: {}]   ;;  %s10991_s1 = inlined_call_operand.vmem [shape: f32[80,16], index: 1, kind: input, shape index: {}]   ;;  %s10992_s2 = inlined_call_operand.vmem [shape: f32[80,64], index: 2, kind: input, shape index: {}]   ;;  %s10993_s3 = inlined_call_operand.hbm [shape: f32[16,256], index: 3, kind: input, shape index: {}]   ;;  %s10994_s4 = inlined_call_operand.hbm [shape: f32[16,256], index: 4, kind: input, shape index: {}]   ;;  %s10995_s5 = inlined_call_operand.vmem [shape: f32[1,256], index: 5, kind: input, shape index: {}]   ;;  %s10996_s6 = inlined_call_operand.vmem [shape: bf16[64,256], index: 6, kind: input, shape index: {}]   ;;  %s10997_s7 = inlined_call_operand.vmem [shape: f32[64,256], index: 7, kind: input, shape index: {}]   ;;  %s10998_s8 = inlined_call_operand.vmem [shape: f32[64,256], index: 8, kind: input, shape index: {}]   ;;  %s10999_s9 = inlined_call_operand.vmem [shape: f32[1,256], index: 9, kind: input, shape index: {}]   ;;  %s11000_s10 = inlined_call_operand.hbm [shape: bf16[64,256], index: 10, kind: input, shape index: {}]   ;;  %s11001_s11 = inlined_call_operand.hbm [shape: f32[64,128], index: 11, kind: input, shape index: {}]   ;;  %s11002_s12 = inlined_call_operand.vmem [shape: f32[1,128], index: 12, kind: input, shape index: {}]   ;;  %s11003_s13 = inlined_call_operand.hbm [shape: f32[8,128], index: 13, kind: output, shape index: {}]  }
   0x1   :  { %19 = vsyncpa [#allocation9], 0 }
   0x2   :  { %20 = vsyncpa [#allocation12], 0 }
   0x3   :  { %21 = vsyncpa [#allocation7], 0  ;;  %s8435_s25 = smov [#allocation8]   ;;  %s8436_s27 = smov [#allocation5]  }
   0x4   :  { %s45_s26 = sshll.u32 %s8435_s25, 4  ;;  %s33_s28 = sshll.u32 %s8436_s27, 4  ;;  %s46_s26 = int_to_ptr.vmem [resolvable:$true] %s45_s26  ;;  %s8519_s28 = int_to_ptr.vmem [resolvable:$true] %s33_s28 }
   0x5   :  { %s8317_s14 = scalar_lea.hbm %s10994_s4, 512 }
   0x6   :  { %p8318_p0 = scmp.ne.s32.totalorder %s10994_s4, %s8317_s14  ;;  %p8321_p1 = scmp.lt.u32.totalorder %s8317_s14, %s10994_s4 }
   0x8   :  { %p8323_p2 = pnand %p8321_p1, %p8318_p0 }
   0xa   :  { %8326 = shalt.err (!%p8323_p2)
}
   0xb   :  { %s8327_s19 = scalar_lea.vmem %s46_s26, 512  ;;  %p8332_p4 = scmp.lt.s32.totalorder %s46_s26, %s46_s26 }
   0xc   :  { %p8328_p3 = scmp.ne.s32.totalorder %s46_s26, %s8327_s19  ;;  %p8333_p5 = scmp.lt.s32.totalorder %s8327_s19, %s8327_s19 }
   0xe   :  { %p8334_p6 = por %p8333_p5, %p8332_p4 }
  0x10   :  { %p8335_p7 = pnand %p8334_p6, %p8328_p3 }
  0x12   :  { %8338 = shalt.err (!%p8335_p7)
}
  0x13   :  { %s8437_s20 = smov 256   ;;  %s8438_s21 = smov 16  }
  0x14   :  { %51 = dma.hbm_to_vmem [thread:$0]  %s10994_s4, 512, %s46_s26, [#allocation9], %s8437_s20, %s8437_s20, %s8438_s21  }
  0x15   :  { %s8339_s27 = scalar_lea.hbm %s10993_s3, 512 }
  0x16   :  { %p8340_p8 = scmp.ne.s32.totalorder %s10993_s3, %s8339_s27  ;;  %p8343_p9 = scmp.lt.u32.totalorder %s8339_s27, %s10993_s3 }
  0x18   :  { %p8345_p10 = pnand %p8343_p9, %p8340_p8 }
  0x1a   :  { %8348 = shalt.err (!%p8345_p10)
}
  0x1b   :  { %s8349_s16 = scalar_lea.vmem %s8519_s28, 512  ;;  %p8354_p12 = scmp.lt.s32.totalorder %s8519_s28, %s8519_s28 }
  0x1c   :  { %p8350_p11 = scmp.ne.s32.totalorder %s8519_s28, %s8349_s16  ;;  %p8355_p13 = scmp.lt.s32.totalorder %s8349_s16, %s8349_s16 }
  0x1e   :  { %p8356_p0 = por %p8355_p13, %p8354_p12 }
  0x20   :  { %p8357_p1 = pnand %p8356_p0, %p8350_p11 }
  0x22   :  { %8360 = shalt.err (!%p8357_p1)
}
  0x23   :  { %39 = dma.hbm_to_vmem [thread:$0]  %s10993_s3, 512, %s8519_s28, [#allocation6], %s8437_s20, %s8437_s20, %s8438_s21  }
  0x24   :  { %s8439_s17 = smov [#allocation10]   ;;  %s8361_s23 = scalar_lea.hbm %s11000_s10, 1024 }
  0x25   :  { %s67_s18 = sshll.u32 %s8439_s17, 4  ;;  %p8362_p2 = scmp.ne.s32.totalorder %s11000_s10, %s8361_s23  ;;  %s68_s18 = int_to_ptr.vmem [resolvable:$true] %s67_s18 }
  0x26   :  { %p8365_p3 = scmp.lt.u32.totalorder %s8361_s23, %s11000_s10 }
  0x28   :  { %p8367_p4 = pnand %p8365_p3, %p8362_p2 }
  0x2a   :  { %8370 = shalt.err (!%p8367_p4)
}
  0x2b   :  { %s8371_s30 = scalar_lea.vmem %s68_s18, 1024  ;;  %p8376_p6 = scmp.lt.s32.totalorder %s68_s18, %s68_s18 }
  0x2c   :  { %p8372_p5 = scmp.ne.s32.totalorder %s68_s18, %s8371_s30  ;;  %p8377_p7 = scmp.lt.s32.totalorder %s8371_s30, %s8371_s30 }
  0x2e   :  { %p8378_p8 = por %p8377_p7, %p8376_p6 }
  0x30   :  { %p8379_p9 = pnand %p8378_p8, %p8372_p5 }
  0x32   :  { %8382 = shalt.err (!%p8379_p9)
}
  0x33   :  { %s8440_s3 = smov 128   ;;  %s8441_s28 = smov 8  }
  0x34   :  { %73 = dma.hbm_to_vmem [thread:$0]  %s11000_s10, 1024, %s68_s18, [#allocation9], %s8440_s3, %s8440_s3, %s8441_s28  }
  0x35   :  { %s8442_s14 = smov [#allocation11]   ;;  %s8383_s26 = scalar_lea.hbm %s11001_s11, 1024 }
  0x36   :  { %s79_s15 = sshll.u32 %s8442_s14, 4  ;;  %p8384_p10 = scmp.ne.s32.totalorder %s11001_s11, %s8383_s26  ;;  %s80_s15 = int_to_ptr.vmem [resolvable:$true] %s79_s15 }
  0x37   :  { %p8387_p11 = scmp.lt.u32.totalorder %s8383_s26, %s11001_s11 }
  0x39   :  { %p8389_p12 = pnand %p8387_p11, %p8384_p10 }
  0x3b   :  { %8392 = shalt.err (!%p8389_p12)
}
  0x3c   :  { %s8393_s24 = scalar_lea.vmem %s80_s15, 1024  ;;  %p8398_p0 = scmp.lt.s32.totalorder %s80_s15, %s80_s15 }
  0x3d   :  { %p8394_p13 = scmp.ne.s32.totalorder %s80_s15, %s8393_s24  ;;  %p8399_p1 = scmp.lt.s32.totalorder %s8393_s24, %s8393_s24 }
  0x3f   :  { %p8400_p2 = por %p8399_p1, %p8398_p0 }
  0x41   :  { %p8401_p3 = pnand %p8400_p2, %p8394_p13 }
  0x43   :  { %8404 = shalt.err (!%p8401_p3)
}
  0x44   :  { %85 = dma.hbm_to_vmem [thread:$0]  %s11001_s11, 1024, %s80_s15, [#allocation12], %s8440_s3, %s8440_s3, %s8441_s28  }
  0x45   :  { %8427 = dma.done.wait [#allocation6], 512  }
  0x46   :  { %8428 = vsyncadd [#allocation6], 4294966784 }
  0x47   :  { %8429 = dma.done.wait [#allocation9], 1536  }
  0x48   :  { %8430 = vsyncadd [#allocation9], 4294965760 }
  0x49   :  { %8431 = dma.done.wait [#allocation12], 1024  }
  0x4a   :  { %8432 = vsyncadd [#allocation12], 4294966272  ;;  %v8443_v0 = vmov 0.0   ;;  %v106_v1 = vld [vmem:[#allocation8 + $0x8] sm:$0xff]  ;;  %v108_v2 = vld [vmem:[#allocation8 + $0x18] sm:$0xff]  ;;  %vm138_vm0 = vcmask 130048  }
  0x4b   :  { %432 = vmatprep.mubr.f32.mxu0 %v8443_v0  ;;  %237 = vmatprep.mubr.f32.mxu1 %v8443_v0  ;;  %v105_v3 = vld [vmem:[#allocation8] sm:$0xff]  ;;  %v169_v4 = vand.u32 4294901760, %v106_v1  ;;  %v173_v5 = vand.u32 4294901760, %v108_v2  ;;  %v107_v6 = vld [vmem:[#allocation8 + $0x10] sm:$0xff]  ;;  %v129_v29 = vld [vmem:[%s10991_s1 + $0x8] sm:$0xff]  ;;  %vm2160_vm2 = vcmask 523264  }
  0x4c   :  { %v171_v7 = vand.u32 4294901760, %v105_v3  ;;  %v175_v8 = vand.u32 4294901760, %v107_v6  ;;  %v128_v16 = vld [vmem:[%s10991_s1] sm:$0xff]  ;;  %v143_v34 = vsel %vm138_vm0, %v129_v29, 0  ;;  %v130_v36 = vld [vmem:[%s10991_s1 + $0x10] sm:$0xff]  ;;  %v131_v40 = vld [vmem:[%s10991_s1 + $0x18] sm:$0xff] }
  0x4d   :  { %v8576_v9 = vsub.f32 %v106_v1, %v169_v4  ;;  %v8578_v10 = vsub.f32 %v108_v2, %v173_v5  ;;  %v140_v26 = vsel %vm138_vm0, %v128_v16, 0  ;;  %v8599_v32 = vpack.c.bf16 %v173_v5, %v169_v4  ;;  %v132_v43 = vld [vmem:[%s10991_s1 + $0x20] sm:$0xff]  ;;  %v133_v46 = vld [vmem:[%s10991_s1 + $0x28] sm:$0xff]  ;;  %v134_v49 = vld [vmem:[%s10991_s1 + $0x30] sm:$0xff]  ;;  %s8448_s16 = smov [#allocation13]  }
  0x4e   :  { %v355_v11 = vsub.f32 %v105_v3, %v171_v7  ;;  %v367_v12 = vsub.f32 %v107_v6, %v175_v8  ;;  %v8597_v31 = vand.u32 4294901760, %v140_v26  ;;  %v8602_v35 = vpack.c.bf16 %v175_v8, %v171_v7  ;;  %v135_v52 = vld [vmem:[%s10991_s1 + $0x38] sm:$0xff]  ;;  %v136_v55 = vld [vmem:[%s10991_s1 + $0x40] sm:$0xff]  ;;  %v137_v58 = vld [vmem:[%s10991_s1 + $0x48] sm:$0xff]  ;;  %s6979_s4 = sshll.u32 %s8448_s16, 4  ;;  %s6980_s4 = int_to_ptr.vmem [resolvable:$true] %s6979_s4 }
  0x4f   :  { %v350_v13 = vand.u32 4294901760, %v8576_v9  ;;  %v362_v14 = vand.u32 4294901760, %v8578_v10  ;;  %v7268_v28 = vpack.c.bf16 %v8578_v10, %v8576_v9  ;;  %7261 = vmatprep.subr.bf16.mxu1 %v8599_v32  ;;  %v8612_v38 = vand.u32 4294901760, %v143_v34  ;;  %v101_v29 = vld [vmem:[#allocation5] sm:$0xff]  ;;  %s8405_s26 = scalar_lea.vmem %s6980_s4, 128  ;;  %p8410_p5 = scmp.lt.s32.totalorder %s6980_s4, %s6980_s4 }
  0x50   :  { %v356_v15 = vand.u32 4294901760, %v355_v11  ;;  %v368_v17 = vand.u32 4294901760, %v367_v12  ;;  %v7270_v33 = vpack.c.bf16 %v367_v12, %v355_v11  ;;  %7263 = vmatpush1.bf16.msra.mxu1 %v8602_v35  ;;  %v146_v39 = vsel %vm138_vm0, %v130_v36, 0  ;;  %p8406_p4 = scmp.ne.s32.totalorder %s6980_s4, %s8405_s26  ;;  %p8411_p6 = scmp.lt.s32.totalorder %s8405_s26, %s8405_s26 }
  0x51   :  { %v351_v18 = vsub.f32 %v8576_v9, %v350_v13  ;;  %v363_v19 = vsub.f32 %v8578_v10, %v362_v14  ;;  %v8621_v41 = vand.u32 4294901760, %v146_v39  ;;  %v149_v42 = vsel %vm138_vm0, %v131_v40, 0 }
  0x52   :  { %v357_v20 = vsub.f32 %v355_v11, %v356_v15  ;;  %v369_v21 = vsub.f32 %v367_v12, %v368_v17  ;;  %v8608_v37 = vpack.c.bf16 %v368_v17, %v356_v15  ;;  %v8629_v44 = vand.u32 4294901760, %v149_v42  ;;  %p8412_p7 = por %p8411_p6, %p8410_p5 }
  0x53   :  { %v352_v22 = vand.u32 4294901760, %v351_v18  ;;  %v364_v23 = vand.u32 4294901760, %v363_v19  ;;  %v152_v45 = vsel %vm138_vm0, %v132_v43, 0  ;;  %v155_v48 = vsel %vm138_vm0, %v133_v46, 0  ;;  %v102_v19 = vld [vmem:[#allocation5 + $0x8] sm:$0xff]  ;;  %v120_v46 = vld [vmem:[%s10990_s0 + $0x10] sm:$0xff] }
  0x54   :  { %v358_v24 = vand.u32 4294901760, %v357_v20  ;;  %v370_v25 = vand.u32 4294901760, %v369_v21  ;;  %v8637_v47 = vand.u32 4294901760, %v152_v45  ;;  %v8645_v50 = vand.u32 4294901760, %v155_v48  ;;  %v104_v20 = vld [vmem:[#allocation5 + $0x18] sm:$0xff]  ;;  %p8413_p8 = pnand %p8412_p7, %p8406_p4 }
  0x55   :  { %v7264_v27 = vpack.c.bf16 %v364_v23, %v352_v22  ;;  %v158_v51 = vsel %vm138_vm0, %v134_v49, 0  ;;  %v161_v54 = vsel %vm138_vm0, %v135_v52, 0  ;;  %v164_v57 = vsel %vm138_vm0, %v136_v55, 0  ;;  %v121_v52 = vld [vmem:[%s10990_s0 + $0x18] sm:$0xff] }
  0x56   :  { %v7266_v30 = vpack.c.bf16 %v370_v25, %v358_v24  ;;  %v8653_v53 = vand.u32 4294901760, %v158_v51  ;;  %v8661_v56 = vand.u32 4294901760, %v161_v54  ;;  %v8669_v59 = vand.u32 4294901760, %v164_v57 }
  0x57   :  { %7265 = vmatprep.subr.bf16.mxu0 %v7264_v27  ;;  %v167_v60 = vsel %vm138_vm0, %v137_v58, 0  ;;  %v8678_v62 = vsub.f32 %v140_v26, %v8597_v31  ;;  %v7276_v63 = vpack.c.bf16 %v362_v14, %v350_v13  ;;  %v8688_v1 = vsub.f32 %v143_v34, %v8612_v38 }
  0x58   :  { %7267 = vmatpush1.bf16.msra.mxu0 %v7266_v30  ;;  %v8674_v61 = vand.u32 4294901760, %v167_v60  ;;  %v8694_v2 = vsub.f32 %v146_v39, %v8621_v41  ;;  %v8699_v3 = vsub.f32 %v149_v42, %v8629_v44  ;;  %v8704_v4 = vsub.f32 %v152_v45, %v8637_v47  ;;  %v103_v30 = vld [vmem:[#allocation5 + $0x10] sm:$0xff] }
  0x59   :  { %7269 = vmatprep.subr.bf16.mxu0 %v7268_v28  ;;  %v8709_v5 = vsub.f32 %v155_v48, %v8645_v50  ;;  %v8714_v6 = vsub.f32 %v158_v51, %v8653_v53  ;;  %v8719_v7 = vsub.f32 %v161_v54, %v8661_v56  ;;  %v8724_v8 = vsub.f32 %v164_v57, %v8669_v59 }
  0x5a   :  { %v8729_v9 = vsub.f32 %v167_v60, %v8674_v61  ;;  %v240_v10 = vand.u32 4294901760, %v8678_v62  ;;  %v251_v11 = vand.u32 4294901760, %v8688_v1  ;;  %v262_v12 = vand.u32 4294901760, %v8694_v2 }
  0x5b   :  { %434 = vmatmul.mubr.f32.vlgmr.msra.gmra.mrb[0].mxu0 %v8597_v31  ;;  %v273_v13 = vand.u32 4294901760, %v8699_v3  ;;  %v284_v14 = vand.u32 4294901760, %v8704_v4  ;;  %v295_v15 = vand.u32 4294901760, %v8709_v5  ;;  %v306_v16 = vand.u32 4294901760, %v8714_v6 }
  0x5c   :  { %7271 = vmatpush1.bf16.msra.mxu0 %v7270_v33  ;;  %439 = vmatprep.mubr.f32.mxu0 %v8443_v0  ;;  %v317_v17 = vand.u32 4294901760, %v8719_v7  ;;  %v328_v18 = vand.u32 4294901760, %v8724_v8  ;;  %v339_v21 = vand.u32 4294901760, %v8729_v9  ;;  %v1131_v22 = vand.u32 4294901760, %v102_v19 }
  0x5d   :  { %7273 = vmatprep.subr.bf16.mxu0 %v8599_v32  ;;  %v1135_v23 = vand.u32 4294901760, %v104_v20  ;;  %v1133_v34 = vand.u32 4294901760, %v101_v29  ;;  %v1108_v51 = vsel %vm138_vm0, %v120_v46, 0  ;;  %v1111_v60 = vsel %vm138_vm0, %v121_v52, 0 }
  0x5e   :  { %v8792_v25 = vsub.f32 %v102_v19, %v1131_v22 }
  0x5f   :  { %441 = vmatmul.mubr.f32.gmra.mrb[2].mxu0 %v8612_v38  ;;  %v8776_v24 = vpack.c.bf16 %v1135_v23, %v1131_v22  ;;  %v8794_v26 = vsub.f32 %v104_v20, %v1135_v23  ;;  %v8883_v22 = vand.u32 4294901760, %v1111_v60 }
  0x60   :  { %446 = vmatprep.mubr.f32.mxu0 %v8443_v0  ;;  %v1312_v27 = vand.u32 4294901760, %v8792_v25 }
  0x61   :  { %v1324_v28 = vand.u32 4294901760, %v8794_v26 }
  0x63   :  { %448 = vmatmul.mubr.f32.gmra.mrb[4].mxu0 %v8621_v41  ;;  %v1325_v33 = vsub.f32 %v8794_v26, %v1324_v28 }
  0x64   :  { %453 = vmatprep.mubr.f32.mxu0 %v8443_v0 }
  0x67   :  { %455 = vmatmul.mubr.f32.gmra.mrb[6].mxu0 %v8629_v44 }
  0x68   :  { %460 = vmatprep.mubr.f32.mxu0 %v8443_v0 }
  0x6b   :  { %462 = vmatmul.mubr.f32.gmra.mrb[8].mxu0 %v8637_v47 }
  0x6c   :  { %467 = vmatprep.mubr.f32.mxu0 %v8443_v0 }
  0x6f   :  { %469 = vmatmul.mubr.f32.gmra.mrb[10].mxu0 %v8645_v50 }
  0x70   :  { %474 = vmatprep.mubr.f32.mxu0 %v8443_v0 }
  0x73   :  { %476 = vmatmul.mubr.f32.gmra.mrb[12].mxu0 %v8653_v53 }
  0x74   :  { %481 = vmatprep.mubr.f32.mxu0 %v8443_v0 }
  0x77   :  { %483 = vmatmul.mubr.f32.gmra.mrb[14].mxu0 %v8661_v56 }
  0x78   :  { %488 = vmatprep.mubr.f32.mxu0 %v8443_v0 }
  0x7b   :  { %490 = vmatmul.mubr.f32.gmra.mrb[16].mxu0 %v8669_v59 }
  0x7c   :  { %495 = vmatprep.mubr.f32.mxu0 %v8443_v0 }
  0x7f   :  { %497 = vmatmul.mubr.f32.gmra.mrb[18].mxu0 %v8674_v61 }
  0x80   :  { %575 = vmatprep.mubr.f32.mxu0 %v8443_v0 }
  0x83   :  { %578 = vmatmul.mubr.f32.vlgmr.msra.gmra.mrb[0].mxu0 %v8678_v62 }
  0x84   :  { %7275 = vmatpush1.bf16.msra.mxu0 %v8602_v35  ;;  %583 = vmatprep.mubr.f32.mxu0 %v8443_v0 }
  0x85   :  { %7277 = vmatprep.subr.bf16.mxu0 %v7276_v63  ;;  %v122_v63 = vld [vmem:[%s10990_s0 + $0x20] sm:$0xff] }
  0x87   :  { %586 = vmatmul.mubr.f32.gmra.mrb[2].mxu0 %v8688_v1 }
  0x88   :  { %591 = vmatprep.mubr.f32.mxu0 %v8443_v0 }
  0x8b   :  { %594 = vmatmul.mubr.f32.gmra.mrb[4].mxu0 %v8694_v2 }
  0x8c   :  { %599 = vmatprep.mubr.f32.mxu0 %v8443_v0 }
  0x8f   :  { %602 = vmatmul.mubr.f32.gmra.mrb[6].mxu0 %v8699_v3 }
  0x90   :  { %607 = vmatprep.mubr.f32.mxu0 %v8443_v0 }
  0x93   :  { %610 = vmatmul.mubr.f32.gmra.mrb[8].mxu0 %v8704_v4 }
  0x94   :  { %615 = vmatprep.mubr.f32.mxu0 %v8443_v0 }
  0x97   :  { %618 = vmatmul.mubr.f32.gmra.mrb[10].mxu0 %v8709_v5 }
  0x98   :  { %623 = vmatprep.mubr.f32.mxu0 %v8443_v0 }
  0x9b   :  { %626 = vmatmul.mubr.f32.gmra.mrb[12].mxu0 %v8714_v6 }
  0x9c   :  { %631 = vmatprep.mubr.f32.mxu0 %v8443_v0 }
  0x9f   :  { %634 = vmatmul.mubr.f32.gmra.mrb[14].mxu0 %v8719_v7 }
  0xa0   :  { %639 = vmatprep.mubr.f32.mxu0 %v8443_v0 }
  0xa3   :  { %642 = vmatmul.mubr.f32.gmra.mrb[16].mxu0 %v8724_v8 }
  0xa4   :  { %647 = vmatprep.mubr.f32.mxu0 %v8443_v0 }
  0xa7   :  { %650 = vmatmul.mubr.f32.gmra.mrb[18].mxu0 %v8729_v9 }
  0xa8   :  { %724 = vmatprep.mubr.f32.mxu0 %v8443_v0 }
  0xab   :  { %728 = vmatmul.mubr.f32.vlgmr.msra.gmra.mrb[0].mxu0 %v240_v10 }
  0xac   :  { %7279 = vmatpush1.bf16.msra.mxu0 %v8608_v37  ;;  %733 = vmatprep.mubr.f32.mxu0 %v8443_v0  ;;  %v1326_v37 = vand.u32 4294901760, %v1325_v33 }
  0xad   :  { %7281 = vmatprep.subr.bf16.mxu0 %v8599_v32  ;;  %v1313_v32 = vsub.f32 %v8792_v25, %v1312_v27 }
  0xaf   :  { %737 = vmatmul.mubr.f32.gmra.mrb[2].mxu0 %v251_v11  ;;  %v1314_v36 = vand.u32 4294901760, %v1313_v32  ;;  %v123_v32 = vld [vmem:[%s10990_s0 + $0x28] sm:$0xff] }
  0xb0   :  { %742 = vmatprep.mubr.f32.mxu0 %v8443_v0 }
  0xb1   :  { %v7288_v40 = vpack.c.bf16 %v1326_v37, %v1314_v36  ;;  %v1117_v37 = vsel %vm138_vm0, %v123_v32, 0 }
  0xb3   :  { %746 = vmatmul.mubr.f32.gmra.mrb[4].mxu0 %v262_v12 }
  0xb4   :  { %751 = vmatprep.mubr.f32.mxu0 %v8443_v0 }
  0xb7   :  { %755 = vmatmul.mubr.f32.gmra.mrb[6].mxu0 %v273_v13 }
  0xb8   :  { %760 = vmatprep.mubr.f32.mxu0 %v8443_v0 }
  0xbb   :  { %764 = vmatmul.mubr.f32.gmra.mrb[8].mxu0 %v284_v14 }
  0xbc   :  { %769 = vmatprep.mubr.f32.mxu0 %v8443_v0 }
  0xbf   :  { %773 = vmatmul.mubr.f32.gmra.mrb[10].mxu0 %v295_v15 }
  0xc0   :  { %778 = vmatprep.mubr.f32.mxu0 %v8443_v0 }
  0xc3   :  { %782 = vmatmul.mubr.f32.gmra.mrb[12].mxu0 %v306_v16 }
  0xc4   :  { %787 = vmatprep.mubr.f32.mxu0 %v8443_v0 }
  0xc7   :  { %791 = vmatmul.mubr.f32.gmra.mrb[14].mxu0 %v317_v17 }
  0xc8   :  { %796 = vmatprep.mubr.f32.mxu0 %v8443_v0 }
  0xcb   :  { %800 = vmatmul.mubr.f32.gmra.mrb[16].mxu0 %v328_v18 }
  0xcc   :  { %805 = vmatprep.mubr.f32.mxu0 %v8443_v0 }
  0xcf   :  { %809 = vmatmul.mubr.f32.gmra.mrb[18].mxu0 %v339_v21 }
  0xd0   :  { %891 = vmatprep.mubr.f32.mxu0 %v8443_v0 }
  0xd3   :  { %893 = vmatmul.mubr.f32.vlgmr.msra.gmra.mrb[0].mxu0 %v8597_v31 }
  0xd4   :  { %7283 = vmatpush1.bf16.msra.mxu0 %v8602_v35  ;;  %898 = vmatprep.mubr.f32.mxu0 %v8443_v0  ;;  %v1137_v35 = vand.u32 4294901760, %v103_v30 }
  0xd5   :  { %7285 = vmatprep.subr.bf16.mxu0 %v8776_v24 }
  0xd6   :  { %v8812_v39 = vpack.c.bf16 %v1137_v35, %v1133_v34  ;;  %v8838_v45 = vsub.f32 %v103_v30, %v1137_v35  ;;  %v1114_v30 = vsel %vm138_vm0, %v122_v63, 0  ;;  %v8896_v35 = vsub.f32 %v1111_v60, %v8883_v22 }
  0xd7   :  { %900 = vmatmul.mubr.f32.gmra.mrb[2].mxu0 %v8612_v38  ;;  %v8898_v36 = vand.u32 4294901760, %v1114_v30 }
  0xd8   :  { %905 = vmatprep.mubr.f32.mxu0 %v8443_v0  ;;  %v1235_v46 = vand.u32 4294901760, %v8896_v35 }
  0xda   :  { %v1236_v63 = vsub.f32 %v8896_v35, %v1235_v46 }
  0xdb   :  { %907 = vmatmul.mubr.f32.gmra.mrb[4].mxu0 %v8621_v41 }
  0xdc   :  { %912 = vmatprep.mubr.f32.mxu0 %v8443_v0 }
  0xdf   :  { %914 = vmatmul.mubr.f32.gmra.mrb[6].mxu0 %v8629_v44 }
  0xe0   :  { %919 = vmatprep.mubr.f32.mxu0 %v8443_v0 }
  0xe3   :  { %921 = vmatmul.mubr.f32.gmra.mrb[8].mxu0 %v8637_v47 }
  0xe4   :  { %926 = vmatprep.mubr.f32.mxu0 %v8443_v0 }
  0xe7   :  { %928 = vmatmul.mubr.f32.gmra.mrb[10].mxu0 %v8645_v50 }
  0xe8   :  { %933 = vmatprep.mubr.f32.mxu0 %v8443_v0 }
  0xeb   :  { %935 = vmatmul.mubr.f32.gmra.mrb[12].mxu0 %v8653_v53 }
  0xec   :  { %940 = vmatprep.mubr.f32.mxu0 %v8443_v0 }
  0xef   :  { %942 = vmatmul.mubr.f32.gmra.mrb[14].mxu0 %v8661_v56 }
  0xf0   :  { %947 = vmatprep.mubr.f32.mxu0 %v8443_v0 }
  0xf3   :  { %949 = vmatmul.mubr.f32.gmra.mrb[16].mxu0 %v8669_v59 }
  0xf4   :  { %954 = vmatprep.mubr.f32.mxu0 %v8443_v0 }
  0xf7   :  { %956 = vmatmul.mubr.f32.gmra.mrb[18].mxu0 %v8674_v61 }
  0xf8   :  { %1030 = vmatprep.mubr.f32.mxu0 %v8443_v0 }
  0xfb   :  { %1032 = vmatmul.mubr.f32.vlgmr.msra.gmra.mrb[0].mxu0 %v8597_v31  ;;  %v118_v31 = vld [vmem:[%s10990_s0] sm:$0xff] }
  0xfc   :  { %7287 = vmatpush1.bf16.msra.mxu0 %v8812_v39  ;;  %1037 = vmatprep.mubr.f32.mxu0 %v8443_v0  ;;  %v1102_v42 = vsel %vm138_vm0, %v118_v31, 0  ;;  %v124_v31 = vld [vmem:[%s10990_s0 + $0x30] sm:$0xff] }
  0xfd   :  { %7289 = vmatprep.subr.bf16.mxu0 %v7288_v40  ;;  %v1120_v52 = vsel %vm138_vm0, %v124_v31, 0 }
  0xff   :  { %1039 = vmatmul.mubr.f32.gmra.mrb[2].mxu0 %v8612_v38  ;;  %v119_v38 = vld [vmem:[%s10990_s0 + $0x8] sm:$0xff] }
 0x100   :  { %1044 = vmatprep.mubr.f32.mxu0 %v8443_v0  ;;  %v1105_v43 = vsel %vm138_vm0, %v119_v38, 0 }
 0x101   :  { %v8847_v48 = vand.u32 4294901760, %v1105_v43 }
 0x103   :  { %1046 = vmatmul.mubr.f32.gmra.mrb[4].mxu0 %v8621_v41  ;;  %v8832_v41 = vand.u32 4294901760, %v1102_v42  ;;  %v8859_v55 = vsub.f32 %v1105_v43, %v8847_v48 }
 0x104   :  { %1051 = vmatprep.mubr.f32.mxu0 %v8443_v0 }
 0x105   :  { %v1213_v19 = vand.u32 4294901760, %v8859_v55 }
 0x107   :  { %1053 = vmatmul.mubr.f32.gmra.mrb[6].mxu0 %v8629_v44  ;;  %v8836_v44 = vsub.f32 %v101_v29, %v1133_v34 }
 0x108   :  { %1058 = vmatprep.mubr.f32.mxu0 %v8443_v0 }
 0x109   :  { %v1318_v49 = vand.u32 4294901760, %v8836_v44 }
 0x10b   :  { %1060 = vmatmul.mubr.f32.gmra.mrb[8].mxu0 %v8637_v47  ;;  %v8845_v47 = vsub.f32 %v1102_v42, %v8832_v41  ;;  %v1319_v57 = vsub.f32 %v8836_v44, %v1318_v49  ;;  %v7292_v42 = vpack.c.bf16 %v8794_v26, %v8792_v25 }
 0x10c   :  { %1065 = vmatprep.mubr.f32.mxu0 %v8443_v0 }
 0x10d   :  { %v1202_v54 = vand.u32 4294901760, %v8845_v47  ;;  %v1320_v23 = vand.u32 4294901760, %v1319_v57  ;;  %v125_v57 = vld [vmem:[%s10990_s0 + $0x38] sm:$0xff] }
 0x10f   :  { %1067 = vmatmul.mubr.f32.gmra.mrb[10].mxu0 %v8645_v50  ;;  %v1330_v50 = vand.u32 4294901760, %v8838_v45 }
 0x110   :  { %1072 = vmatprep.mubr.f32.mxu0 %v8443_v0 }
 0x111   :  { %v1331_v58 = vsub.f32 %v8838_v45, %v1330_v50 }
 0x113   :  { %1074 = vmatmul.mubr.f32.gmra.mrb[12].mxu0 %v8653_v53  ;;  %v8862_v53 = vand.u32 4294901760, %v1108_v51  ;;  %v1332_v29 = vand.u32 4294901760, %v1331_v58 }
 0x114   :  { %1079 = vmatprep.mubr.f32.mxu0 %v8443_v0 }
 0x115   :  { %v8881_v20 = vsub.f32 %v1108_v51, %v8862_v53  ;;  %v7290_v40 = vpack.c.bf16 %v1332_v29, %v1320_v23  ;;  %v8914_v51 = vsub.f32 %v1114_v30, %v8898_v36  ;;  %v8928_v23 = vand.u32 4294901760, %v1120_v52  ;;  %v126_v30 = vld [vmem:[%s10990_s0 + $0x40] sm:$0xff] }
 0x116   :  { %v1123_v29 = vsel %vm138_vm0, %v125_v57, 0  ;;  %v1126_v31 = vsel %vm138_vm0, %v126_v30, 0 }
 0x117   :  { %1081 = vmatmul.mubr.f32.gmra.mrb[14].mxu0 %v8661_v56  ;;  %v1203_v56 = vsub.f32 %v8845_v47, %v1202_v54  ;;  %v1224_v34 = vand.u32 4294901760, %v8881_v20  ;;  %v11058_v25 = vand.u32 4294901760, %v8914_v51 }
 0x118   :  { %1086 = vmatprep.mubr.f32.mxu0 %v8443_v0 }
 0x119   :  { %v1204_v33 = vand.u32 4294901760, %v1203_v56  ;;  %v1225_v43 = vsub.f32 %v8881_v20, %v1224_v34  ;;  %v11004_v56 = vand.u32 4294901760, %v8914_v51 }
 0x11b   :  { %1088 = vmatmul.mubr.f32.gmra.mrb[16].mxu0 %v8669_v59  ;;  %v1214_v59 = vsub.f32 %v8859_v55, %v1213_v19  ;;  %v1226_v60 = vand.u32 4294901760, %v1225_v43 }
 0x11c   :  { %1093 = vmatprep.mubr.f32.mxu0 %v8443_v0 }
 0x11d   :  { %v1215_v38 = vand.u32 4294901760, %v1214_v59  ;;  %v1247_v59 = vsub.f32 %v8914_v51, %v11004_v56 }
 0x11f   :  { %1095 = vmatmul.mubr.f32.gmra.mrb[18].mxu0 %v8674_v61  ;;  %v8907_v61 = vand.u32 4294901760, %v1117_v37  ;;  %v1248_v43 = vand.u32 4294901760, %v1247_v59 }
 0x120   :  { %1199 = vmatprep.mubr.f32.mxu0 %v8443_v0 }
 0x121   :  { %v8922_v58 = vsub.f32 %v1117_v37, %v8907_v61  ;;  %v8940_v37 = vsub.f32 %v1120_v52, %v8928_v23 }
 0x123   :  { %1205 = vmatmul.mubr.f32.vlgmr.msra.gmra.mrb[0].mxu0 %v1204_v33  ;;  %v11005_v32 = vand.u32 4294901760, %v8922_v58  ;;  %v1237_v33 = vand.u32 4294901760, %v1236_v63  ;;  %v11006_v57 = vand.u32 4294901760, %v8940_v37  ;;  %v11060_v26 = vand.u32 4294901760, %v8940_v37 }
 0x124   :  { %7291 = vmatpush1.bf16.msra.mxu0 %v7290_v40  ;;  %1210 = vmatprep.mubr.f32.mxu0 %v8443_v0  ;;  %v8942_v40 = vand.u32 4294901760, %v1123_v29 }
 0x125   :  { %7293 = vmatprep.subr.bf16.mxu0 %v7292_v42  ;;  %v127_v42 = vld [vmem:[%s10990_s0 + $0x48] sm:$0xff]  ;;  %v1269_v56 = vsub.f32 %v8940_v37, %v11006_v57 }
 0x126   :  { %v8954_v52 = vsub.f32 %v1123_v29, %v8942_v40  ;;  %v1129_v63 = vsel %vm138_vm0, %v127_v42, 0 }
 0x127   :  { %1216 = vmatmul.mubr.f32.gmra.mrb[2].mxu0 %v1215_v38  ;;  %v1258_v38 = vsub.f32 %v8922_v58, %v11005_v32  ;;  %v8967_v32 = vand.u32 4294901760, %v1129_v63  ;;  %v1270_v29 = vand.u32 4294901760, %v1269_v56 }
 0x128   :  { %1221 = vmatprep.mubr.f32.mxu0 %v8443_v0 }
 0x129   :  { %v1259_v30 = vand.u32 4294901760, %v1258_v38 }
 0x12b   :  { %1227 = vmatmul.mubr.f32.gmra.mrb[4].mxu0 %v1226_v60  ;;  %v8956_v60 = vand.u32 4294901760, %v1126_v31 }
 0x12c   :  { %1232 = vmatprep.mubr.f32.mxu0 %v8443_v0 }
 0x12d   :  { %v8965_v59 = vsub.f32 %v1126_v31, %v8956_v60 }
 0x12f   :  { %1238 = vmatmul.mubr.f32.gmra.mrb[6].mxu0 %v1237_v33  ;;  %v11007_v33 = vand.u32 4294901760, %v8954_v52  ;;  %v1290_v38 = vand.u32 4294901760, %v8965_v59 }
 0x130   :  { %1243 = vmatprep.mubr.f32.mxu0 %v8443_v0 }
 0x131   :  { %v1280_v42 = vsub.f32 %v8954_v52, %v11007_v33  ;;  %v1291_v57 = vsub.f32 %v8965_v59, %v1290_v38 }
 0x133   :  { %1249 = vmatmul.mubr.f32.gmra.mrb[8].mxu0 %v1248_v43  ;;  %v8975_v43 = vsub.f32 %v1129_v63, %v8967_v32  ;;  %v1281_v31 = vand.u32 4294901760, %v1280_v42  ;;  %v1292_v56 = vand.u32 4294901760, %v1291_v57  ;;  %v241_v63 = vsub.f32 %v8678_v62, %v240_v10  ;;  %v9003_v62 = vld [vmem:[%s10996_s6] ss:$8 sps:$4 sm:$0xff]  }
 0x134   :  { %1254 = vmatprep.mubr.f32.mxu0 %v8443_v0  ;;  %v252_v57 = vsub.f32 %v8688_v1, %v251_v11  ;;  %v7294_v10 = vpack.c.bf16 %v8838_v45, %v8836_v44  ;;  %v263_v1 = vsub.f32 %v8694_v2, %v262_v12  ;;  %v9025_v12 = vld [vmem:[%s10996_s6 + $0x14] ss:$8 sps:$4 sm:$0xff]  }
 0x136   :  { %v264_v11 = vand.u32 4294901760, %v263_v1 }
 0x137   :  { %1260 = vmatmul.mubr.f32.gmra.mrb[10].mxu0 %v1259_v30  ;;  %v11008_v30 = vand.u32 4294901760, %v8975_v43 }
 0x138   :  { %1265 = vmatprep.mubr.f32.mxu0 %v8443_v0 }
 0x139   :  { %v1302_v33 = vsub.f32 %v8975_v43, %v11008_v30  ;;  %v8998_v30 = vld [vmem:[%s10996_s6 + $0x4] ss:$8 sps:$4 sm:$0xff]  }
 0x13a   :  { %2164 = vmatprep.subr.bf16.mxu1 %v8998_v30 }
 0x13b   :  { %1271 = vmatmul.mubr.f32.gmra.mrb[12].mxu0 %v1270_v29  ;;  %v242_v29 = vand.u32 4294901760, %v241_v63  ;;  %v1303_v42 = vand.u32 4294901760, %v1302_v33  ;;  %v274_v33 = vsub.f32 %v8699_v3, %v273_v13  ;;  %v285_v3 = vsub.f32 %v8704_v4, %v284_v14 }
 0x13c   :  { %1276 = vmatprep.mubr.f32.mxu0 %v8443_v0  ;;  %v296_v63 = vsub.f32 %v8709_v5, %v295_v15  ;;  %v307_v14 = vsub.f32 %v8714_v6, %v306_v16  ;;  %v9055_v5 = vld [vmem:[%s10996_s6 + $0x24] ss:$8 sps:$4 sm:$0xff]   ;;  %v9060_v15 = vld [vmem:[%s10996_s6 + $0x20] ss:$8 sps:$4 sm:$0xff]   ;;  %v318_v6 = vsub.f32 %v8719_v7, %v317_v17  ;;  %v9079_v17 = vld [vmem:[%s10996_s6 + $0x34] ss:$8 sps:$4 sm:$0xff]  }
 0x13d   :  { %243 = vmatmul.mubr.f32.vlgmr.msra.gmra.mrb[0].mxu1 %v242_v29  ;;  %v275_v2 = vand.u32 4294901760, %v274_v33  ;;  %v286_v13 = vand.u32 4294901760, %v285_v3 }
 0x13e   :  { %248 = vmatprep.mubr.f32.mxu1 %v8443_v0  ;;  %2165 = vmatpush1.bf16.msra.mxu1 %v9003_v62  ;;  %v297_v4 = vand.u32 4294901760, %v296_v63  ;;  %v308_v29 = vand.u32 4294901760, %v307_v14  ;;  %v319_v16 = vand.u32 4294901760, %v318_v6 }
 0x13f   :  { %1282 = vmatmul.mubr.f32.gmra.mrb[14].mxu0 %v1281_v31  ;;  %v253_v31 = vand.u32 4294901760, %v252_v57  ;;  %2166 = vmatprep.subr.bf16.mxu1 %v9025_v12  ;;  %v9085_v57 = vld [vmem:[%s10996_s6 + $0x30] ss:$8 sps:$4 sm:$0xff]  }
 0x140   :  { %1287 = vmatprep.mubr.f32.mxu0 %v8443_v0 }
 0x141   :  { %254 = vmatmul.mubr.f32.gmra.mrb[2].mxu1 %v253_v31  ;;  %v11011_v31 = vmov 0  }
 0x142   :  { %259 = vmatprep.mubr.f32.mxu1 %v8443_v0 }
 0x143   :  { %1293 = vmatmul.mubr.f32.gmra.mrb[16].mxu0 %v1292_v56  ;;  %v9031_v56 = vld [vmem:[%s10996_s6 + $0x10] ss:$8 sps:$4 sm:$0xff]  }
 0x144   :  { %1298 = vmatprep.mubr.f32.mxu0 %v8443_v0  ;;  %2167 = vmatpush1.bf16.msra.mxu1 %v9031_v56 }
 0x145   :  { %265 = vmatmul.mubr.f32.gmra.mrb[4].mxu1 %v264_v11  ;;  %2168 = vmatprep.subr.bf16.mxu1 %v9055_v5 }
 0x146   :  { %270 = vmatprep.mubr.f32.mxu1 %v8443_v0 }
 0x147   :  { %1304 = vmatmul.mubr.f32.gmra.mrb[18].mxu0 %v1303_v42  ;;  %v329_v42 = vsub.f32 %v8724_v8, %v328_v18  ;;  %v340_v8 = vsub.f32 %v8729_v9, %v339_v21  ;;  %v7300_v9 = vpack.c.bf16 %v1324_v28, %v1312_v27  ;;  %v7302_v21 = vpack.c.bf16 %v1330_v50, %v1318_v49 }
 0x148   :  { %1394 = vmatprep.mubr.f32.mxu0 %v8443_v0  ;;  %2169 = vmatpush1.bf16.msra.mxu1 %v9060_v15  ;;  %v11061_v27 = vand.u32 4294901760, %v8954_v52  ;;  %v11062_v28 = vand.u32 4294901760, %v8975_v43 }
 0x149   :  { %276 = vmatmul.mubr.f32.gmra.mrb[6].mxu1 %v275_v2  ;;  %v330_v7 = vand.u32 4294901760, %v329_v42  ;;  %2170 = vmatprep.subr.bf16.mxu1 %v9079_v17  ;;  %v341_v18 = vand.u32 4294901760, %v340_v8 }
 0x14a   :  { %281 = vmatprep.mubr.f32.mxu1 %v8443_v0 }
 0x14b   :  { %1396 = vmatmul.mubr.f32.vlgmr.msra.gmra.mrb[0].mxu0 %v8832_v41 }
 0x14c   :  { %7295 = vmatpush1.bf16.msra.mxu0 %v7294_v10  ;;  %1401 = vmatprep.mubr.f32.mxu0 %v8443_v0 }
 0x14d   :  { %7297 = vmatprep.subr.bf16.mxu0 %v8776_v24  ;;  %287 = vmatmul.mubr.f32.gmra.mrb[8].mxu1 %v286_v13 }
 0x14e   :  { %292 = vmatprep.mubr.f32.mxu1 %v8443_v0  ;;  %2171 = vmatpush1.bf16.msra.mxu1 %v9085_v57 }
 0x14f   :  { %1403 = vmatmul.mubr.f32.gmra.mrb[2].mxu0 %v8847_v48  ;;  %2258 = vmatprep.subr.bf16.mxu1 %v8998_v30 }
 0x150   :  { %1408 = vmatprep.mubr.f32.mxu0 %v8443_v0 }
 0x151   :  { %298 = vmatmul.mubr.f32.gmra.mrb[10].mxu1 %v297_v4 }
 0x152   :  { %303 = vmatprep.mubr.f32.mxu1 %v8443_v0 }
 0x153   :  { %1410 = vmatmul.mubr.f32.gmra.mrb[4].mxu0 %v8862_v53 }
 0x154   :  { %1415 = vmatprep.mubr.f32.mxu0 %v8443_v0 }
 0x155   :  { %309 = vmatmul.mubr.f32.gmra.mrb[12].mxu1 %v308_v29 }
 0x156   :  { %314 = vmatprep.mubr.f32.mxu1 %v8443_v0 }
 0x157   :  { %1417 = vmatmul.mubr.f32.gmra.mrb[6].mxu0 %v8883_v22 }
 0x158   :  { %1422 = vmatprep.mubr.f32.mxu0 %v8443_v0 }
 0x159   :  { %320 = vmatmul.mubr.f32.gmra.mrb[14].mxu1 %v319_v16 }
 0x15a   :  { %325 = vmatprep.mubr.f32.mxu1 %v8443_v0 }
 0x15b   :  { %1424 = vmatmul.mubr.f32.gmra.mrb[8].mxu0 %v8898_v36 }
 0x15c   :  { %1429 = vmatprep.mubr.f32.mxu0 %v8443_v0 }
 0x15d   :  { %331 = vmatmul.mubr.f32.gmra.mrb[16].mxu1 %v330_v7 }
 0x15e   :  { %336 = vmatprep.mubr.f32.mxu1 %v8443_v0 }
 0x15f   :  { %1431 = vmatmul.mubr.f32.gmra.mrb[10].mxu0 %v8907_v61 }
 0x160   :  { %1436 = vmatprep.mubr.f32.mxu0 %v8443_v0 }
 0x161   :  { %342 = vmatmul.mubr.f32.gmra.mrb[18].mxu1 %v341_v18 }
 0x162   :  { %2196 = vmatprep.mubr.bf16.mxu1 %v11011_v31 }
 0x163   :  { %1438 = vmatmul.mubr.f32.gmra.mrb[12].mxu0 %v8928_v23 }
 0x164   :  { %1443 = vmatprep.mubr.f32.mxu0 %v8443_v0 }
 0x165   :  { %2197 = vmatmul.mubr.bf16.vlgmr.msra.gmra.mrb[20].mxu1 %v11011_v31 }
 0x166   :  { %2259 = vmatpush1.bf16.msra.mxu1 %v9003_v62  ;;  %2290 = vmatprep.mubr.bf16.mxu1 %v11011_v31 }
 0x167   :  { %1445 = vmatmul.mubr.f32.gmra.mrb[14].mxu0 %v8942_v40  ;;  %2260 = vmatprep.subr.bf16.mxu1 %v9025_v12 }
 0x168   :  { %1450 = vmatprep.mubr.f32.mxu0 %v8443_v0 }
 0x16a   :  { %2261 = vmatpush1.bf16.msra.mxu1 %v9031_v56 }
 0x16b   :  { %1452 = vmatmul.mubr.f32.gmra.mrb[16].mxu0 %v8956_v60  ;;  %2262 = vmatprep.subr.bf16.mxu1 %v9055_v5 }
 0x16c   :  { %1457 = vmatprep.mubr.f32.mxu0 %v8443_v0 }
 0x16e   :  { %2263 = vmatpush1.bf16.msra.mxu1 %v9060_v15 }
 0x16f   :  { %1459 = vmatmul.mubr.f32.gmra.mrb[18].mxu0 %v8967_v32  ;;  %2264 = vmatprep.subr.bf16.mxu1 %v9079_v17 }
 0x170   :  { %1537 = vmatprep.mubr.f32.mxu0 %v8443_v0 }
 0x172   :  { %2265 = vmatpush1.bf16.msra.mxu1 %v9085_v57 }
 0x173   :  { %1540 = vmatmul.mubr.f32.vlgmr.msra.gmra.mrb[0].mxu0 %v8845_v47  ;;  %2357 = vmatprep.subr.bf16.mxu1 %v8998_v30 }
 0x174   :  { %7299 = vmatpush1.bf16.msra.mxu0 %v8812_v39  ;;  %1545 = vmatprep.mubr.f32.mxu0 %v8443_v0 }
 0x175   :  { %7301 = vmatprep.subr.bf16.mxu0 %v7300_v9 }
 0x177   :  { %1548 = vmatmul.mubr.f32.gmra.mrb[2].mxu0 %v8859_v55 }
 0x178   :  { %1553 = vmatprep.mubr.f32.mxu0 %v8443_v0 }
 0x17b   :  { %1556 = vmatmul.mubr.f32.gmra.mrb[4].mxu0 %v8881_v20 }
 0x17c   :  { %1561 = vmatprep.mubr.f32.mxu0 %v8443_v0 }
 0x17f   :  { %1564 = vmatmul.mubr.f32.gmra.mrb[6].mxu0 %v8896_v35 }
 0x180   :  { %1569 = vmatprep.mubr.f32.mxu0 %v8443_v0 }
 0x183   :  { %1572 = vmatmul.mubr.f32.gmra.mrb[8].mxu0 %v8914_v51 }
 0x184   :  { %1577 = vmatprep.mubr.f32.mxu0 %v8443_v0 }
 0x187   :  { %1580 = vmatmul.mubr.f32.gmra.mrb[10].mxu0 %v8922_v58 }
 0x188   :  { %1585 = vmatprep.mubr.f32.mxu0 %v8443_v0 }
 0x18b   :  { %1588 = vmatmul.mubr.f32.gmra.mrb[12].mxu0 %v8940_v37 }
 0x18c   :  { %1593 = vmatprep.mubr.f32.mxu0 %v8443_v0 }
 0x18f   :  { %1596 = vmatmul.mubr.f32.gmra.mrb[14].mxu0 %v8954_v52 }
 0x190   :  { %1601 = vmatprep.mubr.f32.mxu0 %v8443_v0 }
 0x193   :  { %1604 = vmatmul.mubr.f32.gmra.mrb[16].mxu0 %v8965_v59  ;;  %v109_v59 = vld [vmem:[%s10995_s5] sm:$0x3]  ;;  %s8445_s5 = smov 64  }
 0x194   :  { %1609 = vmatprep.mubr.f32.mxu0 %v8443_v0 }
 0x197   :  { %1612 = vmatmul.mubr.f32.gmra.mrb[18].mxu0 %v8975_v43 }
 0x198   :  { %1686 = vmatprep.mubr.f32.mxu0 %v8443_v0 }
 0x19b   :  { %1690 = vmatmul.mubr.f32.vlgmr.msra.gmra.mrb[0].mxu0 %v1202_v54 }
 0x19c   :  { %7303 = vmatpush1.bf16.msra.mxu0 %v7302_v21  ;;  %1695 = vmatprep.mubr.f32.mxu0 %v8443_v0 }
 0x19d   :  { %7305 = vmatprep.subr.bf16.mxu0 %v8776_v24  ;;  %v11059_v24 = vand.u32 4294901760, %v8922_v58 }
 0x19f   :  { %1699 = vmatmul.mubr.f32.gmra.mrb[2].mxu0 %v1213_v19 }
 0x1a0   :  { %1704 = vmatprep.mubr.f32.mxu0 %v8443_v0 }
 0x1a3   :  { %1708 = vmatmul.mubr.f32.gmra.mrb[4].mxu0 %v1224_v34 }
 0x1a4   :  { %1713 = vmatprep.mubr.f32.mxu0 %v8443_v0 }
 0x1a7   :  { %1717 = vmatmul.mubr.f32.gmra.mrb[6].mxu0 %v1235_v46 }
 0x1a8   :  { %1722 = vmatprep.mubr.f32.mxu0 %v8443_v0 }
 0x1ab   :  { %1726 = vmatmul.mubr.f32.gmra.mrb[8].mxu0 %v11058_v25 }
 0x1ac   :  { %1731 = vmatprep.mubr.f32.mxu0 %v8443_v0 }
 0x1af   :  { %1735 = vmatmul.mubr.f32.gmra.mrb[10].mxu0 %v11059_v24 }
 0x1b0   :  { %1740 = vmatprep.mubr.f32.mxu0 %v8443_v0 }
 0x1b3   :  { %1744 = vmatmul.mubr.f32.gmra.mrb[12].mxu0 %v11060_v26 }
 0x1b4   :  { %1749 = vmatprep.mubr.f32.mxu0 %v8443_v0 }
 0x1b7   :  { %1753 = vmatmul.mubr.f32.gmra.mrb[14].mxu0 %v11061_v27 }
 0x1b8   :  { %1758 = vmatprep.mubr.f32.mxu0 %v8443_v0 }
 0x1bb   :  { %1762 = vmatmul.mubr.f32.gmra.mrb[16].mxu0 %v1290_v38 }
 0x1bc   :  { %1767 = vmatprep.mubr.f32.mxu0 %v8443_v0 }
 0x1bf   :  { %1771 = vmatmul.mubr.f32.gmra.mrb[18].mxu0 %v11062_v28 }
 0x1c0   :  { %1853 = vmatprep.mubr.f32.mxu0 %v8443_v0 }
 0x1c3   :  { %1855 = vmatmul.mubr.f32.vlgmr.msra.gmra.mrb[0].mxu0 %v8832_v41 }
 0x1c4   :  { %7307 = vmatpush1.bf16.msra.mxu0 %v8812_v39  ;;  %1860 = vmatprep.mubr.f32.mxu0 %v8443_v0 }
 0x1c7   :  { %1862 = vmatmul.mubr.f32.gmra.mrb[2].mxu0 %v8847_v48 }
 0x1c8   :  { %1867 = vmatprep.mubr.f32.mxu0 %v8443_v0 }
 0x1cb   :  { %1869 = vmatmul.mubr.f32.gmra.mrb[4].mxu0 %v8862_v53 }
 0x1cc   :  { %1874 = vmatprep.mubr.f32.mxu0 %v8443_v0 }
 0x1cf   :  { %1876 = vmatmul.mubr.f32.gmra.mrb[6].mxu0 %v8883_v22 }
 0x1d0   :  { %1881 = vmatprep.mubr.f32.mxu0 %v8443_v0 }
 0x1d3   :  { %1883 = vmatmul.mubr.f32.gmra.mrb[8].mxu0 %v8898_v36 }
 0x1d4   :  { %1888 = vmatprep.mubr.f32.mxu0 %v8443_v0 }
 0x1d7   :  { %1890 = vmatmul.mubr.f32.gmra.mrb[10].mxu0 %v8907_v61 }
 0x1d8   :  { %1895 = vmatprep.mubr.f32.mxu0 %v8443_v0 }
 0x1db   :  { %1897 = vmatmul.mubr.f32.gmra.mrb[12].mxu0 %v8928_v23 }
 0x1dc   :  { %1902 = vmatprep.mubr.f32.mxu0 %v8443_v0 }
 0x1df   :  { %1904 = vmatmul.mubr.f32.gmra.mrb[14].mxu0 %v8942_v40 }
 0x1e0   :  { %1909 = vmatprep.mubr.f32.mxu0 %v8443_v0 }
 0x1e3   :  { %1911 = vmatmul.mubr.f32.gmra.mrb[16].mxu0 %v8956_v60 }
 0x1e4   :  { %1916 = vmatprep.mubr.f32.mxu0 %v8443_v0 }
 0x1e7   :  { %1918 = vmatmul.mubr.f32.gmra.mrb[18].mxu0 %v8967_v32 }
 0x1e8   :  { %1992 = vmatprep.mubr.f32.mxu0 %v8443_v0 }
 0x1eb   :  { %1994 = vmatmul.mubr.f32.vlgmr.msra.gmra.mrb[0].mxu0 %v8832_v41 }
 0x1ec   :  { %1999 = vmatprep.mubr.f32.mxu0 %v8443_v0 }
 0x1ef   :  { %2001 = vmatmul.mubr.f32.gmra.mrb[2].mxu0 %v8847_v48 }
 0x1f0   :  { %2006 = vmatprep.mubr.f32.mxu0 %v8443_v0 }
 0x1f3   :  { %2008 = vmatmul.mubr.f32.gmra.mrb[4].mxu0 %v8862_v53 }
 0x1f4   :  { %2013 = vmatprep.mubr.f32.mxu0 %v8443_v0 }
 0x1f7   :  { %2015 = vmatmul.mubr.f32.gmra.mrb[6].mxu0 %v8883_v22 }
 0x1f8   :  { %2020 = vmatprep.mubr.f32.mxu0 %v8443_v0 }
 0x1fb   :  { %2022 = vmatmul.mubr.f32.gmra.mrb[8].mxu0 %v8898_v36 }
 0x1fc   :  { %2027 = vmatprep.mubr.f32.mxu0 %v8443_v0 }
 0x1ff   :  { %2029 = vmatmul.mubr.f32.gmra.mrb[10].mxu0 %v8907_v61 }
 0x200   :  { %2034 = vmatprep.mubr.f32.mxu0 %v8443_v0 }
 0x203   :  { %2036 = vmatmul.mubr.f32.gmra.mrb[12].mxu0 %v8928_v23 }
 0x204   :  { %2041 = vmatprep.mubr.f32.mxu0 %v8443_v0 }
 0x207   :  { %2043 = vmatmul.mubr.f32.gmra.mrb[14].mxu0 %v8942_v40  ;;  %v2064_v40 = vlaneseq }
 0x208   :  { %2048 = vmatprep.mubr.f32.mxu0 %v8443_v0 }
 0x209   :  { %v9226_v52 = vshrl.u32 %v2064_v40, 7 }
 0x20b   :  { %2050 = vmatmul.mubr.f32.gmra.mrb[16].mxu0 %v8956_v60  ;;  %v11010_v60 = vsub.s32 0, %v9226_v52  ;;  %v11009_v38 = vsub.s32 1, %v9226_v52 }
 0x20c   :  { %2055 = vmatprep.mubr.f32.mxu0 %v8443_v0 }
 0x20d   :  { %v9235_v43 = vrot.slane %v109_v59, %v11010_v60  ;;  %v9239_v1 = vrot.slane %v109_v59, %v11009_v38 }
 0x20f   :  { %2057 = vmatmul.mubr.f32.gmra.mrb[18].mxu0 %v8967_v32 }
 0x210   :  { %5555 = vmatprep.mubr.bf16.mxu0 %v11011_v31  ;;  %v244_v39 = vpop.f32.mrb[0].mxu1 }
 0x211   :  { %v246_v41 = vpop.f32.mrb[1].mxu1 }
 0x214   :  { %v255_v44 = vpop.f32.mrb[2].mxu1 }
 0x215   :  { %v257_v45 = vpop.f32.mrb[3].mxu1 }
 0x218   :  { %v266_v47 = vpop.f32.mrb[4].mxu1 }
 0x219   :  { %v268_v48 = vpop.f32.mrb[5].mxu1 }
 0x21c   :  { %v277_v49 = vpop.f32.mrb[6].mxu1 }
 0x21d   :  { %v279_v50 = vpop.f32.mrb[7].mxu1 }
 0x220   :  { %v288_v54 = vpop.f32.mrb[8].mxu1 }
 0x221   :  { %v290_v55 = vpop.f32.mrb[9].mxu1 }
 0x224   :  { %v299_v53 = vpop.f32.mrb[10].mxu1 }
 0x225   :  { %v301_v19 = vpop.f32.mrb[11].mxu1 }
 0x228   :  { %v310_v20 = vpop.f32.mrb[12].mxu1 }
 0x229   :  { %v9212_v22 = vpop.f32.mrb[13].mxu1 }
 0x22c   :  { %v9214_v34 = vpop.f32.mrb[14].mxu1 }
 0x22d   :  { %v9216_v35 = vpop.f32.mrb[15].mxu1 }
 0x230   :  { %v9218_v36 = vpop.f32.mrb[16].mxu1 }
 0x231   :  { %v9220_v61 = vpop.f32.mrb[17].mxu1 }
 0x234   :  { %v9222_v46 = vpop.f32.mrb[18].mxu1 }
 0x235   :  { %v9224_v51 = vpop.f32.mrb[19].mxu1 }
 0x238   :  { %v2198_v58 = vpop.f32.mrb[20].mxu1 }
 0x239   :  { %v2200_v23 = vpop.f32.mrb[21].mxu1 }
 0x23a   :  { %v2202_v32 = vpop.f32.mrb[22].mxu1 }
 0x23b   :  { %v2203_v37 = vpop.f32.mrb[23].mxu1 }
 0x2be   :  { %v1995_v10 = vpop.f32.mrb[0].mxu0 }
 0x2bf   :  { %v7572_v11 = vadd.f32 %v1995_v10, %v244_v39  ;;  %v1997_v33 = vpop.f32.mrb[1].mxu0 }
 0x2c0   :  { %v7573_v2 = vadd.f32 %v1997_v33, %v246_v41 }
 0x2c1   :  { %v2074_v3 = vadd.f32 %v7572_v11, %v9235_v43 }
 0x2c2   :  { %v2075_v13 = vadd.f32 %v7573_v2, %v9239_v1  ;;  %v2002_v63 = vpop.f32.mrb[2].mxu0 }
 0x2c3   :  { %v2205_v4 = vadd.f32 %v2198_v58, %v2074_v3  ;;  %v7574_v14 = vadd.f32 %v2002_v63, %v255_v44  ;;  %v2004_v29 = vpop.f32.mrb[3].mxu0 }
 0x2c4   :  { %v9243_v6 = vadd.f32 %v2200_v23, %v2075_v13  ;;  %v7575_v16 = vadd.f32 %v2004_v29, %v257_v45 }
 0x2c5   :  { %v9246_v42 = vadd.f32 %v7574_v14, %v9235_v43 }
 0x2c6   :  { %8061 = vtanh.f32 %v9243_v6  ;;  %v2009_v7 = vpop.f32.mrb[4].mxu0  ;;  %v9250_v8 = vadd.f32 %v7575_v16, %v9239_v1 }
 0x2c7   :  { %v7576_v18 = vadd.f32 %v2009_v7, %v266_v47  ;;  %v2011_v9 = vpop.f32.mrb[5].mxu0 }
 0x2c8   :  { %v7577_v21 = vadd.f32 %v2011_v9, %v268_v48 }
 0x2c9   :  { %v9253_v25 = vadd.f32 %v7576_v18, %v9235_v43 }
 0x2ca   :  { %v2016_v24 = vpop.f32.mrb[6].mxu0  ;;  %v9256_v26 = vadd.f32 %v7577_v21, %v9239_v1 }
 0x2cb   :  { %v7578_v27 = vadd.f32 %v2016_v24, %v277_v49  ;;  %v2018_v28 = vpop.f32.mrb[7].mxu0 }
 0x2cc   :  { %v7579_v39 = vadd.f32 %v2018_v28, %v279_v50 }
 0x2cd   :  { %v9259_v41 = vadd.f32 %v7578_v27, %v9235_v43 }
 0x2ce   :  { %v2023_v44 = vpop.f32.mrb[8].mxu0  ;;  %v9262_v45 = vadd.f32 %v7579_v39, %v9239_v1  ;;  %v7007_v39 = vmul.f32 -1.442695, %v2205_v4 }
 0x2cf   :  { %v7580_v47 = vadd.f32 %v2023_v44, %v288_v54  ;;  %v2025_v58 = vpop.f32.mrb[9].mxu0 }
 0x2d0   :  { %v8062_v48 = vpop.eup %8061  ;;  %v7581_v23 = vadd.f32 %v2025_v58, %v290_v55  ;;  %8063 = vpow2.f32 %v7007_v39 }
 0x2d1   :  { %2222 = vrot.lane.b32.xlu0 %v8062_v48, %s8445_s5  ;;  %v9266_v32 = vadd.f32 %v7580_v47, %v9235_v43 }
 0x2d2   :  { %v2030_v49 = vpop.f32.mrb[10].mxu0  ;;  %v9269_v50 = vadd.f32 %v7581_v23, %v9239_v1 }
 0x2d3   :  { %v7582_v37 = vadd.f32 %v2030_v49, %v299_v53  ;;  %v2032_v40 = vpop.f32.mrb[11].mxu0 }
 0x2d4   :  { %v7583_v59 = vadd.f32 %v2032_v40, %v301_v19 }
 0x2d5   :  { %v9272_v10 = vadd.f32 %v7582_v37, %v9235_v43  ;;  %v2119_v37 = vld [vmem:[%s10992_s2] sm:$0xff] }
 0x2d6   :  { %v2037_v54 = vpop.f32.mrb[12].mxu0  ;;  %v9275_v11 = vadd.f32 %v7583_v59, %v9239_v1  ;;  %vm2237_vm1 = vcmp.gt.f32.partialorder %v2119_v37, 0.5 }
 0x2d7   :  { %v7584_v55 = vadd.f32 %v2037_v54, %v310_v20  ;;  %v2039_v33 = vpop.f32.mrb[13].mxu0 }
 0x2d8   :  { %v7585_v2 = vadd.f32 %v2039_v33, %v9212_v22 }
 0x2d9   :  { %v9279_v3 = vadd.f32 %v7584_v55, %v9235_v43 }
 0x2da   :  { %v2044_v13 = vpop.f32.mrb[14].mxu0  ;;  %v9282_v63 = vadd.f32 %v7585_v2, %v9239_v1 }
 0x2db   :  { %v7586_v53 = vadd.f32 %v2044_v13, %v9214_v34  ;;  %v2046_v19 = vpop.f32.mrb[15].mxu0 }
 0x2dc   :  { %v7587_v14 = vadd.f32 %v2046_v19, %v9216_v35 }
 0x2dd   :  { %v9287_v29 = vadd.f32 %v7586_v53, %v9235_v43 }
 0x2de   :  { %v2051_v16 = vpop.f32.mrb[16].mxu0  ;;  %v9290_v20 = vadd.f32 %v7587_v14, %v9239_v1 }
 0x2df   :  { %v7588_v22 = vadd.f32 %v2051_v16, %v9218_v36  ;;  %v2053_v7 = vpop.f32.mrb[17].mxu0 }
 0x2e0   :  { %v7589_v18 = vadd.f32 %v2053_v7, %v9220_v61  ;;  %v8064_v61 = vpop.eup %8063 }
 0x2e1   :  { %v9295_v9 = vadd.f32 %v7588_v22, %v9235_v43  ;;  %v2213_v44 = vadd.f32 1.0, %v8064_v61 }
 0x2e2   :  { %v2058_v21 = vpop.f32.mrb[18].mxu0  ;;  %v9298_v34 = vadd.f32 %v7589_v18, %v9239_v1 }
 0x2e3   :  { %v7590_v35 = vadd.f32 %v2058_v21, %v9222_v46  ;;  %v2060_v24 = vpop.f32.mrb[19].mxu0  ;;  %8065 = vrcp.f32 %v2213_v44 }
 0x2e4   :  { %v7591_v27 = vadd.f32 %v2060_v24, %v9224_v51 }
 0x2e5   :  { %v9303_v28 = vadd.f32 %v7590_v35, %v9235_v43  ;;  %v7008_v43 = vmul.f32 -1.442695, %v9243_v6 }
 0x2e6   :  { %v9306_v36 = vadd.f32 %v7591_v27, %v9239_v1 }
 0x2ed   :  { %v8066_v47 = vpop.eup %8065 }
 0x2ee   :  { %v2220_v46 = vmul.f32 0.0, %v8066_v47 }
 0x343   :  { %v2223_v58 = vpop.permute.xlu0 %2222 }
 0x344   :  { %v2225_v48 = vmul.f32 %v8066_v47, %v2223_v58 }
 0x346   :  { %2227 = vrot.lane.b32.xlu0 %v2225_v48, %s8445_s5 }
 0x3b8   :  { %v2228_v23 = vpop.permute.xlu0 %2227 }
 0x3b9   :  { %v2230_v49 = vadd.f32 %v2228_v23, %v2220_v46  ;;  %v7009_v46 = vld [vmem:[%s10992_s2 + $0x8] sm:$0xff] }
 0x3ba   :  { %vm2335_vm3 = vcmp.gt.f32.partialorder %v7009_v46, 0.5 }
 0x3bb   :  { %8067 = vtanh.f32 %v2230_v49 }
 0x3bc   :  { %8069 = vpow2.f32 %v7008_v43 }
 0x3c5   :  { %v8068_v51 = vpop.eup %8067 }
 0x3c6   :  { %2233 = vrot.lane.b32.xlu1 %v8068_v51, %s8445_s5  ;;  %v8070_v1 = vpop.eup %8069 }
 0x3c7   :  { %v2214_v4 = vadd.f32 1.0, %v8070_v1 }
 0x3c9   :  { %8071 = vrcp.f32 %v2214_v4 }
 0x3ca   :  { %2240 = vrot.lane.b32.xlu1 %v2230_v49, %s8445_s5 }
 0x3d3   :  { %v8072_v40 = vpop.eup %8071 }
 0x438   :  { %v2234_v59 = vpop.permute.xlu1 %2233 }
 0x439   :  { %v2236_v54 = vmul.f32 %v8072_v40, %v2234_v59 }
 0x43b   :  { %v2238_v55 = vsel %vm2237_vm1, %v2236_v54, 0.0 }
 0x43c   :  { %2244 = vst.msk [vmem:[#allocation3] sm:$0xff] %vm2160_vm2, %v2238_v55  ;;  %2246 = vst.msk [vmem:[#allocation4 + $0x48] sm:$0xff] %vm2160_vm2, %v2238_v55  ;;  %v2254_v33 = vpack.c.bf16 %v2238_v55, %v2238_v55  ;;  %v2241_v6 = vpop.permute.xlu1 %2240 }
 0x43d   :  { %v2243_v2 = vsel %vm2237_vm1, %v2241_v6, 0.0 }
 0x43e   :  { %7010 = vmatmul.mubr.msk.bf16.vlgmr.msra.gmra.mrb[24].mxu1 %vm2160_vm2, %v2254_v33  ;;  %2315 = vrot.lane.b32.xlu1 %v2243_v2, %s8445_s5 }
 0x43f   :  { %2358 = vmatpush1.bf16.msra.mxu1 %v9003_v62  ;;  %2389 = vmatprep.mubr.bf16.mxu1 %v11011_v31 }
 0x440   :  { %2359 = vmatprep.subr.bf16.mxu1 %v9025_v12 }
 0x443   :  { %2360 = vmatpush1.bf16.msra.mxu1 %v9031_v56 }
 0x444   :  { %2361 = vmatprep.subr.bf16.mxu1 %v9055_v5 }
 0x447   :  { %2362 = vmatpush1.bf16.msra.mxu1 %v9060_v15 }
 0x448   :  { %2363 = vmatprep.subr.bf16.mxu1 %v9079_v17 }
 0x44b   :  { %2364 = vmatpush1.bf16.msra.mxu1 %v9085_v57 }
 0x44c   :  { %2456 = vmatprep.subr.bf16.mxu1 %v8998_v30 }
 0x511   :  { %v2292_v13 = vpop.f32.mrb[24].mxu1 }
 0x512   :  { %v2299_v53 = vadd.f32 %v2292_v13, %v9246_v42  ;;  %v2294_v19 = vpop.f32.mrb[25].mxu1  ;;  %v2316_v42 = vpop.permute.xlu1 %2315 }
 0x513   :  { %v2300_v14 = vadd.f32 %v2294_v19, %v9250_v8  ;;  %v2296_v16 = vpop.f32.mrb[26].mxu1 }
 0x514   :  { %v2297_v22 = vpop.f32.mrb[27].mxu1  ;;  %v7011_v18 = vmul.f32 -1.442695, %v2299_v53 }
 0x515   :  { %8073 = vtanh.f32 %v2300_v14  ;;  %v7012_v58 = vmul.f32 -1.442695, %v2300_v14 }
 0x516   :  { %8075 = vpow2.f32 %v7011_v18 }
 0x51f   :  { %v8074_v7 = vpop.eup %8073 }
 0x520   :  { %2320 = vrot.lane.b32.xlu0 %v8074_v7, %s8445_s5  ;;  %v8076_v21 = vpop.eup %8075 }
 0x521   :  { %v2307_v35 = vadd.f32 1.0, %v8076_v21 }
 0x523   :  { %8077 = vrcp.f32 %v2307_v35 }
 0x52d   :  { %v8078_v24 = vpop.eup %8077 }
 0x52e   :  { %v2318_v61 = vmul.f32 %v8078_v24, %v2316_v42 }
 0x592   :  { %v2321_v27 = vpop.permute.xlu0 %2320 }
 0x593   :  { %v2323_v39 = vmul.f32 %v8078_v24, %v2321_v27 }
 0x595   :  { %2325 = vrot.lane.b32.xlu0 %v2323_v39, %s8445_s5  ;;  %v7013_v39 = vld [vmem:[%s10992_s2 + $0x10] sm:$0xff] }
 0x596   :  { %vm2434_vm4 = vcmp.gt.f32.partialorder %v7013_v39, 0.5 }
 0x607   :  { %v2326_v44 = vpop.permute.xlu0 %2325 }
 0x608   :  { %v2328_v8 = vadd.f32 %v2326_v44, %v2318_v61 }
 0x60a   :  { %8079 = vtanh.f32 %v2328_v8  ;;  %2338 = vrot.lane.b32.xlu0 %v2328_v8, %s8445_s5 }
 0x60b   :  { %8081 = vpow2.f32 %v7012_v58 }
 0x614   :  { %v8080_v47 = vpop.eup %8079 }
 0x615   :  { %2331 = vrot.lane.b32.xlu1 %v8080_v47, %s8445_s5  ;;  %v8082_v48 = vpop.eup %8081 }
 0x616   :  { %v2308_v23 = vadd.f32 1.0, %v8082_v48 }
 0x618   :  { %8083 = vrcp.f32 %v2308_v23 }
 0x622   :  { %v8084_v43 = vpop.eup %8083 }
 0x67c   :  { %v2339_v49 = vpop.permute.xlu0 %2338 }
 0x67d   :  { %v2341_v51 = vsel %vm2335_vm3, %v2339_v49, %v2243_v2 }
 0x67e   :  { %2414 = vrot.lane.b32.xlu0 %v2341_v51, %s8445_s5 }
 0x687   :  { %v2332_v1 = vpop.permute.xlu1 %2331 }
 0x688   :  { %v2334_v4 = vmul.f32 %v8084_v43, %v2332_v1 }
 0x68a   :  { %v2336_v37 = vsel %vm2335_vm3, %v2334_v4, %v2238_v55 }
 0x68b   :  { %2343 = vst.msk [vmem:[#allocation3 + $0x8] sm:$0xff] %vm2160_vm2, %v2336_v37  ;;  %2345 = vst.msk [vmem:[#allocation4 + $0x40] sm:$0xff] %vm2160_vm2, %v2336_v37  ;;  %v2353_v40 = vpack.c.bf16 %v2336_v37, %v2336_v37 }
 0x68d   :  { %7014 = vmatmul.mubr.msk.bf16.vlgmr.msra.gmra.mrb[28].mxu1 %vm2160_vm2, %v2353_v40 }
 0x68e   :  { %2457 = vmatpush1.bf16.msra.mxu1 %v9003_v62  ;;  %2488 = vmatprep.mubr.bf16.mxu1 %v11011_v31 }
 0x68f   :  { %2458 = vmatprep.subr.bf16.mxu1 %v9025_v12 }
 0x692   :  { %2459 = vmatpush1.bf16.msra.mxu1 %v9031_v56 }
 0x693   :  { %2460 = vmatprep.subr.bf16.mxu1 %v9055_v5 }
 0x696   :  { %2461 = vmatpush1.bf16.msra.mxu1 %v9060_v15 }
 0x697   :  { %2462 = vmatprep.subr.bf16.mxu1 %v9079_v17 }
 0x69a   :  { %2463 = vmatpush1.bf16.msra.mxu1 %v9085_v57 }
 0x69b   :  { %2555 = vmatprep.subr.bf16.mxu1 %v8998_v30 }
 0x760   :  { %v2391_v59 = vpop.f32.mrb[28].mxu1 }
 0x761   :  { %v2398_v54 = vadd.f32 %v2391_v59, %v9253_v25  ;;  %v2393_v55 = vpop.f32.mrb[29].mxu1  ;;  %v2415_v25 = vpop.permute.xlu0 %2414 }
 0x762   :  { %v2399_v33 = vadd.f32 %v2393_v55, %v9256_v26  ;;  %v2395_v6 = vpop.f32.mrb[30].mxu1 }
 0x763   :  { %v2396_v2 = vpop.f32.mrb[31].mxu1  ;;  %v7015_v53 = vmul.f32 -1.442695, %v2398_v54 }
 0x764   :  { %8085 = vtanh.f32 %v2399_v33  ;;  %v7016_v24 = vmul.f32 -1.442695, %v2399_v33 }
 0x765   :  { %8087 = vpow2.f32 %v7015_v53 }
 0x76e   :  { %v8086_v13 = vpop.eup %8085 }
 0x76f   :  { %2419 = vrot.lane.b32.xlu1 %v8086_v13, %s8445_s5  ;;  %v8088_v19 = vpop.eup %8087 }
 0x770   :  { %v2406_v14 = vadd.f32 1.0, %v8088_v19 }
 0x772   :  { %8089 = vrcp.f32 %v2406_v14 }
 0x77c   :  { %v8090_v16 = vpop.eup %8089 }
 0x77d   :  { %v2417_v18 = vmul.f32 %v8090_v16, %v2415_v25 }
 0x7e1   :  { %v2420_v22 = vpop.permute.xlu1 %2419 }
 0x7e2   :  { %v2422_v7 = vmul.f32 %v8090_v16, %v2420_v22  ;;  %v7017_v16 = vld [vmem:[%s10992_s2 + $0x18] sm:$0xff] }
 0x7e3   :  { %vm2533_vm5 = vcmp.gt.f32.partialorder %v7017_v16, 0.5 }
 0x7e4   :  { %2424 = vrot.lane.b32.xlu1 %v2422_v7, %s8445_s5 }
 0x856   :  { %v2425_v21 = vpop.permute.xlu1 %2424 }
 0x857   :  { %v2427_v26 = vadd.f32 %v2425_v21, %v2417_v18 }
 0x859   :  { %8091 = vtanh.f32 %v2427_v26  ;;  %2437 = vrot.lane.b32.xlu1 %v2427_v26, %s8445_s5 }
 0x85a   :  { %8093 = vpow2.f32 %v7016_v24 }
 0x863   :  { %v8092_v35 = vpop.eup %8091 }
 0x864   :  { %2430 = vrot.lane.b32.xlu0 %v8092_v35, %s8445_s5  ;;  %v8094_v27 = vpop.eup %8093 }
 0x865   :  { %v2407_v42 = vadd.f32 1.0, %v8094_v27 }
 0x867   :  { %8095 = vrcp.f32 %v2407_v42 }
 0x871   :  { %v8096_v8 = vpop.eup %8095 }
 0x8cb   :  { %v2438_v61 = vpop.permute.xlu1 %2437 }
 0x8cc   :  { %v2440_v44 = vsel %vm2434_vm4, %v2438_v61, %v2341_v51 }
 0x8cd   :  { %2513 = vrot.lane.b32.xlu1 %v2440_v44, %s8445_s5 }
 0x8d6   :  { %v2431_v47 = vpop.permute.xlu0 %2430 }
 0x8d7   :  { %v2433_v58 = vmul.f32 %v8096_v8, %v2431_v47 }
 0x8d9   :  { %v2435_v48 = vsel %vm2434_vm4, %v2433_v58, %v2336_v37 }
 0x8da   :  { %2442 = vst.msk [vmem:[#allocation3 + $0x10] sm:$0xff] %vm2160_vm2, %v2435_v48  ;;  %2444 = vst.msk [vmem:[#allocation4 + $0x38] sm:$0xff] %vm2160_vm2, %v2435_v48  ;;  %v2452_v46 = vpack.c.bf16 %v2435_v48, %v2435_v48 }
 0x8dc   :  { %7018 = vmatmul.mubr.msk.bf16.vlgmr.msra.gmra.mrb[32].mxu1 %vm2160_vm2, %v2452_v46 }
 0x8dd   :  { %2556 = vmatpush1.bf16.msra.mxu1 %v9003_v62  ;;  %2587 = vmatprep.mubr.bf16.mxu1 %v11011_v31 }
 0x8de   :  { %2557 = vmatprep.subr.bf16.mxu1 %v9025_v12 }
 0x8e1   :  { %2558 = vmatpush1.bf16.msra.mxu1 %v9031_v56 }
 0x8e2   :  { %2559 = vmatprep.subr.bf16.mxu1 %v9055_v5 }
 0x8e5   :  { %2560 = vmatpush1.bf16.msra.mxu1 %v9060_v15 }
 0x8e6   :  { %2561 = vmatprep.subr.bf16.mxu1 %v9079_v17 }
 0x8e9   :  { %2562 = vmatpush1.bf16.msra.mxu1 %v9085_v57 }
 0x8ea   :  { %2654 = vmatprep.subr.bf16.mxu1 %v8998_v30 }
 0x9af   :  { %v2490_v23 = vpop.f32.mrb[32].mxu1 }
 0x9b0   :  { %v2497_v49 = vadd.f32 %v2490_v23, %v9259_v41  ;;  %v2492_v51 = vpop.f32.mrb[33].mxu1  ;;  %v2514_v41 = vpop.permute.xlu1 %2513 }
 0x9b1   :  { %v2498_v43 = vadd.f32 %v2492_v51, %v9262_v45  ;;  %v2494_v1 = vpop.f32.mrb[34].mxu1 }
 0x9b2   :  { %v2495_v4 = vpop.f32.mrb[35].mxu1  ;;  %v7019_v40 = vmul.f32 -1.442695, %v2497_v49 }
 0x9b3   :  { %8097 = vtanh.f32 %v2498_v43  ;;  %v7020_v19 = vmul.f32 -1.442695, %v2498_v43 }
 0x9b4   :  { %8099 = vpow2.f32 %v7019_v40 }
 0x9bd   :  { %v8098_v37 = vpop.eup %8097 }
 0x9be   :  { %2518 = vrot.lane.b32.xlu0 %v8098_v37, %s8445_s5  ;;  %v8100_v59 = vpop.eup %8099  ;;  %v7021_v37 = vld [vmem:[%s10992_s2 + $0x20] sm:$0xff] }
 0x9bf   :  { %v2505_v54 = vadd.f32 1.0, %v8100_v59  ;;  %vm2632_vm6 = vcmp.gt.f32.partialorder %v7021_v37, 0.5 }
 0x9c1   :  { %8101 = vrcp.f32 %v2505_v54 }
 0x9cb   :  { %v8102_v55 = vpop.eup %8101 }
 0x9cc   :  { %v2516_v2 = vmul.f32 %v8102_v55, %v2514_v41 }
 0xa30   :  { %v2519_v33 = vpop.permute.xlu0 %2518 }
 0xa31   :  { %v2521_v6 = vmul.f32 %v8102_v55, %v2519_v33 }
 0xa33   :  { %2523 = vrot.lane.b32.xlu0 %v2521_v6, %s8445_s5 }
 0xaa5   :  { %v2524_v13 = vpop.permute.xlu0 %2523 }
 0xaa6   :  { %v2526_v45 = vadd.f32 %v2524_v13, %v2516_v2  ;;  %v9410_v13 = vld [vmem:[%s10996_s6] ss:$8 sps:$4 sm:$0xff]  }
 0xaa8   :  { %8103 = vtanh.f32 %v2526_v45  ;;  %2536 = vrot.lane.b32.xlu0 %v2526_v45, %s8445_s5  ;;  %v9423_v45 = vld [vmem:[%s10996_s6 + $0x4] ss:$8 sps:$4 sm:$0xff]  }
 0xaa9   :  { %8105 = vpow2.f32 %v7020_v19 }
 0xab2   :  { %v8104_v53 = vpop.eup %8103 }
 0xab3   :  { %2529 = vrot.lane.b32.xlu1 %v8104_v53, %s8445_s5  ;;  %v8106_v14 = vpop.eup %8105 }
 0xab4   :  { %v2506_v22 = vadd.f32 1.0, %v8106_v14 }
 0xab6   :  { %8107 = vrcp.f32 %v2506_v22 }
 0xac0   :  { %v8108_v18 = vpop.eup %8107 }
 0xb1a   :  { %v2537_v7 = vpop.permute.xlu0 %2536 }
 0xb1b   :  { %v2539_v25 = vsel %vm2533_vm5, %v2537_v7, %v2440_v44 }
 0xb1c   :  { %2612 = vrot.lane.b32.xlu0 %v2539_v25, %s8445_s5 }
 0xb25   :  { %v2530_v21 = vpop.permute.xlu1 %2529 }
 0xb26   :  { %v2532_v26 = vmul.f32 %v8108_v18, %v2530_v21 }
 0xb28   :  { %v2534_v35 = vsel %vm2533_vm5, %v2532_v26, %v2435_v48 }
 0xb29   :  { %2541 = vst.msk [vmem:[#allocation3 + $0x18] sm:$0xff] %vm2160_vm2, %v2534_v35  ;;  %2543 = vst.msk [vmem:[#allocation4 + $0x30] sm:$0xff] %vm2160_vm2, %v2534_v35  ;;  %v2551_v24 = vpack.c.bf16 %v2534_v35, %v2534_v35 }
 0xb2b   :  { %7022 = vmatmul.mubr.msk.bf16.vlgmr.msra.gmra.mrb[36].mxu1 %vm2160_vm2, %v2551_v24 }
 0xb2c   :  { %2655 = vmatpush1.bf16.msra.mxu1 %v9003_v62  ;;  %2686 = vmatprep.mubr.bf16.mxu1 %v11011_v31 }
 0xb2d   :  { %2656 = vmatprep.subr.bf16.mxu1 %v9025_v12 }
 0xb30   :  { %2657 = vmatpush1.bf16.msra.mxu1 %v9031_v56 }
 0xb31   :  { %2658 = vmatprep.subr.bf16.mxu1 %v9055_v5 }
 0xb34   :  { %2659 = vmatpush1.bf16.msra.mxu1 %v9060_v15 }
 0xb35   :  { %2660 = vmatprep.subr.bf16.mxu1 %v9079_v17 }
 0xb38   :  { %2661 = vmatpush1.bf16.msra.mxu1 %v9085_v57 }
 0xb39   :  { %2753 = vmatprep.subr.bf16.mxu1 %v8998_v30 }
 0xbfe   :  { %v2589_v27 = vpop.f32.mrb[36].mxu1 }
 0xbff   :  { %v2596_v39 = vadd.f32 %v2589_v27, %v9266_v32  ;;  %v2591_v62 = vpop.f32.mrb[37].mxu1  ;;  %v2613_v32 = vpop.permute.xlu0 %2612  ;;  %v7025_v27 = vld [vmem:[%s10992_s2 + $0x28] sm:$0xff] }
 0xc00   :  { %v2597_v42 = vadd.f32 %v2591_v62, %v9269_v50  ;;  %v2593_v61 = vpop.f32.mrb[38].mxu1  ;;  %vm2731_vm7 = vcmp.gt.f32.partialorder %v7025_v27, 0.5 }
 0xc01   :  { %v2594_v44 = vpop.f32.mrb[39].mxu1  ;;  %v7023_v47 = vmul.f32 -1.442695, %v2596_v39 }
 0xc02   :  { %8109 = vtanh.f32 %v2597_v42  ;;  %v7024_v1 = vmul.f32 -1.442695, %v2597_v42 }
 0xc03   :  { %8111 = vpow2.f32 %v7023_v47 }
 0xc0c   :  { %v8110_v8 = vpop.eup %8109 }
 0xc0d   :  { %2617 = vrot.lane.b32.xlu1 %v8110_v8, %s8445_s5  ;;  %v8112_v58 = vpop.eup %8111 }
 0xc0e   :  { %v2604_v48 = vadd.f32 1.0, %v8112_v58 }
 0xc10   :  { %8113 = vrcp.f32 %v2604_v48  ;;  %v9444_v48 = vld [vmem:[%s10996_s6 + $0x14] ss:$8 sps:$4 sm:$0xff]  }
 0xc1a   :  { %v8114_v46 = vpop.eup %8113 }
 0xc1b   :  { %v2615_v49 = vmul.f32 %v8114_v46, %v2613_v32  ;;  %v9468_v32 = vld [vmem:[%s10996_s6 + $0x34] ss:$8 sps:$4 sm:$0xff]  }
 0xc7f   :  { %v2618_v23 = vpop.permute.xlu1 %2617 }
 0xc80   :  { %v2620_v30 = vmul.f32 %v8114_v46, %v2618_v23  ;;  %v9450_v46 = vld [vmem:[%s10996_s6 + $0x10] ss:$8 sps:$4 sm:$0xff]   ;;  %v9456_v23 = vld [vmem:[%s10996_s6 + $0x24] ss:$8 sps:$4 sm:$0xff]  }
 0xc82   :  { %2622 = vrot.lane.b32.xlu1 %v2620_v30, %s8445_s5  ;;  %v9462_v30 = vld [vmem:[%s10996_s6 + $0x20] ss:$8 sps:$4 sm:$0xff]  }
 0xcf4   :  { %v2623_v51 = vpop.permute.xlu1 %2622 }
 0xcf5   :  { %v2625_v50 = vadd.f32 %v2623_v51, %v2615_v49  ;;  %v9474_v49 = vld [vmem:[%s10996_s6 + $0x30] ss:$8 sps:$4 sm:$0xff]  }
 0xcf7   :  { %8115 = vtanh.f32 %v2625_v50  ;;  %2635 = vrot.lane.b32.xlu1 %v2625_v50, %s8445_s5 }
 0xcf8   :  { %8117 = vpow2.f32 %v7024_v1 }
 0xd01   :  { %v8116_v43 = vpop.eup %8115 }
 0xd02   :  { %2628 = vrot.lane.b32.xlu0 %v8116_v43, %s8445_s5  ;;  %v8118_v4 = vpop.eup %8117 }
 0xd03   :  { %v2605_v40 = vadd.f32 1.0, %v8118_v4 }
 0xd05   :  { %8119 = vrcp.f32 %v2605_v40 }
 0xd0f   :  { %v8120_v55 = vpop.eup %8119 }
 0xd69   :  { %v2636_v59 = vpop.permute.xlu1 %2635 }
 0xd6a   :  { %v2638_v54 = vsel %vm2632_vm6, %v2636_v59, %v2539_v25 }
 0xd6b   :  { %2711 = vrot.lane.b32.xlu1 %v2638_v54, %s8445_s5 }
 0xd74   :  { %v2629_v33 = vpop.permute.xlu0 %2628 }
 0xd75   :  { %v2631_v6 = vmul.f32 %v8120_v55, %v2629_v33 }
 0xd77   :  { %v2633_v41 = vsel %vm2632_vm6, %v2631_v6, %v2534_v35  ;;  %vm8447_vm6 = vmmov 0  }
 0xd78   :  { %2640 = vst.msk [vmem:[#allocation3 + $0x20] sm:$0xff] %vm2160_vm2, %v2633_v41  ;;  %2642 = vst.msk [vmem:[#allocation4 + $0x28] sm:$0xff] %vm2160_vm2, %v2633_v41  ;;  %v2650_v2 = vpack.c.bf16 %v2633_v41, %v2633_v41 }
 0xd7a   :  { %7026 = vmatmul.mubr.msk.bf16.vlgmr.msra.gmra.mrb[40].mxu1 %vm2160_vm2, %v2650_v2 }
 0xd7b   :  { %2754 = vmatpush1.bf16.msra.mxu1 %v9410_v13  ;;  %2785 = vmatprep.mubr.bf16.mxu1 %v11011_v31 }
 0xd7c   :  { %2755 = vmatprep.subr.bf16.mxu1 %v9025_v12 }
 0xd7f   :  { %2756 = vmatpush1.bf16.msra.mxu1 %v9031_v56 }
 0xd80   :  { %2757 = vmatprep.subr.bf16.mxu1 %v9055_v5 }
 0xd83   :  { %2758 = vmatpush1.bf16.msra.mxu1 %v9060_v15 }
 0xd84   :  { %2759 = vmatprep.subr.bf16.mxu1 %v9079_v17 }
 0xd87   :  { %2760 = vmatpush1.bf16.msra.mxu1 %v9085_v57 }
 0xd88   :  { %2852 = vmatprep.subr.bf16.mxu1 %v9423_v45 }
 0xe4d   :  { %v2688_v53 = vpop.f32.mrb[40].mxu1 }
 0xe4e   :  { %v2695_v12 = vadd.f32 %v2688_v53, %v9272_v10  ;;  %v2690_v19 = vpop.f32.mrb[41].mxu1  ;;  %v2712_v10 = vpop.permute.xlu1 %2711 }
 0xe4f   :  { %v2696_v56 = vadd.f32 %v2690_v19, %v9275_v11  ;;  %v2692_v5 = vpop.f32.mrb[42].mxu1 }
 0xe50   :  { %v2693_v14 = vpop.f32.mrb[43].mxu1  ;;  %v7027_v17 = vmul.f32 -1.442695, %v2695_v12  ;;  %v7029_v5 = vld [vmem:[%s10992_s2 + $0x30] sm:$0xff] }
 0xe51   :  { %8121 = vtanh.f32 %v2696_v56  ;;  %v7028_v35 = vmul.f32 -1.442695, %v2696_v56  ;;  %vm2830_vm8 = vcmp.gt.f32.partialorder %v7029_v5, 0.5 }
 0xe52   :  { %8123 = vpow2.f32 %v7027_v17 }
 0xe5b   :  { %v8122_v15 = vpop.eup %8121 }
 0xe5c   :  { %2716 = vrot.lane.b32.xlu0 %v8122_v15, %s8445_s5  ;;  %v8124_v57 = vpop.eup %8123 }
 0xe5d   :  { %v2703_v16 = vadd.f32 1.0, %v8124_v57 }
 0xe5f   :  { %8125 = vrcp.f32 %v2703_v16 }
 0xe69   :  { %v8126_v22 = vpop.eup %8125 }
 0xe6a   :  { %v2714_v18 = vmul.f32 %v8126_v22, %v2712_v10 }
 0xece   :  { %v2717_v7 = vpop.permute.xlu0 %2716 }
 0xecf   :  { %v2719_v25 = vmul.f32 %v8126_v22, %v2717_v7 }
 0xed1   :  { %2721 = vrot.lane.b32.xlu0 %v2719_v25, %s8445_s5 }
 0xf43   :  { %v2722_v21 = vpop.permute.xlu0 %2721 }
 0xf44   :  { %v2724_v11 = vadd.f32 %v2722_v21, %v2714_v18 }
 0xf46   :  { %8127 = vtanh.f32 %v2724_v11  ;;  %2734 = vrot.lane.b32.xlu0 %v2724_v11, %s8445_s5 }
 0xf47   :  { %8129 = vpow2.f32 %v7028_v35 }
 0xf50   :  { %v8128_v26 = vpop.eup %8127 }
 0xf51   :  { %2727 = vrot.lane.b32.xlu1 %v8128_v26, %s8445_s5  ;;  %v8130_v24 = vpop.eup %8129 }
 0xf52   :  { %v2704_v39 = vadd.f32 1.0, %v8130_v24 }
 0xf54   :  { %8131 = vrcp.f32 %v2704_v39 }
 0xf5e   :  { %v8132_v61 = vpop.eup %8131 }
 0xfb8   :  { %v2735_v62 = vpop.permute.xlu0 %2734 }
 0xfb9   :  { %v2737_v42 = vsel %vm2731_vm7, %v2735_v62, %v2638_v54 }
 0xfba   :  { %2810 = vrot.lane.b32.xlu0 %v2737_v42, %s8445_s5 }
 0xfc3   :  { %v2728_v44 = vpop.permute.xlu1 %2727 }
 0xfc4   :  { %v2730_v8 = vmul.f32 %v8132_v61, %v2728_v44 }
 0xfc6   :  { %v2732_v47 = vsel %vm2731_vm7, %v2730_v8, %v2633_v41 }
 0xfc7   :  { %2739 = vst.msk [vmem:[#allocation3 + $0x28] sm:$0xff] %vm2160_vm2, %v2732_v47  ;;  %2741 = vst.msk [vmem:[#allocation4 + $0x20] sm:$0xff] %vm2160_vm2, %v2732_v47  ;;  %v2749_v58 = vpack.c.bf16 %v2732_v47, %v2732_v47 }
 0xfc9   :  { %7030 = vmatmul.mubr.msk.bf16.vlgmr.msra.gmra.mrb[44].mxu1 %vm2160_vm2, %v2749_v58 }
 0xfca   :  { %2853 = vmatpush1.bf16.msra.mxu1 %v9410_v13  ;;  %2884 = vmatprep.mubr.bf16.mxu1 %v11011_v31 }
 0xfcb   :  { %2854 = vmatprep.subr.bf16.mxu1 %v9444_v48 }
 0xfce   :  { %2855 = vmatpush1.bf16.msra.mxu1 %v9450_v46 }
 0xfcf   :  { %2856 = vmatprep.subr.bf16.mxu1 %v9456_v23 }
 0xfd2   :  { %2857 = vmatpush1.bf16.msra.mxu1 %v9462_v30 }
 0xfd3   :  { %2858 = vmatprep.subr.bf16.mxu1 %v9468_v32 }
 0xfd6   :  { %2859 = vmatpush1.bf16.msra.mxu1 %v9474_v49 }
 0xfd7   :  { %2951 = vmatprep.subr.bf16.mxu1 %v9423_v45 }
0x109c   :  { %v2787_v51 = vpop.f32.mrb[44].mxu1 }
0x109d   :  { %v2794_v50 = vadd.f32 %v2787_v51, %v9279_v3  ;;  %v2789_v43 = vpop.f32.mrb[45].mxu1  ;;  %v2811_v3 = vpop.permute.xlu0 %2810 }
0x109e   :  { %v2795_v1 = vadd.f32 %v2789_v43, %v9282_v63  ;;  %v2791_v4 = vpop.f32.mrb[46].mxu1 }
0x109f   :  { %v2792_v37 = vpop.f32.mrb[47].mxu1  ;;  %v7031_v59 = vmul.f32 -1.442695, %v2794_v50  ;;  %v7033_v50 = vld [vmem:[%s10992_s2 + $0x38] sm:$0xff] }
0x10a0   :  { %8133 = vtanh.f32 %v2795_v1  ;;  %v7032_v19 = vmul.f32 -1.442695, %v2795_v1  ;;  %vm2929_vm9 = vcmp.gt.f32.partialorder %v7033_v50, 0.5  ;;  %v3148_v50 = vld [vmem:[%s10998_s8] sm:$0xff] }
0x10a1   :  { %8135 = vpow2.f32 %v7031_v59 }
0x10aa   :  { %v8134_v40 = vpop.eup %8133 }
0x10ab   :  { %2815 = vrot.lane.b32.xlu1 %v8134_v40, %s8445_s5  ;;  %v8136_v54 = vpop.eup %8135 }
0x10ac   :  { %v2802_v55 = vadd.f32 1.0, %v8136_v54 }
0x10ae   :  { %8137 = vrcp.f32 %v2802_v55 }
0x10b8   :  { %v8138_v33 = vpop.eup %8137 }
0x10b9   :  { %v2813_v2 = vmul.f32 %v8138_v33, %v2811_v3 }
0x111d   :  { %v2816_v6 = vpop.permute.xlu1 %2815 }
0x111e   :  { %v2818_v41 = vmul.f32 %v8138_v33, %v2816_v6 }
0x1120   :  { %2820 = vrot.lane.b32.xlu1 %v2818_v41, %s8445_s5 }
0x1192   :  { %v2821_v53 = vpop.permute.xlu1 %2820 }
0x1193   :  { %v2823_v63 = vadd.f32 %v2821_v53, %v2813_v2 }
0x1195   :  { %8139 = vtanh.f32 %v2823_v63  ;;  %2833 = vrot.lane.b32.xlu1 %v2823_v63, %s8445_s5 }
0x1196   :  { %8141 = vpow2.f32 %v7032_v19 }
0x119f   :  { %v8140_v12 = vpop.eup %8139 }
0x11a0   :  { %2826 = vrot.lane.b32.xlu0 %v8140_v12, %s8445_s5  ;;  %v8142_v56 = vpop.eup %8141 }
0x11a1   :  { %v2803_v14 = vadd.f32 1.0, %v8142_v56 }
0x11a3   :  { %8143 = vrcp.f32 %v2803_v14  ;;  %v7037_v14 = vld [vmem:[%s10992_s2 + $0x40] sm:$0xff] }
0x11a4   :  { %vm3028_vm10 = vcmp.gt.f32.partialorder %v7037_v14, 0.5 }
0x11ad   :  { %v8144_v57 = vpop.eup %8143 }
0x1207   :  { %v2834_v15 = vpop.permute.xlu1 %2833 }
0x1208   :  { %v2836_v17 = vsel %vm2830_vm8, %v2834_v15, %v2737_v42 }
0x1209   :  { %2909 = vrot.lane.b32.xlu1 %v2836_v17, %s8445_s5 }
0x1212   :  { %v2827_v16 = vpop.permute.xlu0 %2826 }
0x1213   :  { %v2829_v22 = vmul.f32 %v8144_v57, %v2827_v16 }
0x1215   :  { %v2831_v7 = vsel %vm2830_vm8, %v2829_v22, %v2732_v47 }
0x1216   :  { %2838 = vst.msk [vmem:[#allocation3 + $0x30] sm:$0xff] %vm2160_vm2, %v2831_v7  ;;  %2840 = vst.msk [vmem:[#allocation4 + $0x18] sm:$0xff] %vm2160_vm2, %v2831_v7  ;;  %v2848_v25 = vpack.c.bf16 %v2831_v7, %v2831_v7 }
0x1218   :  { %7034 = vmatmul.mubr.msk.bf16.vlgmr.msra.gmra.mrb[48].mxu1 %vm2160_vm2, %v2848_v25 }
0x1219   :  { %2952 = vmatpush1.bf16.msra.mxu1 %v9410_v13  ;;  %2983 = vmatprep.mubr.bf16.mxu1 %v11011_v31 }
0x121a   :  { %2953 = vmatprep.subr.bf16.mxu1 %v9444_v48 }
0x121d   :  { %2954 = vmatpush1.bf16.msra.mxu1 %v9450_v46 }
0x121e   :  { %2955 = vmatprep.subr.bf16.mxu1 %v9456_v23 }
0x1221   :  { %2956 = vmatpush1.bf16.msra.mxu1 %v9462_v30 }
0x1222   :  { %2957 = vmatprep.subr.bf16.mxu1 %v9468_v32 }
0x1225   :  { %2958 = vmatpush1.bf16.msra.mxu1 %v9474_v49 }
0x1226   :  { %3050 = vmatprep.subr.bf16.mxu1 %v9423_v45 }
0x12eb   :  { %v2886_v10 = vpop.f32.mrb[48].mxu1 }
0x12ec   :  { %v2893_v18 = vadd.f32 %v2886_v10, %v9287_v29  ;;  %v2888_v21 = vpop.f32.mrb[49].mxu1  ;;  %v2910_v29 = vpop.permute.xlu1 %2909 }
0x12ed   :  { %v2894_v11 = vadd.f32 %v2888_v21, %v9290_v20  ;;  %v2890_v26 = vpop.f32.mrb[50].mxu1 }
0x12ee   :  { %v2891_v35 = vpop.f32.mrb[51].mxu1  ;;  %v7035_v27 = vmul.f32 -1.442695, %v2893_v18 }
0x12ef   :  { %8145 = vtanh.f32 %v2894_v11  ;;  %v7036_v58 = vmul.f32 -1.442695, %v2894_v11 }
0x12f0   :  { %8147 = vpow2.f32 %v7035_v27 }
0x12f9   :  { %v8146_v24 = vpop.eup %8145 }
0x12fa   :  { %2914 = vrot.lane.b32.xlu0 %v8146_v24, %s8445_s5  ;;  %v8148_v39 = vpop.eup %8147 }
0x12fb   :  { %v2901_v62 = vadd.f32 1.0, %v8148_v39 }
0x12fd   :  { %8149 = vrcp.f32 %v2901_v62 }
0x1307   :  { %v8150_v42 = vpop.eup %8149 }
0x1308   :  { %v2912_v44 = vmul.f32 %v8150_v42, %v2910_v29 }
0x136c   :  { %v2915_v61 = vpop.permute.xlu0 %2914 }
0x136d   :  { %v2917_v45 = vmul.f32 %v8150_v42, %v2915_v61 }
0x136f   :  { %2919 = vrot.lane.b32.xlu0 %v2917_v45, %s8445_s5 }
0x13e1   :  { %v2920_v8 = vpop.permute.xlu0 %2919 }
0x13e2   :  { %v2922_v20 = vadd.f32 %v2920_v8, %v2912_v44 }
0x13e4   :  { %8151 = vtanh.f32 %v2922_v20  ;;  %2932 = vrot.lane.b32.xlu0 %v2922_v20, %s8445_s5  ;;  %v9551_v20 = vld [vmem:[%s10998_s8 + $0x8] sm:$0xff] }
0x13e5   :  { %8153 = vpow2.f32 %v7036_v58  ;;  %v3223_v58 = vand.u32 4294901760, %v9551_v20 }
0x13ee   :  { %v8152_v47 = vpop.eup %8151 }
0x13ef   :  { %2925 = vrot.lane.b32.xlu1 %v8152_v47, %s8445_s5  ;;  %v8154_v51 = vpop.eup %8153  ;;  %v9556_v47 = vld [vmem:[%s10998_s8 + $0x18] sm:$0xff] }
0x13f0   :  { %v2902_v43 = vadd.f32 1.0, %v8154_v51  ;;  %v3227_v51 = vand.u32 4294901760, %v9556_v47 }
0x13f2   :  { %8155 = vrcp.f32 %v2902_v43  ;;  %v3150_v43 = vld [vmem:[%s10998_s8 + $0x10] sm:$0xff] }
0x13fc   :  { %v8156_v37 = vpop.eup %8155 }
0x1456   :  { %v2933_v1 = vpop.permute.xlu0 %2932 }
0x1457   :  { %v2935_v4 = vsel %vm2929_vm9, %v2933_v1, %v2836_v17  ;;  %v3225_v1 = vand.u32 4294901760, %v3148_v50 }
0x1458   :  { %3008 = vrot.lane.b32.xlu0 %v2935_v4, %s8445_s5 }
0x1461   :  { %v2926_v40 = vpop.permute.xlu1 %2925 }
0x1462   :  { %v2928_v59 = vmul.f32 %v8156_v37, %v2926_v40  ;;  %v3153_v37 = vld [vmem:[%s10998_s8 + $0x28] sm:$0xff]  ;;  %v3155_v40 = vld [vmem:[%s10998_s8 + $0x38] sm:$0xff] }
0x1464   :  { %v2930_v54 = vsel %vm2929_vm9, %v2928_v59, %v2831_v7  ;;  %v3152_v59 = vld [vmem:[%s10998_s8 + $0x20] sm:$0xff] }
0x1465   :  { %2937 = vst.msk [vmem:[#allocation3 + $0x38] sm:$0xff] %vm2160_vm2, %v2930_v54  ;;  %2939 = vst.msk [vmem:[#allocation4 + $0x10] sm:$0xff] %vm2160_vm2, %v2930_v54  ;;  %v2947_v55 = vpack.c.bf16 %v2930_v54, %v2930_v54 }
0x1467   :  { %7038 = vmatmul.mubr.msk.bf16.vlgmr.msra.gmra.mrb[52].mxu1 %vm2160_vm2, %v2947_v55  ;;  %v3231_v55 = vand.u32 4294901760, %v3153_v37 }
0x1468   :  { %3051 = vmatpush1.bf16.msra.mxu1 %v9410_v13  ;;  %3082 = vmatprep.mubr.bf16.mxu1 %v11011_v31 }
0x1469   :  { %3052 = vmatprep.subr.bf16.mxu1 %v9444_v48 }
0x146c   :  { %3053 = vmatpush1.bf16.msra.mxu1 %v9450_v46 }
0x146d   :  { %3054 = vmatprep.subr.bf16.mxu1 %v9456_v23 }
0x1470   :  { %3055 = vmatpush1.bf16.msra.mxu1 %v9462_v30 }
0x1471   :  { %3056 = vmatprep.subr.bf16.mxu1 %v9468_v32 }
0x1474   :  { %3057 = vmatpush1.bf16.msra.mxu1 %v9474_v49 }
0x153a   :  { %v2985_v33 = vpop.f32.mrb[52].mxu1 }
0x153b   :  { %v2992_v6 = vadd.f32 %v2985_v33, %v9295_v9  ;;  %v2987_v41 = vpop.f32.mrb[53].mxu1  ;;  %v3009_v9 = vpop.permute.xlu0 %3008  ;;  %v3154_v33 = vld [vmem:[%s10998_s8 + $0x30] sm:$0xff] }
0x153c   :  { %v2993_v13 = vadd.f32 %v2987_v41, %v9298_v34  ;;  %v2989_v3 = vpop.f32.mrb[54].mxu1  ;;  %v3159_v41 = vld [vmem:[%s10998_s8 + $0x58] sm:$0xff] }
0x153d   :  { %v2990_v2 = vpop.f32.mrb[55].mxu1  ;;  %v7039_v46 = vmul.f32 -1.442695, %v2992_v6  ;;  %v3157_v6 = vld [vmem:[%s10998_s8 + $0x48] sm:$0xff]  ;;  %v9588_v3 = vsub.f32 %v3148_v50, %v3225_v1 }
0x153e   :  { %8157 = vtanh.f32 %v2993_v13  ;;  %v7040_v56 = vmul.f32 -1.442695, %v2993_v13 }
0x153f   :  { %8159 = vpow2.f32 %v7039_v46  ;;  %v3156_v46 = vld [vmem:[%s10998_s8 + $0x40] sm:$0xff] }
0x1548   :  { %v8158_v48 = vpop.eup %8157 }
0x1549   :  { %3013 = vrot.lane.b32.xlu1 %v8158_v48, %s8445_s5  ;;  %v8160_v23 = vpop.eup %8159  ;;  %v3235_v48 = vand.u32 4294901760, %v3155_v40 }
0x154a   :  { %v3000_v30 = vadd.f32 1.0, %v8160_v23  ;;  %v9596_v23 = vsub.f32 %v3153_v37, %v3231_v55 }
0x154c   :  { %8161 = vrcp.f32 %v3000_v30  ;;  %v3233_v30 = vand.u32 4294901760, %v3152_v59 }
0x154e   :  { %v9614_v14 = vsub.f32 %v3152_v59, %v3233_v30 }
0x1556   :  { %v8162_v32 = vpop.eup %8161 }
0x1557   :  { %v3011_v63 = vmul.f32 %v8162_v32, %v3009_v9  ;;  %v9602_v9 = vpack.c.bf16 %v3235_v48, %v3231_v55 }
0x15bb   :  { %v3014_v53 = vpop.permute.xlu1 %3013 }
0x15bc   :  { %v3016_v49 = vmul.f32 %v8162_v32, %v3014_v53  ;;  %v3237_v32 = vand.u32 4294901760, %v3154_v33  ;;  %v3239_v53 = vand.u32 4294901760, %v3157_v6 }
0x15be   :  { %3018 = vrot.lane.b32.xlu1 %v3016_v49, %s8445_s5  ;;  %v3158_v49 = vld [vmem:[%s10998_s8 + $0x50] sm:$0xff] }
0x1630   :  { %v3019_v12 = vpop.permute.xlu1 %3018 }
0x1631   :  { %v3021_v34 = vadd.f32 %v3019_v12, %v3011_v63  ;;  %v9604_v63 = vsub.f32 %v3155_v40, %v3235_v48  ;;  %v3243_v12 = vand.u32 4294901760, %v3159_v41 }
0x1633   :  { %8163 = vtanh.f32 %v3021_v34  ;;  %3031 = vrot.lane.b32.xlu1 %v3021_v34, %s8445_s5  ;;  %v3241_v34 = vand.u32 4294901760, %v3156_v46  ;;  %v11023_v48 = vand.u32 4294901760, %v9604_v63  ;;  %v7344_v38 = vpack.c.bf16 %v9604_v63, %v9596_v23 }
0x1634   :  { %8165 = vpow2.f32 %v7040_v56  ;;  %v3163_v56 = vld [vmem:[%s10998_s8 + $0x78] sm:$0xff] }
0x163d   :  { %v8164_v19 = vpop.eup %8163 }
0x163e   :  { %3024 = vrot.lane.b32.xlu0 %v8164_v19, %s8445_s5  ;;  %v8166_v5 = vpop.eup %8165  ;;  %v3161_v19 = vld [vmem:[%s10998_s8 + $0x68] sm:$0xff] }
0x163f   :  { %v3001_v15 = vadd.f32 1.0, %v8166_v5  ;;  %v9612_v5 = vpack.c.bf16 %v3237_v32, %v3233_v30 }
0x1641   :  { %8167 = vrcp.f32 %v3001_v15  ;;  %v9616_v15 = vsub.f32 %v3154_v33, %v3237_v32 }
0x1643   :  { %v11021_v30 = vand.u32 4294901760, %v9616_v15  ;;  %v7346_v60 = vpack.c.bf16 %v9616_v15, %v9614_v14 }
0x164b   :  { %v8168_v16 = vpop.eup %8167 }
0x16a5   :  { %v3032_v17 = vpop.permute.xlu1 %3031 }
0x16a6   :  { %v3034_v57 = vsel %vm3028_vm10, %v3032_v17, %v2935_v4  ;;  %v3229_v4 = vand.u32 4294901760, %v3150_v43  ;;  %v9618_v17 = vsub.f32 %v3157_v6, %v3239_v53 }
0x16a7   :  { %3107 = vrot.lane.b32.xlu1 %v3034_v57, %s8445_s5  ;;  %v3160_v57 = vld [vmem:[%s10998_s8 + $0x60] sm:$0xff] }
0x16a8   :  { %v9586_v13 = vpack.c.bf16 %v3229_v4, %v3225_v1  ;;  %v9590_v2 = vsub.f32 %v3150_v43, %v3229_v4  ;;  %v11028_v1 = vand.u32 4294901760, %v9588_v3 }
0x16aa   :  { %v11025_v4 = vand.u32 4294901760, %v9590_v2 }
0x16b0   :  { %v3025_v22 = vpop.permute.xlu0 %3024 }
0x16b1   :  { %v3027_v7 = vmul.f32 %v8168_v16, %v3025_v22  ;;  %v3162_v16 = vld [vmem:[%s10998_s8 + $0x70] sm:$0xff]  ;;  %v9627_v22 = vpack.c.bf16 %v3243_v12, %v3239_v53  ;;  %v3453_v53 = vsub.f32 %v9604_v63, %v11023_v48 }
0x16b3   :  { %v9531_v25 = vsel %vm3028_vm10, %v3027_v7, %v2930_v54  ;;  %v9575_v54 = vpack.c.bf16 %v3227_v51, %v3223_v58  ;;  %v9629_v7 = vsub.f32 %v3159_v41, %v3243_v12  ;;  %v11024_v41 = vand.u32 4294901760, %v9596_v23 }
0x16b4   :  { %3036 = vst.msk [vmem:[#allocation3 + $0x40] sm:$0xff] %vm2160_vm2, %v9531_v25  ;;  %3038 = vst.msk [vmem:[#allocation4 + $0x8] sm:$0xff] %vm2160_vm2, %v9531_v25  ;;  %v3046_v10 = vpack.c.bf16 %v9531_v25, %v9531_v25  ;;  %v3459_v12 = vsub.f32 %v9616_v15, %v11021_v30 }
0x16b5   :  { %7309 = vmatprep.subr.bf16.mxu1 %v9575_v54  ;;  %v3441_v32 = vsub.f32 %v9596_v23, %v11024_v41 }
0x16b6   :  { %7042 = vmatmul.mubr.msk.bf16.vlgmr.msra.gmra.mrb[56].mxu1 %vm2160_vm2, %v3046_v10  ;;  %v3245_v10 = vand.u32 4294901760, %v3158_v49 }
0x16b7   :  { %3303 = vmatprep.mubr.f32.mxu1 %v8443_v0  ;;  %7311 = vmatpush1.bf16.msra.mxu1 %v9586_v13 }
0x16b8   :  { %7313 = vmatprep.subr.bf16.mxu1 %v9602_v9 }
0x16bb   :  { %7315 = vmatpush1.bf16.msra.mxu1 %v9612_v5 }
0x16bc   :  { %7317 = vmatprep.subr.bf16.mxu1 %v9627_v22 }
0x1789   :  { %v3084_v18 = vpop.f32.mrb[56].mxu1 }
0x178a   :  { %v3091_v21 = vadd.f32 %v3084_v18, %v9303_v28  ;;  %v3086_v11 = vpop.f32.mrb[57].mxu1  ;;  %v3108_v28 = vpop.permute.xlu1 %3107  ;;  %v9631_v18 = vsub.f32 %v3156_v46, %v3241_v34  ;;  %v11022_v46 = vand.u32 4294901760, %v9614_v14 }
0x178b   :  { %v9543_v26 = vadd.f32 %v3086_v11, %v9306_v36  ;;  %v3088_v35 = vpop.f32.mrb[58].mxu1  ;;  %v3251_v11 = vand.u32 4294901760, %v3163_v56 }
0x178c   :  { %v3089_v24 = vpop.f32.mrb[59].mxu1  ;;  %v7043_v39 = vmul.f32 -1.442695, %v3091_v21  ;;  %v3247_v21 = vand.u32 4294901760, %v3161_v19  ;;  %v9634_v35 = vpack.c.bf16 %v3245_v10, %v3241_v34  ;;  %v3442_v34 = vand.u32 4294901760, %v3441_v32 }
0x178d   :  { %8169 = vtanh.f32 %v9543_v26  ;;  %v9636_v24 = vsub.f32 %v3158_v49, %v3245_v10  ;;  %v3447_v49 = vsub.f32 %v9614_v14, %v11022_v46 }
0x178e   :  { %8171 = vpow2.f32 %v7043_v39  ;;  %v3253_v39 = vand.u32 4294901760, %v3162_v16  ;;  %7319 = vmatpush1.bf16.msra.mxu1 %v9634_v35 }
0x1797   :  { %v8170_v27 = vpop.eup %8169 }
0x1798   :  { %3112 = vrot.lane.b32.xlu0 %v8170_v27, %s8445_s5  ;;  %v8172_v62 = vpop.eup %8171  ;;  %v3249_v27 = vand.u32 4294901760, %v3160_v57 }
0x1799   :  { %v3099_v42 = vadd.f32 1.0, %v8172_v62 }
0x179b   :  { %8173 = vrcp.f32 %v3099_v42  ;;  %v9639_v42 = vpack.c.bf16 %v3251_v11, %v3247_v21 }
0x179d   :  { %7321 = vmatprep.subr.bf16.mxu1 %v9639_v42 }
0x17a5   :  { %v8174_v61 = vpop.eup %8173 }
0x17a6   :  { %v3110_v36 = vmul.f32 %v8174_v61, %v3108_v28  ;;  %v9648_v28 = vsub.f32 %v3162_v16, %v3253_v39 }
0x180a   :  { %v3113_v45 = vpop.permute.xlu0 %3112 }
0x180b   :  { %v3115_v29 = vmul.f32 %v8174_v61, %v3113_v45  ;;  %v9641_v61 = vsub.f32 %v3161_v19, %v3247_v21  ;;  %v9643_v45 = vsub.f32 %v3163_v56, %v3251_v11  ;;  %v3454_v19 = vand.u32 4294901760, %v3453_v53 }
0x180c   :  { %v3448_v56 = vand.u32 4294901760, %v3447_v49  ;;  %v11020_v21 = vand.u32 4294901760, %v9618_v17  ;;  %v11019_v11 = vand.u32 4294901760, %v9629_v7 }
0x180d   :  { %3117 = vrot.lane.b32.xlu0 %v3115_v29, %s8445_s5  ;;  %v9646_v29 = vsub.f32 %v3160_v57, %v3249_v27  ;;  %v3460_v57 = vand.u32 4294901760, %v3459_v12  ;;  %v9695_v16 = vpack.c.bf16 %v3454_v19, %v3442_v34  ;;  %v11016_v32 = vand.u32 4294901760, %v9641_v61 }
0x180e   :  { %v11015_v53 = vand.u32 4294901760, %v9643_v45  ;;  %v11013_v12 = vand.u32 4294901760, %v9648_v28 }
0x180f   :  { %v9697_v10 = vpack.c.bf16 %v3460_v57, %v3448_v56  ;;  %v11014_v49 = vand.u32 4294901760, %v9646_v29  ;;  %v3489_v34 = vsub.f32 %v9641_v61, %v11016_v32  ;;  %v3184_v32 = vld [vmem:[#allocation4 + $0x8] sm:$0xff] }
0x1810   :  { %v3501_v19 = vsub.f32 %v9643_v45, %v11015_v53  ;;  %v3507_v57 = vsub.f32 %v9648_v28, %v11013_v12 }
0x1811   :  { %v3495_v56 = vsub.f32 %v9646_v29, %v11014_v49 }
0x187f   :  { %v3118_v44 = vpop.permute.xlu0 %3117 }
0x1880   :  { %v3120_v8 = vadd.f32 %v3118_v44, %v3110_v36  ;;  %v9651_v36 = vpack.c.bf16 %v3253_v39, %v3249_v27  ;;  %v9655_v44 = vsub.f32 %v9551_v20, %v3223_v58  ;;  %v3435_v58 = vsub.f32 %v9590_v2, %v11025_v4  ;;  %v3189_v4 = vld [vmem:[#allocation4 + $0x30] sm:$0xff] }
0x1881   :  { %v11018_v27 = vand.u32 4294901760, %v9631_v18  ;;  %v11017_v39 = vand.u32 4294901760, %v9636_v24 }
0x1882   :  { %8175 = vtanh.f32 %v3120_v8  ;;  %v9658_v8 = vsub.f32 %v9556_v47, %v3227_v51  ;;  %7323 = vmatpush1.bf16.msra.mxu1 %v9651_v36  ;;  %v3416_v50 = vand.u32 4294901760, %v9655_v44  ;;  %v3423_v47 = vsub.f32 %v9588_v3, %v11028_v1 }
0x1883   :  { %v3436_v55 = vand.u32 4294901760, %v3435_v58 }
0x1884   :  { %v11031_v43 = vand.u32 4294901760, %v9658_v8  ;;  %v3417_v37 = vsub.f32 %v9655_v44, %v3416_v50  ;;  %v3424_v59 = vand.u32 4294901760, %v3423_v47  ;;  %v3483_v47 = vsub.f32 %v9636_v24, %v11017_v39 }
0x1886   :  { %v3429_v20 = vsub.f32 %v9658_v8, %v11031_v43  ;;  %v3418_v51 = vand.u32 4294901760, %v3417_v37  ;;  %v9677_v6 = vpack.c.bf16 %v3436_v55, %v3424_v59  ;;  %v3477_v37 = vsub.f32 %v9629_v7, %v11019_v11 }
0x1887   :  { %v3484_v59 = vand.u32 4294901760, %v3483_v47  ;;  %v3508_v47 = vand.u32 4294901760, %v3507_v57  ;;  %v7354_v57 = vpack.c.bf16 %v9648_v28, %v9646_v29 }
0x1888   :  { %v3430_v40 = vand.u32 4294901760, %v3429_v20  ;;  %v3471_v20 = vsub.f32 %v9631_v18, %v11018_v27  ;;  %v3186_v27 = vld [vmem:[#allocation4 + $0x18] sm:$0xff] }
0x188a   :  { %v7324_v33 = vpack.c.bf16 %v3430_v40, %v3418_v51  ;;  %v3478_v51 = vand.u32 4294901760, %v3477_v37  ;;  %v3472_v40 = vand.u32 4294901760, %v3471_v20  ;;  %v3502_v37 = vand.u32 4294901760, %v3501_v19 }
0x188b   :  { %v3496_v20 = vand.u32 4294901760, %v3495_v56  ;;  %v7350_v19 = vpack.c.bf16 %v9636_v24, %v9631_v18  ;;  %v7352_v56 = vpack.c.bf16 %v9643_v45, %v9641_v61 }
0x188c   :  { %v8176_v62 = vpop.eup %8175  ;;  %7325 = vmatprep.subr.bf16.mxu1 %v7324_v33  ;;  %v9717_v33 = vpack.c.bf16 %v3484_v59, %v3472_v40  ;;  %v7340_v40 = vpack.c.bf16 %v9658_v8, %v9655_v44  ;;  %v7342_v59 = vpack.c.bf16 %v9590_v2, %v9588_v3  ;;  %v11064_v44 = vand.u32 4294901760, %v9588_v3 }
0x188d   :  { %3123 = vrot.lane.b32.xlu1 %v8176_v62, %s8445_s5  ;;  %v3465_v62 = vsub.f32 %v9618_v17, %v11020_v21  ;;  %v11071_v3 = vand.u32 4294901760, %v9618_v17 }
0x188f   :  { %v3466_v58 = vand.u32 4294901760, %v3465_v62  ;;  %v3490_v62 = vand.u32 4294901760, %v3489_v34  ;;  %v7348_v34 = vpack.c.bf16 %v9629_v7, %v9618_v17 }
0x1891   :  { %v9715_v55 = vpack.c.bf16 %v3478_v51, %v3466_v58  ;;  %v9735_v58 = vpack.c.bf16 %v3502_v37, %v3490_v62  ;;  %v9737_v51 = vpack.c.bf16 %v3508_v47, %v3496_v20  ;;  %v7044_v62 = vmul.f32 -1.442695, %v9543_v26  ;;  %v7041_v47 = vld [vmem:[%s10992_s2 + $0x48] sm:$0xff] }
0x1892   :  { %vm3127_vm11 = vcmp.gt.f32.partialorder %v7041_v47, 0.5  ;;  %v3197_v26 = vsel %vm2160_vm2, %v3184_v32, 0 }
0x1893   :  { %8177 = vpow2.f32 %v7044_v62  ;;  %v3185_v62 = vld [vmem:[#allocation4 + $0x10] sm:$0xff] }
0x189d   :  { %v8178_v37 = vpop.eup %8177 }
0x189e   :  { %v3100_v20 = vadd.f32 1.0, %v8178_v37  ;;  %v9763_v37 = vand.u32 4294901760, %v3197_v26 }
0x18a0   :  { %8179 = vrcp.f32 %v3100_v20  ;;  %v3200_v20 = vsel %vm2160_vm2, %v3185_v62, 0 }
0x18aa   :  { %v8180_v31 = vpop.eup %8179 }
0x18ff   :  { %v3124_v12 = vpop.permute.xlu1 %3123 }
0x1900   :  { %v3126_v49 = vmul.f32 %v8180_v31, %v3124_v12  ;;  %v9770_v31 = vsub.f32 %v3197_v26, %v9763_v37  ;;  %v3188_v26 = vld [vmem:[#allocation4 + $0x28] sm:$0xff] }
0x1902   :  { %v3128_v53 = vsel %vm3127_vm11, %v3126_v49, %v9531_v25  ;;  %v9772_v25 = vand.u32 4294901760, %v3200_v20  ;;  %v3187_v49 = vld [vmem:[#allocation4 + $0x20] sm:$0xff]  ;;  %v11027_v21 = vand.u32 4294901760, %v9770_v31 }
0x1903   :  { %3130 = vst.msk [vmem:[#allocation3 + $0x48] sm:$0xff] %vm2160_vm2, %v3128_v53  ;;  %3131 = vst.msk [vmem:[#allocation4] sm:$0xff] %vm2160_vm2, %v3128_v53  ;;  %v3203_v53 = vsel %vm2160_vm2, %v3186_v27, 0  ;;  %v3206_v12 = vsel %vm2160_vm2, %v3187_v49, 0 }
0x1904   :  { %v9784_v30 = vand.u32 4294901760, %v3203_v53  ;;  %v9789_v27 = vand.u32 4294901760, %v3206_v12  ;;  %v3318_v49 = vsub.f32 %v9770_v31, %v11027_v21 }
0x1906   :  { %v9810_v1 = vsub.f32 %v3206_v12, %v9789_v27 }
0x190a   :  { %v3183_v39 = vld [vmem:[#allocation4] sm:$0xff] }
0x190b   :  { %v3194_v47 = vsel %vm2160_vm2, %v3183_v39, 0  ;;  %v9782_v39 = vsub.f32 %v3200_v20, %v9772_v25  ;;  %v9797_v20 = vsub.f32 %v3203_v53, %v9784_v30 }
0x190c   :  { %v9767_v11 = vand.u32 4294901760, %v3194_v47 }
0x190d   :  { %v11029_v41 = vand.u32 4294901760, %v9782_v39  ;;  %v11030_v53 = vand.u32 4294901760, %v9797_v20 }
0x190e   :  { %v9776_v32 = vsub.f32 %v3194_v47, %v9767_v11  ;;  %v3209_v47 = vsel %vm2160_vm2, %v3188_v26, 0  ;;  %v3212_v26 = vsel %vm2160_vm2, %v3189_v4, 0 }
0x190f   :  { %v3329_v21 = vsub.f32 %v9782_v39, %v11029_v41  ;;  %v11032_v41 = vand.u32 4294901760, %v9810_v1 }
0x1910   :  { %v11026_v62 = vand.u32 4294901760, %v9776_v32 }
0x1912   :  { %v3307_v46 = vsub.f32 %v9776_v32, %v11026_v62  ;;  %v9801_v62 = vand.u32 4294901760, %v3209_v47 }
0x1914   :  { %v3308_v48 = vand.u32 4294901760, %v3307_v46  ;;  %v3319_v46 = vand.u32 4294901760, %v3318_v49  ;;  %v3330_v49 = vand.u32 4294901760, %v3329_v21  ;;  %v9822_v12 = vsub.f32 %v3209_v47, %v9801_v62 }
0x1916   :  { %3309 = vmatmul.mubr.f32.vlgmr.msra.gmra.mrb[60].mxu1 %v3308_v48  ;;  %v3190_v48 = vld [vmem:[#allocation4 + $0x38] sm:$0xff]  ;;  %v3361_v47 = vand.u32 4294901760, %v9822_v12 }
0x1917   :  { %7327 = vmatpush1.bf16.msra.mxu1 %v9677_v6  ;;  %3314 = vmatprep.mubr.f32.mxu1 %v8443_v0  ;;  %v9814_v6 = vand.u32 4294901760, %v3212_v26  ;;  %v3215_v4 = vsel %vm2160_vm2, %v3190_v48, 0 }
0x1918   :  { %7329 = vmatprep.subr.bf16.mxu1 %v9695_v16  ;;  %v3340_v16 = vsub.f32 %v9797_v20, %v11030_v53  ;;  %v3351_v53 = vsub.f32 %v9810_v1, %v11032_v41 }
0x1919   :  { %v9835_v43 = vsub.f32 %v3212_v26, %v9814_v6 }
0x191a   :  { %3320 = vmatmul.mubr.f32.gmra.mrb[62].mxu1 %v3319_v46  ;;  %v3191_v46 = vld [vmem:[#allocation4 + $0x40] sm:$0xff]  ;;  %v3341_v48 = vand.u32 4294901760, %v3340_v16  ;;  %v3352_v16 = vand.u32 4294901760, %v3351_v53 }
0x191b   :  { %3325 = vmatprep.mubr.f32.mxu1 %v8443_v0  ;;  %7331 = vmatpush1.bf16.msra.mxu1 %v9697_v10  ;;  %v9827_v10 = vand.u32 4294901760, %v3215_v4  ;;  %v3218_v21 = vsel %vm2160_vm2, %v3191_v46, 0  ;;  %v3362_v46 = vsub.f32 %v9822_v12, %v3361_v47  ;;  %v11033_v26 = vand.u32 4294901760, %v9835_v43 }
0x191c   :  { %7333 = vmatprep.subr.bf16.mxu1 %v9715_v55  ;;  %v3192_v55 = vld [vmem:[#allocation4 + $0x48] sm:$0xff] }
0x191d   :  { %v9848_v41 = vsub.f32 %v3215_v4, %v9827_v10  ;;  %v3373_v53 = vsub.f32 %v9835_v43, %v11033_v26 }
0x191e   :  { %3331 = vmatmul.mubr.f32.gmra.mrb[64].mxu1 %v3330_v49  ;;  %v3221_v49 = vsel %vm2160_vm2, %v3192_v55, 0 }
0x191f   :  { %3336 = vmatprep.mubr.f32.mxu1 %v8443_v0  ;;  %7335 = vmatpush1.bf16.msra.mxu1 %v9717_v33  ;;  %v9840_v33 = vand.u32 4294901760, %v3218_v21  ;;  %v3374_v4 = vand.u32 4294901760, %v3373_v53 }
0x1920   :  { %7337 = vmatprep.subr.bf16.mxu1 %v9735_v58  ;;  %v9854_v58 = vand.u32 4294901760, %v3221_v49 }
0x1921   :  { %v9861_v55 = vsub.f32 %v3218_v21, %v9840_v33 }
0x1922   :  { %3342 = vmatmul.mubr.f32.gmra.mrb[66].mxu1 %v3341_v48  ;;  %v11034_v48 = vand.u32 4294901760, %v9848_v41 }
0x1923   :  { %3347 = vmatprep.mubr.f32.mxu1 %v8443_v0  ;;  %7339 = vmatpush1.bf16.msra.mxu1 %v9737_v51  ;;  %v3363_v51 = vand.u32 4294901760, %v3362_v46  ;;  %v9869_v46 = vsub.f32 %v3221_v49, %v9854_v58 }
0x1924   :  { %7341 = vmatprep.subr.bf16.mxu1 %v7340_v40  ;;  %v3384_v40 = vsub.f32 %v9848_v41, %v11034_v48 }
0x1926   :  { %3353 = vmatmul.mubr.f32.gmra.mrb[68].mxu1 %v3352_v16  ;;  %v3394_v16 = vand.u32 4294901760, %v9861_v55  ;;  %v3385_v26 = vand.u32 4294901760, %v3384_v40  ;;  %v11077_v40 = vand.u32 4294901760, %v9643_v45  ;;  %v11083_v45 = vand.u32 4294901760, %v9835_v43 }
0x1927   :  { %3358 = vmatprep.mubr.f32.mxu1 %v8443_v0 }
0x1928   :  { %v3395_v21 = vsub.f32 %v9861_v55, %v3394_v16 }
0x192a   :  { %3364 = vmatmul.mubr.f32.gmra.mrb[70].mxu1 %v3363_v51  ;;  %v3405_v51 = vand.u32 4294901760, %v9869_v46  ;;  %v3396_v53 = vand.u32 4294901760, %v3395_v21  ;;  %v11080_v21 = vand.u32 4294901760, %v9648_v28  ;;  %v3135_v28 = vld [vmem:[%s10997_s7 + $0x18] sm:$0xff] }
0x192b   :  { %3369 = vmatprep.mubr.f32.mxu1 %v8443_v0 }
0x192c   :  { %v3406_v48 = vsub.f32 %v9869_v46, %v3405_v51 }
0x192e   :  { %3375 = vmatmul.mubr.f32.gmra.mrb[72].mxu1 %v3374_v4  ;;  %v3407_v49 = vand.u32 4294901760, %v3406_v48  ;;  %v11075_v4 = vand.u32 4294901760, %v9636_v24  ;;  %v11081_v24 = vand.u32 4294901760, %v9797_v20 }
0x192f   :  { %3380 = vmatprep.mubr.f32.mxu1 %v8443_v0 }
0x1932   :  { %3386 = vmatmul.mubr.f32.gmra.mrb[74].mxu1 %v3385_v26  ;;  %v11070_v26 = vand.u32 4294901760, %v9616_v15  ;;  %v11076_v15 = vand.u32 4294901760, %v9641_v61  ;;  %v11082_v61 = vand.u32 4294901760, %v9810_v1 }
0x1933   :  { %3391 = vmatprep.mubr.f32.mxu1 %v8443_v0 }
0x1934   :  { %v7384_v17 = vpack.c.bf16 %v11077_v40, %v11076_v15 }
0x1936   :  { %3397 = vmatmul.mubr.f32.gmra.mrb[76].mxu1 %v3396_v53 }
0x1937   :  { %3402 = vmatprep.mubr.f32.mxu1 %v8443_v0 }
0x193a   :  { %3408 = vmatmul.mubr.f32.gmra.mrb[78].mxu1 %v3407_v49 }
0x193b   :  { %3558 = vmatprep.mubr.f32.mxu1 %v8443_v0 }
0x193e   :  { %3560 = vmatmul.mubr.f32.vlgmr.msra.gmra.mrb[60].mxu1 %v9767_v11 }
0x193f   :  { %7343 = vmatpush1.bf16.msra.mxu1 %v7342_v59  ;;  %3565 = vmatprep.mubr.f32.mxu1 %v8443_v0  ;;  %v11066_v59 = vand.u32 4294901760, %v9596_v23 }
0x1940   :  { %7345 = vmatprep.subr.bf16.mxu1 %v7344_v38 }
0x1942   :  { %3567 = vmatmul.mubr.f32.gmra.mrb[62].mxu1 %v9763_v37 }
0x1943   :  { %3572 = vmatprep.mubr.f32.mxu1 %v8443_v0  ;;  %7347 = vmatpush1.bf16.msra.mxu1 %v7346_v60  ;;  %v11063_v60 = vand.u32 4294901760, %v9658_v8  ;;  %v11065_v8 = vand.u32 4294901760, %v9590_v2  ;;  %v11072_v2 = vand.u32 4294901760, %v9629_v7  ;;  %v11078_v7 = vand.u32 4294901760, %v9782_v39 }
0x1944   :  { %7349 = vmatprep.subr.bf16.mxu1 %v7348_v34  ;;  %v11067_v34 = vand.u32 4294901760, %v9604_v63  ;;  %v11073_v63 = vand.u32 4294901760, %v9770_v31 }
0x1945   :  { %v7372_v38 = vpack.c.bf16 %v11063_v60, %v3416_v50  ;;  %v7374_v50 = vpack.c.bf16 %v11065_v8, %v11064_v44  ;;  %v7380_v23 = vpack.c.bf16 %v11072_v2, %v11071_v3  ;;  %v10117_v8 = vld [vmem:[%s10997_s7 + $0x40] sm:$0xff] }
0x1946   :  { %3574 = vmatmul.mubr.f32.gmra.mrb[64].mxu1 %v9772_v25 }
0x1947   :  { %3579 = vmatprep.mubr.f32.mxu1 %v8443_v0  ;;  %7351 = vmatpush1.bf16.msra.mxu1 %v7350_v19  ;;  %v7376_v19 = vpack.c.bf16 %v11067_v34, %v11066_v59 }
0x1948   :  { %7353 = vmatprep.subr.bf16.mxu1 %v7352_v56  ;;  %v11068_v56 = vand.u32 4294901760, %v9776_v32 }
0x194a   :  { %3581 = vmatmul.mubr.f32.gmra.mrb[66].mxu1 %v9784_v30 }
0x194b   :  { %3586 = vmatprep.mubr.f32.mxu1 %v8443_v0  ;;  %7355 = vmatpush1.bf16.msra.mxu1 %v7354_v57  ;;  %v11069_v57 = vand.u32 4294901760, %v9614_v14 }
0x194c   :  { %7357 = vmatprep.subr.bf16.mxu1 %v9575_v54 }
0x194d   :  { %v7378_v48 = vpack.c.bf16 %v11070_v26, %v11069_v57 }
0x194e   :  { %3588 = vmatmul.mubr.f32.gmra.mrb[68].mxu1 %v9789_v27 }
0x194f   :  { %3593 = vmatprep.mubr.f32.mxu1 %v8443_v0 }
0x1952   :  { %3595 = vmatmul.mubr.f32.gmra.mrb[70].mxu1 %v9801_v62 }
0x1953   :  { %3600 = vmatprep.mubr.f32.mxu1 %v8443_v0 }
0x1956   :  { %3602 = vmatmul.mubr.f32.gmra.mrb[72].mxu1 %v9814_v6 }
0x1957   :  { %3607 = vmatprep.mubr.f32.mxu1 %v8443_v0 }
0x195a   :  { %3609 = vmatmul.mubr.f32.gmra.mrb[74].mxu1 %v9827_v10 }
0x195b   :  { %3614 = vmatprep.mubr.f32.mxu1 %v8443_v0 }
0x195e   :  { %3616 = vmatmul.mubr.f32.gmra.mrb[76].mxu1 %v9840_v33 }
0x195f   :  { %3621 = vmatprep.mubr.f32.mxu1 %v8443_v0 }
0x1962   :  { %3623 = vmatmul.mubr.f32.gmra.mrb[78].mxu1 %v9854_v58 }
0x1963   :  { %3725 = vmatprep.mubr.f32.mxu1 %v8443_v0 }
0x1966   :  { %3728 = vmatmul.mubr.f32.vlgmr.msra.gmra.mrb[60].mxu1 %v9776_v32  ;;  %v11074_v32 = vand.u32 4294901760, %v9631_v18 }
0x1967   :  { %7359 = vmatpush1.bf16.msra.mxu1 %v9586_v13  ;;  %3733 = vmatprep.mubr.f32.mxu1 %v8443_v0 }
0x1968   :  { %7361 = vmatprep.subr.bf16.mxu1 %v9602_v9  ;;  %v7382_v14 = vpack.c.bf16 %v11075_v4, %v11074_v32 }
0x196a   :  { %3736 = vmatmul.mubr.f32.gmra.mrb[62].mxu1 %v9770_v31  ;;  %v11079_v31 = vand.u32 4294901760, %v9646_v29  ;;  %v11084_v29 = vand.u32 4294901760, %v9848_v41 }
0x196b   :  { %3741 = vmatprep.mubr.f32.mxu1 %v8443_v0  ;;  %7363 = vmatpush1.bf16.msra.mxu1 %v9612_v5 }
0x196c   :  { %7365 = vmatprep.subr.bf16.mxu1 %v9627_v22  ;;  %v7386_v18 = vpack.c.bf16 %v11080_v21, %v11079_v31 }
0x196e   :  { %3744 = vmatmul.mubr.f32.gmra.mrb[64].mxu1 %v9782_v39 }
0x196f   :  { %3749 = vmatprep.mubr.f32.mxu1 %v8443_v0  ;;  %7367 = vmatpush1.bf16.msra.mxu1 %v9634_v35 }
0x1970   :  { %7369 = vmatprep.subr.bf16.mxu1 %v9639_v42 }
0x1972   :  { %3752 = vmatmul.mubr.f32.gmra.mrb[66].mxu1 %v9797_v20 }
0x1973   :  { %3757 = vmatprep.mubr.f32.mxu1 %v8443_v0  ;;  %7371 = vmatpush1.bf16.msra.mxu1 %v9651_v36 }
0x1974   :  { %7373 = vmatprep.subr.bf16.mxu1 %v7372_v38 }
0x1976   :  { %3760 = vmatmul.mubr.f32.gmra.mrb[68].mxu1 %v9810_v1 }
0x1977   :  { %3765 = vmatprep.mubr.f32.mxu1 %v8443_v0 }
0x197a   :  { %3768 = vmatmul.mubr.f32.gmra.mrb[70].mxu1 %v9822_v12 }
0x197b   :  { %3773 = vmatprep.mubr.f32.mxu1 %v8443_v0 }
0x197e   :  { %3776 = vmatmul.mubr.f32.gmra.mrb[72].mxu1 %v9835_v43  ;;  %v4345_v43 = vand.u32 4294901760, %v3135_v28 }
0x197f   :  { %3781 = vmatprep.mubr.f32.mxu1 %v8443_v0 }
0x1980   :  { %v10077_v20 = vsub.f32 %v3135_v28, %v4345_v43 }
0x1982   :  { %3784 = vmatmul.mubr.f32.gmra.mrb[74].mxu1 %v9848_v41  ;;  %v10073_v41 = vld [vmem:[%s10997_s7 + $0x20] sm:$0xff]  ;;  %v4546_v34 = vand.u32 4294901760, %v10077_v20 }
0x1983   :  { %3789 = vmatprep.mubr.f32.mxu1 %v8443_v0  ;;  %v4351_v53 = vand.u32 4294901760, %v10073_v41 }
0x1984   :  { %v4547_v4 = vsub.f32 %v10077_v20, %v4546_v34 }
0x1986   :  { %3792 = vmatmul.mubr.f32.gmra.mrb[76].mxu1 %v9861_v55  ;;  %v10084_v55 = vld [vmem:[%s10997_s7 + $0x30] sm:$0xff]  ;;  %v4548_v31 = vand.u32 4294901760, %v4547_v4  ;;  %v3176_v4 = vld [vmem:[#allocation3 + $0x18] sm:$0xff] }
0x1987   :  { %3797 = vmatprep.mubr.f32.mxu1 %v8443_v0  ;;  %v4355_v49 = vand.u32 4294901760, %v10084_v55 }
0x1989   :  { %v10143_v57 = vpack.c.bf16 %v4355_v49, %v4351_v53 }
0x198a   :  { %3800 = vmatmul.mubr.f32.gmra.mrb[78].mxu1 %v9869_v46  ;;  %v10094_v46 = vld [vmem:[%s10997_s7 + $0x58] sm:$0xff] }
0x198b   :  { %3886 = vmatprep.mubr.f32.mxu1 %v8443_v0  ;;  %v4361_v38 = vand.u32 4294901760, %v10094_v46 }
0x198e   :  { %3890 = vmatmul.mubr.f32.vlgmr.msra.gmra.mrb[60].mxu1 %v11068_v56  ;;  %v10134_v56 = vld [vmem:[%s10997_s7 + $0x78] sm:$0xff] }
0x198f   :  { %7375 = vmatpush1.bf16.msra.mxu1 %v7374_v50  ;;  %3895 = vmatprep.mubr.f32.mxu1 %v8443_v0  ;;  %v10122_v50 = vld [vmem:[%s10997_s7 + $0x50] sm:$0xff]  ;;  %v4369_v2 = vand.u32 4294901760, %v10134_v56 }
0x1990   :  { %7377 = vmatprep.subr.bf16.mxu1 %v7376_v19  ;;  %v10129_v19 = vld [vmem:[%s10997_s7 + $0x68] sm:$0xff] }
0x1991   :  { %v4365_v3 = vand.u32 4294901760, %v10129_v19 }
0x1992   :  { %3899 = vmatmul.mubr.f32.gmra.mrb[62].mxu1 %v11073_v63  ;;  %v10164_v63 = vld [vmem:[%s10997_s7 + $0x70] sm:$0xff] }
0x1993   :  { %3904 = vmatprep.mubr.f32.mxu1 %v8443_v0  ;;  %7379 = vmatpush1.bf16.msra.mxu1 %v7378_v48  ;;  %v4359_v48 = vand.u32 4294901760, %v10117_v8  ;;  %v4371_v40 = vand.u32 4294901760, %v10164_v63 }
0x1994   :  { %7381 = vmatprep.subr.bf16.mxu1 %v7380_v23  ;;  %v10159_v23 = vld [vmem:[%s10997_s7 + $0x60] sm:$0xff] }
0x1995   :  { %v4367_v15 = vand.u32 4294901760, %v10159_v23 }
0x1996   :  { %3908 = vmatmul.mubr.f32.gmra.mrb[64].mxu1 %v11078_v7 }
0x1997   :  { %3913 = vmatprep.mubr.f32.mxu1 %v8443_v0  ;;  %7383 = vmatpush1.bf16.msra.mxu1 %v7382_v14 }
0x1998   :  { %7385 = vmatprep.subr.bf16.mxu1 %v7384_v17  ;;  %v3173_v17 = vld [vmem:[#allocation3] sm:$0xff] }
0x1999   :  { %v4312_v21 = vsel %vm2160_vm2, %v3173_v17, 0 }
0x199a   :  { %3917 = vmatmul.mubr.f32.gmra.mrb[66].mxu1 %v11081_v24 }
0x199b   :  { %3922 = vmatprep.mubr.f32.mxu1 %v8443_v0  ;;  %7387 = vmatpush1.bf16.msra.mxu1 %v7386_v18  ;;  %v10198_v18 = vpack.c.bf16 %v4371_v40, %v4367_v15 }
0x199c   :  { %7389 = vmatprep.subr.bf16.mxu1 %v9575_v54  ;;  %v3133_v54 = vld [vmem:[%s10997_s7 + $0x8] sm:$0xff] }
0x199e   :  { %3926 = vmatmul.mubr.f32.gmra.mrb[68].mxu1 %v11082_v61  ;;  %v10201_v61 = vand.u32 4294901760, %v4312_v21 }
0x199f   :  { %3931 = vmatprep.mubr.f32.mxu1 %v8443_v0 }
0x19a2   :  { %3935 = vmatmul.mubr.f32.gmra.mrb[70].mxu1 %v3361_v47 }
0x19a3   :  { %3940 = vmatprep.mubr.f32.mxu1 %v8443_v0 }
0x19a6   :  { %3944 = vmatmul.mubr.f32.gmra.mrb[72].mxu1 %v11083_v45  ;;  %v3174_v45 = vld [vmem:[#allocation3 + $0x8] sm:$0xff] }
0x19a7   :  { %3949 = vmatprep.mubr.f32.mxu1 %v8443_v0 }
0x19aa   :  { %3953 = vmatmul.mubr.f32.gmra.mrb[74].mxu1 %v11084_v29  ;;  %v10208_v29 = vsub.f32 %v4312_v21, %v10201_v61  ;;  %v3177_v21 = vld [vmem:[#allocation3 + $0x20] sm:$0xff] }
0x19ab   :  { %3958 = vmatprep.mubr.f32.mxu1 %v8443_v0 }
0x19ae   :  { %3962 = vmatmul.mubr.f32.gmra.mrb[76].mxu1 %v3394_v16  ;;  %v10089_v16 = vld [vmem:[%s10997_s7 + $0x48] sm:$0xff] }
0x19af   :  { %3967 = vmatprep.mubr.f32.mxu1 %v8443_v0  ;;  %v4357_v60 = vand.u32 4294901760, %v10089_v16 }
0x19b1   :  { %v10149_v26 = vpack.c.bf16 %v4361_v38, %v4357_v60 }
0x19b2   :  { %3971 = vmatmul.mubr.f32.gmra.mrb[78].mxu1 %v3405_v51 }
0x19b3   :  { %4089 = vmatprep.mubr.f32.mxu1 %v8443_v0 }
0x19b6   :  { %4091 = vmatmul.mubr.f32.vlgmr.msra.gmra.mrb[60].mxu1 %v9767_v11 }
0x19b7   :  { %7391 = vmatpush1.bf16.msra.mxu1 %v9586_v13  ;;  %4096 = vmatprep.mubr.f32.mxu1 %v8443_v0  ;;  %v4341_v13 = vand.u32 4294901760, %v3133_v54 }
0x19b8   :  { %7393 = vmatprep.subr.bf16.mxu1 %v9602_v9 }
0x19b9   :  { %v10032_v9 = vpack.c.bf16 %v4345_v43, %v4341_v13  ;;  %v10075_v39 = vsub.f32 %v3133_v54, %v4341_v13  ;;  %v11039_v13 = vand.u32 4294901760, %v10208_v29  ;;  %v3175_v43 = vld [vmem:[#allocation3 + $0x10] sm:$0xff] }
0x19ba   :  { %4098 = vmatmul.mubr.f32.gmra.mrb[62].mxu1 %v9763_v37 }
0x19bb   :  { %4103 = vmatprep.mubr.f32.mxu1 %v8443_v0  ;;  %7395 = vmatpush1.bf16.msra.mxu1 %v9612_v5  ;;  %v10049_v5 = vld [vmem:[%s10997_s7] sm:$0xff]  ;;  %v4534_v59 = vand.u32 4294901760, %v10075_v39 }
0x19bc   :  { %7397 = vmatprep.subr.bf16.mxu1 %v9627_v22  ;;  %v10054_v22 = vld [vmem:[%s10997_s7 + $0x10] sm:$0xff] }
0x19bd   :  { %v4347_v1 = vand.u32 4294901760, %v10054_v22  ;;  %v4535_v32 = vsub.f32 %v10075_v39, %v4534_v59 }
0x19be   :  { %4105 = vmatmul.mubr.f32.gmra.mrb[64].mxu1 %v9772_v25 }
0x19bf   :  { %4110 = vmatprep.mubr.f32.mxu1 %v8443_v0  ;;  %7399 = vmatpush1.bf16.msra.mxu1 %v9634_v35  ;;  %v10059_v35 = vld [vmem:[%s10997_s7 + $0x28] sm:$0xff]  ;;  %v4536_v7 = vand.u32 4294901760, %v4535_v32  ;;  %v10222_v28 = vsub.f32 %v10054_v22, %v4347_v1  ;;  %v4318_v22 = vsel %vm2160_vm2, %v3175_v43, 0  ;;  %v10312_v43 = vsub.f32 %v10129_v19, %v4365_v3 }
0x19c0   :  { %7401 = vmatprep.subr.bf16.mxu1 %v9639_v42  ;;  %v10064_v42 = vld [vmem:[%s10997_s7 + $0x38] sm:$0xff]  ;;  %v4349_v12 = vand.u32 4294901760, %v10059_v35 }
0x19c1   :  { %v4353_v47 = vand.u32 4294901760, %v10064_v42  ;;  %v7420_v24 = vpack.c.bf16 %v4548_v31, %v4536_v7  ;;  %v10263_v7 = vand.u32 4294901760, %v4318_v22  ;;  %v4321_v31 = vsel %vm2160_vm2, %v3176_v4, 0 }
0x19c2   :  { %4112 = vmatmul.mubr.f32.gmra.mrb[66].mxu1 %v9784_v30  ;;  %v10321_v4 = vand.u32 4294901760, %v4321_v31 }
0x19c3   :  { %4117 = vmatprep.mubr.f32.mxu1 %v8443_v0  ;;  %7403 = vmatpush1.bf16.msra.mxu1 %v9651_v36  ;;  %v4343_v36 = vand.u32 4294901760, %v10049_v5  ;;  %v10112_v44 = vpack.c.bf16 %v4353_v47, %v4349_v12  ;;  %v10233_v32 = vsub.f32 %v10064_v42, %v4353_v47  ;;  %v10256_v42 = vsub.f32 %v10084_v55, %v4355_v49 }
0x19c4   :  { %7405 = vmatprep.subr.bf16.mxu1 %v10032_v9 }
0x19c5   :  { %v10101_v51 = vpack.c.bf16 %v4347_v1, %v4343_v36  ;;  %v11043_v1 = vand.u32 4294901760, %v10222_v28  ;;  %v11040_v47 = vand.u32 4294901760, %v10233_v32 }
0x19c6   :  { %4119 = vmatmul.mubr.f32.gmra.mrb[68].mxu1 %v9789_v27 }
0x19c7   :  { %4124 = vmatprep.mubr.f32.mxu1 %v8443_v0  ;;  %v4553_v49 = vsub.f32 %v10222_v28, %v11043_v1 }
0x19ca   :  { %4126 = vmatmul.mubr.f32.gmra.mrb[70].mxu1 %v9801_v62 }
0x19cb   :  { %4131 = vmatprep.mubr.f32.mxu1 %v8443_v0 }
0x19ce   :  { %4133 = vmatmul.mubr.f32.gmra.mrb[72].mxu1 %v9814_v6 }
0x19cf   :  { %4138 = vmatprep.mubr.f32.mxu1 %v8443_v0 }
0x19d2   :  { %4140 = vmatmul.mubr.f32.gmra.mrb[74].mxu1 %v9827_v10 }
0x19d3   :  { %4145 = vmatprep.mubr.f32.mxu1 %v8443_v0 }
0x19d6   :  { %4147 = vmatmul.mubr.f32.gmra.mrb[76].mxu1 %v9840_v33 }
0x19d7   :  { %4152 = vmatprep.mubr.f32.mxu1 %v8443_v0 }
0x19da   :  { %4154 = vmatmul.mubr.f32.gmra.mrb[78].mxu1 %v9854_v58 }
0x19db   :  { %4240 = vmatprep.mubr.f32.mxu1 %v8443_v0 }
0x19de   :  { %4242 = vmatmul.mubr.f32.vlgmr.msra.gmra.mrb[60].mxu1 %v9767_v11  ;;  %v4363_v11 = vand.u32 4294901760, %v10122_v50 }
0x19df   :  { %7407 = vmatpush1.bf16.msra.mxu1 %v10101_v51  ;;  %4247 = vmatprep.mubr.f32.mxu1 %v8443_v0 }
0x19e0   :  { %7409 = vmatprep.subr.bf16.mxu1 %v10112_v44  ;;  %v10179_v14 = vpack.c.bf16 %v4363_v11, %v4359_v48 }
0x19e2   :  { %4249 = vmatmul.mubr.f32.gmra.mrb[62].mxu1 %v9763_v37  ;;  %v10188_v37 = vpack.c.bf16 %v4369_v2, %v4365_v3 }
0x19e3   :  { %4254 = vmatprep.mubr.f32.mxu1 %v8443_v0  ;;  %7411 = vmatpush1.bf16.msra.mxu1 %v10143_v57 }
0x19e4   :  { %7413 = vmatprep.subr.bf16.mxu1 %v10149_v26 }
0x19e6   :  { %4256 = vmatmul.mubr.f32.gmra.mrb[64].mxu1 %v9772_v25  ;;  %v4315_v25 = vsel %vm2160_vm2, %v3174_v45, 0 }
0x19e7   :  { %4261 = vmatprep.mubr.f32.mxu1 %v8443_v0  ;;  %7415 = vmatpush1.bf16.msra.mxu1 %v10179_v14  ;;  %v10212_v54 = vand.u32 4294901760, %v4315_v25 }
0x19e8   :  { %7417 = vmatprep.subr.bf16.mxu1 %v10188_v37 }
0x19ea   :  { %4263 = vmatmul.mubr.f32.gmra.mrb[66].mxu1 %v9784_v30  ;;  %v10217_v30 = vsub.f32 %v10049_v5, %v4343_v36  ;;  %v10238_v5 = vsub.f32 %v4315_v25, %v10212_v54  ;;  %v10244_v36 = vsub.f32 %v10208_v29, %v11039_v13  ;;  %v10307_v25 = vsub.f32 %v4318_v22, %v10263_v7 }
0x19eb   :  { %4268 = vmatprep.mubr.f32.mxu1 %v8443_v0  ;;  %7419 = vmatpush1.bf16.msra.mxu1 %v10198_v18  ;;  %v4324_v22 = vsel %vm2160_vm2, %v3177_v21, 0 }
0x19ec   :  { %7421 = vmatprep.subr.bf16.mxu1 %v7420_v24  ;;  %v11035_v17 = vand.u32 4294901760, %v10238_v5  ;;  %v4426_v55 = vand.u32 4294901760, %v10244_v36  ;;  %v10295_v24 = vsub.f32 %v10117_v8, %v4359_v48  ;;  %v10317_v8 = vsub.f32 %v10134_v56, %v4369_v2  ;;  %v3178_v2 = vld [vmem:[#allocation3 + $0x28] sm:$0xff] }
0x19ed   :  { %v4554_v36 = vand.u32 4294901760, %v4553_v49 }
0x19ee   :  { %4270 = vmatmul.mubr.f32.gmra.mrb[68].mxu1 %v9789_v27  ;;  %v10228_v27 = vsub.f32 %v10059_v35, %v4349_v12  ;;  %v11044_v35 = vand.u32 4294901760, %v10217_v30  ;;  %v4436_v45 = vsub.f32 %v10238_v5, %v11035_v17  ;;  %v4588_v49 = vand.u32 4294901760, %v10295_v24 }
0x19ef   :  { %4275 = vmatprep.mubr.f32.mxu1 %v8443_v0  ;;  %v11048_v21 = vand.u32 4294901760, %v10317_v8 }
0x19f0   :  { %v11041_v12 = vand.u32 4294901760, %v10228_v27 }
0x19f2   :  { %4277 = vmatmul.mubr.f32.gmra.mrb[70].mxu1 %v9801_v62  ;;  %v10251_v62 = vsub.f32 %v10073_v41, %v4351_v53  ;;  %v10268_v41 = vsub.f32 %v10089_v16, %v4357_v60  ;;  %v4541_v53 = vsub.f32 %v10217_v30, %v11044_v35  ;;  %v4559_v16 = vsub.f32 %v10228_v27, %v11041_v12 }
0x19f3   :  { %4282 = vmatprep.mubr.f32.mxu1 %v8443_v0 }
0x19f4   :  { %v11037_v60 = vand.u32 4294901760, %v10251_v62  ;;  %v4560_v17 = vand.u32 4294901760, %v4559_v16 }
0x19f6   :  { %4284 = vmatmul.mubr.f32.gmra.mrb[72].mxu1 %v9814_v6  ;;  %v10273_v6 = vsub.f32 %v10094_v46, %v4361_v38  ;;  %v4571_v46 = vsub.f32 %v10233_v32, %v11040_v47  ;;  %v11036_v38 = vand.u32 4294901760, %v10256_v42  ;;  %v4565_v3 = vsub.f32 %v10251_v62, %v11037_v60 }
0x19f7   :  { %4289 = vmatprep.mubr.f32.mxu1 %v8443_v0  ;;  %v4327_v60 = vsel %vm2160_vm2, %v3178_v2, 0 }
0x19f8   :  { %v11042_v48 = vand.u32 4294901760, %v10273_v6  ;;  %v4572_v19 = vand.u32 4294901760, %v4571_v46  ;;  %v4577_v56 = vsub.f32 %v10256_v42, %v11036_v38  ;;  %v10356_v38 = vand.u32 4294901760, %v4324_v22 }
0x19f9   :  { %v4566_v47 = vand.u32 4294901760, %v4565_v3 }
0x19fa   :  { %4291 = vmatmul.mubr.f32.gmra.mrb[74].mxu1 %v9827_v10  ;;  %v10300_v10 = vsub.f32 %v10122_v50, %v4363_v11  ;;  %v11038_v50 = vand.u32 4294901760, %v10268_v41  ;;  %v4542_v11 = vand.u32 4294901760, %v4541_v53  ;;  %v10334_v53 = vsub.f32 %v10159_v23, %v4367_v15 }
0x19fb   :  { %4296 = vmatprep.mubr.f32.mxu1 %v8443_v0  ;;  %v4595_v23 = vsub.f32 %v10273_v6, %v11042_v48  ;;  %v11046_v15 = vand.u32 4294901760, %v10312_v43  ;;  %v7424_v13 = vpack.c.bf16 %v4572_v19, %v4560_v17  ;;  %v4578_v12 = vand.u32 4294901760, %v4577_v56 }
0x19fc   :  { %v11045_v16 = vand.u32 4294901760, %v10300_v10  ;;  %v4583_v46 = vsub.f32 %v10268_v41, %v11038_v50  ;;  %v7422_v50 = vpack.c.bf16 %v4554_v36, %v4542_v11  ;;  %v4589_v48 = vsub.f32 %v10295_v24, %v4588_v49 }
0x19fd   :  { %v11050_v1 = vand.u32 4294901760, %v10334_v53  ;;  %v4607_v17 = vsub.f32 %v10312_v43, %v11046_v15  ;;  %v4619_v11 = vsub.f32 %v10317_v8, %v11048_v21  ;;  %v4437_v36 = vand.u32 4294901760, %v4436_v45 }
0x19fe   :  { %4298 = vmatmul.mubr.f32.gmra.mrb[76].mxu1 %v9840_v33  ;;  %v10339_v33 = vsub.f32 %v10164_v63, %v4371_v40  ;;  %v11047_v63 = vand.u32 4294901760, %v10307_v25  ;;  %v10354_v40 = vsub.f32 %v4321_v31, %v10321_v4  ;;  %v4601_v31 = vsub.f32 %v10300_v10, %v11045_v16 }
0x19ff   :  { %4303 = vmatprep.mubr.f32.mxu1 %v8443_v0  ;;  %v4584_v35 = vand.u32 4294901760, %v4583_v46  ;;  %v7426_v3 = vpack.c.bf16 %v4578_v12, %v4566_v47  ;;  %v10379_v16 = vand.u32 4294901760, %v4327_v60  ;;  %v3179_v46 = vld [vmem:[#allocation3 + $0x30] sm:$0xff]  ;;  %v4613_v45 = vsub.f32 %v10334_v53, %v11050_v1 }
0x1a00   :  { %v11049_v2 = vand.u32 4294901760, %v10339_v33  ;;  %v4447_v19 = vsub.f32 %v10307_v25, %v11047_v63  ;;  %v11057_v56 = vand.u32 4294901760, %v10354_v40  ;;  %v4602_v15 = vand.u32 4294901760, %v4601_v31  ;;  %v3180_v31 = vld [vmem:[#allocation3 + $0x38] sm:$0xff] }
0x1a01   :  { %v10389_v12 = vsub.f32 %v4324_v22, %v10356_v38  ;;  %v4608_v63 = vand.u32 4294901760, %v4607_v17  ;;  %v4620_v21 = vand.u32 4294901760, %v4619_v11  ;;  %v4614_v22 = vand.u32 4294901760, %v4613_v45 }
0x1a02   :  { %4305 = vmatmul.mubr.f32.gmra.mrb[78].mxu1 %v9854_v58  ;;  %v4596_v58 = vand.u32 4294901760, %v4595_v23  ;;  %v4590_v23 = vand.u32 4294901760, %v4589_v48  ;;  %v4458_v48 = vsub.f32 %v10354_v40, %v11057_v56 }
0x1a03   :  { %4421 = vmatprep.mubr.f32.mxu1 %v8443_v0  ;;  %v7432_v11 = vpack.c.bf16 %v4620_v21, %v4608_v63  ;;  %v7436_v21 = vpack.c.bf16 %v10077_v20, %v10075_v39  ;;  %v11086_v39 = vand.u32 4294901760, %v10217_v30  ;;  %v11087_v20 = vand.u32 4294901760, %v10222_v28 }
0x1a04   :  { %v7428_v47 = vpack.c.bf16 %v4596_v58, %v4584_v35  ;;  %v4448_v35 = vand.u32 4294901760, %v4447_v19  ;;  %v11056_v58 = vand.u32 4294901760, %v10389_v12 }
0x1a06   :  { %4427 = vmatmul.mubr.f32.vlgmr.msra.gmra.mrb[60].mxu1 %v4426_v55  ;;  %v4625_v55 = vsub.f32 %v10339_v33, %v11049_v2  ;;  %v10397_v2 = vsub.f32 %v4327_v60, %v10379_v16  ;;  %v4469_v19 = vsub.f32 %v10389_v12, %v11056_v58  ;;  %v11092_v58 = vand.u32 4294901760, %v10256_v42 }
0x1a07   :  { %7423 = vmatpush1.bf16.msra.mxu1 %v7422_v50  ;;  %4432 = vmatprep.mubr.f32.mxu1 %v8443_v0  ;;  %v4330_v50 = vsel %vm2160_vm2, %v3179_v46, 0  ;;  %v3181_v46 = vld [vmem:[#allocation3 + $0x40] sm:$0xff] }
0x1a08   :  { %7425 = vmatprep.subr.bf16.mxu1 %v7424_v13  ;;  %v7430_v13 = vpack.c.bf16 %v4602_v15, %v4590_v23  ;;  %v4626_v1 = vand.u32 4294901760, %v4625_v55  ;;  %v10400_v17 = vand.u32 4294901760, %v4330_v50  ;;  %v11055_v60 = vand.u32 4294901760, %v10397_v2  ;;  %v3182_v55 = vld [vmem:[#allocation3 + $0x48] sm:$0xff] }
0x1a09   :  { %v4336_v63 = vsel %vm2160_vm2, %v3181_v46, 0 }
0x1a0a   :  { %4438 = vmatmul.mubr.f32.gmra.mrb[62].mxu1 %v4437_v36  ;;  %v4333_v36 = vsel %vm2160_vm2, %v3180_v31, 0  ;;  %v7434_v15 = vpack.c.bf16 %v4626_v1, %v4614_v22  ;;  %v10409_v23 = vsub.f32 %v4330_v50, %v10400_v17  ;;  %v4480_v1 = vsub.f32 %v10397_v2, %v11055_v60 }
0x1a0b   :  { %4443 = vmatprep.mubr.f32.mxu1 %v8443_v0  ;;  %7427 = vmatpush1.bf16.msra.mxu1 %v7426_v3  ;;  %v4459_v3 = vand.u32 4294901760, %v4458_v48  ;;  %v10411_v45 = vand.u32 4294901760, %v4333_v36  ;;  %v10424_v31 = vand.u32 4294901760, %v4336_v63  ;;  %v11091_v60 = vand.u32 4294901760, %v10251_v62 }
0x1a0c   :  { %7429 = vmatprep.subr.bf16.mxu1 %v7428_v47  ;;  %v4470_v47 = vand.u32 4294901760, %v4469_v19  ;;  %v11054_v50 = vand.u32 4294901760, %v10409_v23  ;;  %v4481_v22 = vand.u32 4294901760, %v4480_v1 }
0x1a0d   :  { %v10422_v48 = vsub.f32 %v4333_v36, %v10411_v45  ;;  %v10433_v46 = vsub.f32 %v4336_v63, %v10424_v31  ;;  %v7474_v56 = vpack.c.bf16 %v11092_v58, %v11091_v60  ;;  %v11098_v58 = vand.u32 4294901760, %v10317_v8 }
0x1a0e   :  { %4449 = vmatmul.mubr.f32.gmra.mrb[64].mxu1 %v4448_v35  ;;  %v4491_v35 = vsub.f32 %v10409_v23, %v11054_v50  ;;  %v11090_v50 = vand.u32 4294901760, %v10208_v29 }
0x1a0f   :  { %4454 = vmatprep.mubr.f32.mxu1 %v8443_v0  ;;  %7431 = vmatpush1.bf16.msra.mxu1 %v7430_v13  ;;  %v4339_v13 = vsel %vm2160_vm2, %v3182_v55, 0  ;;  %v11052_v19 = vand.u32 4294901760, %v10433_v46 }
0x1a10   :  { %7433 = vmatprep.subr.bf16.mxu1 %v7432_v11  ;;  %v11053_v11 = vand.u32 4294901760, %v10422_v48  ;;  %v10435_v36 = vand.u32 4294901760, %v4339_v13 }
0x1a11   :  { %v4513_v55 = vsub.f32 %v10433_v46, %v11052_v19  ;;  %v7468_v19 = vpack.c.bf16 %v4546_v34, %v4534_v59  ;;  %v7470_v59 = vpack.c.bf16 %v11087_v20, %v11086_v39  ;;  %v11088_v34 = vand.u32 4294901760, %v10228_v27 }
0x1a12   :  { %4460 = vmatmul.mubr.f32.gmra.mrb[66].mxu1 %v4459_v3  ;;  %v4492_v3 = vand.u32 4294901760, %v4491_v35  ;;  %v10457_v35 = vld [vmem:[#allocation10] ss:$8 sps:$4 sm:$0xff]  }
0x1a13   :  { %4465 = vmatprep.mubr.f32.mxu1 %v8443_v0  ;;  %7435 = vmatpush1.bf16.msra.mxu1 %v7434_v15  ;;  %v4502_v15 = vsub.f32 %v10422_v48, %v11053_v11 }
0x1a14   :  { %7437 = vmatprep.subr.bf16.mxu1 %v7436_v21  ;;  %v10443_v21 = vsub.f32 %v4339_v13, %v10435_v36  ;;  %v10455_v13 = vld [vmem:[#allocation10 + $0x4] ss:$8 sps:$4 sm:$0xff]  }
0x1a15   :  { %v4503_v63 = vand.u32 4294901760, %v4502_v15  ;;  %5523 = vmatprep.subr.bf16.mxu0 %v10455_v13  ;;  %v7438_v15 = vpack.c.bf16 %v10222_v28, %v10217_v30  ;;  %v11093_v30 = vand.u32 4294901760, %v10268_v41  ;;  %v11094_v28 = vand.u32 4294901760, %v10273_v6 }
0x1a16   :  { %4471 = vmatmul.mubr.f32.gmra.mrb[68].mxu1 %v4470_v47  ;;  %v11051_v1 = vand.u32 4294901760, %v10443_v21  ;;  %v4514_v47 = vand.u32 4294901760, %v4513_v55  ;;  %5524 = vmatpush1.bf16.msra.mxu0 %v10457_v35  ;;  %v7442_v55 = vpack.c.bf16 %v10256_v42, %v10251_v62  ;;  %v11097_v42 = vand.u32 4294901760, %v10312_v43 }
0x1a17   :  { %4476 = vmatprep.mubr.f32.mxu1 %v8443_v0 }
0x1a1a   :  { %4482 = vmatmul.mubr.f32.gmra.mrb[70].mxu1 %v4481_v22  ;;  %v4524_v22 = vsub.f32 %v10443_v21, %v11051_v1  ;;  %v7448_v1 = vpack.c.bf16 %v10317_v8, %v10312_v43  ;;  %v11104_v43 = vand.u32 4294901760, %v10397_v2  ;;  %v11105_v8 = vand.u32 4294901760, %v10409_v23 }
0x1a1b   :  { %4487 = vmatprep.mubr.f32.mxu1 %v8443_v0 }
0x1a1e   :  { %4493 = vmatmul.mubr.f32.gmra.mrb[72].mxu1 %v4492_v3  ;;  %v4525_v3 = vand.u32 4294901760, %v4524_v22  ;;  %v10473_v22 = vld [vmem:[#allocation10 + $0x14] ss:$8 sps:$4 sm:$0xff]  }
0x1a1f   :  { %4498 = vmatprep.mubr.f32.mxu1 %v8443_v0  ;;  %5525 = vmatprep.subr.bf16.mxu0 %v10473_v22 }
0x1a22   :  { %4504 = vmatmul.mubr.f32.gmra.mrb[74].mxu1 %v4503_v63  ;;  %v7440_v63 = vpack.c.bf16 %v10233_v32, %v10228_v27  ;;  %v7476_v27 = vpack.c.bf16 %v11094_v28, %v11093_v30 }
0x1a23   :  { %4509 = vmatprep.mubr.f32.mxu1 %v8443_v0 }
0x1a26   :  { %4515 = vmatmul.mubr.f32.gmra.mrb[76].mxu1 %v4514_v47  ;;  %v7444_v47 = vpack.c.bf16 %v10273_v6, %v10268_v41  ;;  %v7480_v41 = vpack.c.bf16 %v11098_v58, %v11097_v42  ;;  %v11099_v6 = vand.u32 4294901760, %v10307_v25 }
0x1a27   :  { %4520 = vmatprep.mubr.f32.mxu1 %v8443_v0 }
0x1a2a   :  { %4526 = vmatmul.mubr.f32.gmra.mrb[78].mxu1 %v4525_v3  ;;  %v10475_v3 = vld [vmem:[#allocation10 + $0x10] ss:$8 sps:$4 sm:$0xff]  }
0x1a2b   :  { %4676 = vmatprep.mubr.f32.mxu1 %v8443_v0  ;;  %5526 = vmatpush1.bf16.msra.mxu0 %v10475_v3 }
0x1a2e   :  { %4678 = vmatmul.mubr.f32.vlgmr.msra.gmra.mrb[60].mxu1 %v10201_v61 }
0x1a2f   :  { %7439 = vmatpush1.bf16.msra.mxu1 %v7438_v15  ;;  %4683 = vmatprep.mubr.f32.mxu1 %v8443_v0  ;;  %v7446_v15 = vpack.c.bf16 %v10300_v10, %v10295_v24 }
0x1a30   :  { %7441 = vmatprep.subr.bf16.mxu1 %v7440_v63  ;;  %v7450_v63 = vpack.c.bf16 %v10339_v33, %v10334_v53 }
0x1a32   :  { %4685 = vmatmul.mubr.f32.gmra.mrb[62].mxu1 %v10212_v54 }
0x1a33   :  { %4690 = vmatprep.mubr.f32.mxu1 %v8443_v0  ;;  %7443 = vmatpush1.bf16.msra.mxu1 %v7442_v55  ;;  %v10489_v55 = vld [vmem:[#allocation10 + $0x24] ss:$8 sps:$4 sm:$0xff]  }
0x1a34   :  { %7445 = vmatprep.subr.bf16.mxu1 %v7444_v47  ;;  %v10492_v47 = vld [vmem:[#allocation10 + $0x20] ss:$8 sps:$4 sm:$0xff]   ;;  %5527 = vmatprep.subr.bf16.mxu0 %v10489_v55 }
0x1a35   :  { %5528 = vmatpush1.bf16.msra.mxu0 %v10492_v47 }
0x1a36   :  { %4692 = vmatmul.mubr.f32.gmra.mrb[64].mxu1 %v10263_v7 }
0x1a37   :  { %4697 = vmatprep.mubr.f32.mxu1 %v8443_v0  ;;  %7447 = vmatpush1.bf16.msra.mxu1 %v7446_v15  ;;  %v10504_v15 = vld [vmem:[#allocation10 + $0x30] ss:$8 sps:$4 sm:$0xff]  }
0x1a38   :  { %7449 = vmatprep.subr.bf16.mxu1 %v7448_v1  ;;  %v10502_v1 = vld [vmem:[#allocation10 + $0x34] ss:$8 sps:$4 sm:$0xff]  }
0x1a39   :  { %5529 = vmatprep.subr.bf16.mxu0 %v10502_v1 }
0x1a3a   :  { %4699 = vmatmul.mubr.f32.gmra.mrb[66].mxu1 %v10321_v4  ;;  %5530 = vmatpush1.bf16.msra.mxu0 %v10504_v15 }
0x1a3b   :  { %4704 = vmatprep.mubr.f32.mxu1 %v8443_v0  ;;  %7451 = vmatpush1.bf16.msra.mxu1 %v7450_v63  ;;  %v11085_v63 = vmov 0  }
0x1a3c   :  { %7453 = vmatprep.subr.bf16.mxu1 %v10032_v9  ;;  %5610 = vmatprep.subr.bf16.mxu0 %v10455_v13 }
0x1a3d   :  { %5556 = vmatmul.mubr.bf16.vlgmr.msra.gmra.mrb[20].mxu0 %v11085_v63 }
0x1a3e   :  { %4706 = vmatmul.mubr.f32.gmra.mrb[68].mxu1 %v10356_v38  ;;  %5611 = vmatpush1.bf16.msra.mxu0 %v10457_v35 }
0x1a3f   :  { %4711 = vmatprep.mubr.f32.mxu1 %v8443_v0  ;;  %5642 = vmatprep.mubr.bf16.mxu0 %v11085_v63 }
0x1a40   :  { %5612 = vmatprep.subr.bf16.mxu0 %v10473_v22 }
0x1a42   :  { %4713 = vmatmul.mubr.f32.gmra.mrb[70].mxu1 %v10379_v16  ;;  %5613 = vmatpush1.bf16.msra.mxu0 %v10475_v3 }
0x1a43   :  { %4718 = vmatprep.mubr.f32.mxu1 %v8443_v0  ;;  %5614 = vmatprep.subr.bf16.mxu0 %v10489_v55 }
0x1a46   :  { %4720 = vmatmul.mubr.f32.gmra.mrb[72].mxu1 %v10400_v17  ;;  %5615 = vmatpush1.bf16.msra.mxu0 %v10492_v47 }
0x1a47   :  { %4725 = vmatprep.mubr.f32.mxu1 %v8443_v0  ;;  %5616 = vmatprep.subr.bf16.mxu0 %v10502_v1 }
0x1a4a   :  { %4727 = vmatmul.mubr.f32.gmra.mrb[74].mxu1 %v10411_v45  ;;  %5617 = vmatpush1.bf16.msra.mxu0 %v10504_v15 }
0x1a4b   :  { %4732 = vmatprep.mubr.f32.mxu1 %v8443_v0  ;;  %5701 = vmatprep.subr.bf16.mxu0 %v10455_v13 }
0x1a4e   :  { %4734 = vmatmul.mubr.f32.gmra.mrb[76].mxu1 %v10424_v31 }
0x1a4f   :  { %4739 = vmatprep.mubr.f32.mxu1 %v8443_v0 }
0x1a52   :  { %4741 = vmatmul.mubr.f32.gmra.mrb[78].mxu1 %v10435_v36 }
0x1a53   :  { %4843 = vmatprep.mubr.f32.mxu1 %v8443_v0 }
0x1a56   :  { %4846 = vmatmul.mubr.f32.vlgmr.msra.gmra.mrb[60].mxu1 %v10208_v29  ;;  %v11096_v29 = vand.u32 4294901760, %v10300_v10  ;;  %v11102_v10 = vand.u32 4294901760, %v10354_v40 }
0x1a57   :  { %7455 = vmatpush1.bf16.msra.mxu1 %v10101_v51  ;;  %4851 = vmatprep.mubr.f32.mxu1 %v8443_v0 }
0x1a58   :  { %7457 = vmatprep.subr.bf16.mxu1 %v10112_v44  ;;  %v7478_v62 = vpack.c.bf16 %v11096_v29, %v4588_v49 }
0x1a5a   :  { %4854 = vmatmul.mubr.f32.gmra.mrb[62].mxu1 %v10238_v5 }
0x1a5b   :  { %4859 = vmatprep.mubr.f32.mxu1 %v8443_v0  ;;  %7459 = vmatpush1.bf16.msra.mxu1 %v10143_v57 }
0x1a5c   :  { %7461 = vmatprep.subr.bf16.mxu1 %v10149_v26 }
0x1a5e   :  { %4862 = vmatmul.mubr.f32.gmra.mrb[64].mxu1 %v10307_v25  ;;  %v11103_v25 = vand.u32 4294901760, %v10389_v12 }
0x1a5f   :  { %4867 = vmatprep.mubr.f32.mxu1 %v8443_v0  ;;  %7463 = vmatpush1.bf16.msra.mxu1 %v10179_v14 }
0x1a60   :  { %7465 = vmatprep.subr.bf16.mxu1 %v10188_v37 }
0x1a62   :  { %4870 = vmatmul.mubr.f32.gmra.mrb[66].mxu1 %v10354_v40 }
0x1a63   :  { %4875 = vmatprep.mubr.f32.mxu1 %v8443_v0  ;;  %7467 = vmatpush1.bf16.msra.mxu1 %v10198_v18 }
0x1a64   :  { %7469 = vmatprep.subr.bf16.mxu1 %v7468_v19  ;;  %v11089_v19 = vand.u32 4294901760, %v10233_v32  ;;  %v11095_v32 = vand.u32 4294901760, %v10238_v5  ;;  %v11100_v5 = vand.u32 4294901760, %v10334_v53  ;;  %v11106_v53 = vand.u32 4294901760, %v10422_v48 }
0x1a66   :  { %4878 = vmatmul.mubr.f32.gmra.mrb[68].mxu1 %v10389_v12  ;;  %v7472_v11 = vpack.c.bf16 %v11089_v19, %v11088_v34 }
0x1a67   :  { %4883 = vmatprep.mubr.f32.mxu1 %v8443_v0 }
0x1a6a   :  { %4886 = vmatmul.mubr.f32.gmra.mrb[70].mxu1 %v10397_v2 }
0x1a6b   :  { %4891 = vmatprep.mubr.f32.mxu1 %v8443_v0 }
0x1a6e   :  { %4894 = vmatmul.mubr.f32.gmra.mrb[72].mxu1 %v10409_v23 }
0x1a6f   :  { %4899 = vmatprep.mubr.f32.mxu1 %v8443_v0 }
0x1a72   :  { %4902 = vmatmul.mubr.f32.gmra.mrb[74].mxu1 %v10422_v48 }
0x1a73   :  { %4907 = vmatprep.mubr.f32.mxu1 %v8443_v0 }
0x1a76   :  { %4910 = vmatmul.mubr.f32.gmra.mrb[76].mxu1 %v10433_v46 }
0x1a77   :  { %4915 = vmatprep.mubr.f32.mxu1 %v8443_v0 }
0x1a7a   :  { %4918 = vmatmul.mubr.f32.gmra.mrb[78].mxu1 %v10443_v21 }
0x1a7b   :  { %5004 = vmatprep.mubr.f32.mxu1 %v8443_v0 }
0x1a7e   :  { %5008 = vmatmul.mubr.f32.vlgmr.msra.gmra.mrb[60].mxu1 %v11090_v50 }
0x1a7f   :  { %7471 = vmatpush1.bf16.msra.mxu1 %v7470_v59  ;;  %5013 = vmatprep.mubr.f32.mxu1 %v8443_v0 }
0x1a80   :  { %7473 = vmatprep.subr.bf16.mxu1 %v7472_v11 }
0x1a82   :  { %5017 = vmatmul.mubr.f32.gmra.mrb[62].mxu1 %v11095_v32 }
0x1a83   :  { %5022 = vmatprep.mubr.f32.mxu1 %v8443_v0  ;;  %7475 = vmatpush1.bf16.msra.mxu1 %v7474_v56  ;;  %v11101_v56 = vand.u32 4294901760, %v10339_v33  ;;  %v11108_v33 = vand.u32 4294901760, %v10443_v21 }
0x1a84   :  { %7477 = vmatprep.subr.bf16.mxu1 %v7476_v27 }
0x1a85   :  { %v7482_v24 = vpack.c.bf16 %v11101_v56, %v11100_v5 }
0x1a86   :  { %5026 = vmatmul.mubr.f32.gmra.mrb[64].mxu1 %v11099_v6 }
0x1a87   :  { %5031 = vmatprep.mubr.f32.mxu1 %v8443_v0  ;;  %7479 = vmatpush1.bf16.msra.mxu1 %v7478_v62 }
0x1a88   :  { %7481 = vmatprep.subr.bf16.mxu1 %v7480_v41 }
0x1a8a   :  { %5035 = vmatmul.mubr.f32.gmra.mrb[66].mxu1 %v11102_v10 }
0x1a8b   :  { %5040 = vmatprep.mubr.f32.mxu1 %v8443_v0  ;;  %7483 = vmatpush1.bf16.msra.mxu1 %v7482_v24 }
0x1a8c   :  { %7485 = vmatprep.subr.bf16.mxu1 %v10032_v9  ;;  %v11107_v9 = vand.u32 4294901760, %v10433_v46 }
0x1a8e   :  { %5044 = vmatmul.mubr.f32.gmra.mrb[68].mxu1 %v11103_v25 }
0x1a8f   :  { %5049 = vmatprep.mubr.f32.mxu1 %v8443_v0 }
0x1a92   :  { %5053 = vmatmul.mubr.f32.gmra.mrb[70].mxu1 %v11104_v43 }
0x1a93   :  { %5058 = vmatprep.mubr.f32.mxu1 %v8443_v0 }
0x1a96   :  { %5062 = vmatmul.mubr.f32.gmra.mrb[72].mxu1 %v11105_v8 }
0x1a97   :  { %5067 = vmatprep.mubr.f32.mxu1 %v8443_v0 }
0x1a9a   :  { %5071 = vmatmul.mubr.f32.gmra.mrb[74].mxu1 %v11106_v53 }
0x1a9b   :  { %5076 = vmatprep.mubr.f32.mxu1 %v8443_v0 }
0x1a9e   :  { %5080 = vmatmul.mubr.f32.gmra.mrb[76].mxu1 %v11107_v9 }
0x1a9f   :  { %5085 = vmatprep.mubr.f32.mxu1 %v8443_v0 }
0x1aa2   :  { %5089 = vmatmul.mubr.f32.gmra.mrb[78].mxu1 %v11108_v33 }
0x1aa3   :  { %5207 = vmatprep.mubr.f32.mxu1 %v8443_v0 }
0x1aa6   :  { %5209 = vmatmul.mubr.f32.vlgmr.msra.gmra.mrb[60].mxu1 %v10201_v61 }
0x1aa7   :  { %7487 = vmatpush1.bf16.msra.mxu1 %v10101_v51  ;;  %5214 = vmatprep.mubr.f32.mxu1 %v8443_v0 }
0x1aa8   :  { %7489 = vmatprep.subr.bf16.mxu1 %v10112_v44 }
0x1aaa   :  { %5216 = vmatmul.mubr.f32.gmra.mrb[62].mxu1 %v10212_v54 }
0x1aab   :  { %5221 = vmatprep.mubr.f32.mxu1 %v8443_v0  ;;  %7491 = vmatpush1.bf16.msra.mxu1 %v10143_v57 }
0x1aac   :  { %7493 = vmatprep.subr.bf16.mxu1 %v10149_v26 }
0x1aae   :  { %5223 = vmatmul.mubr.f32.gmra.mrb[64].mxu1 %v10263_v7 }
0x1aaf   :  { %5228 = vmatprep.mubr.f32.mxu1 %v8443_v0  ;;  %7495 = vmatpush1.bf16.msra.mxu1 %v10179_v14  ;;  %v3164_v14 = vld [vmem:[%s10999_s9] sm:$0x3] }
0x1ab0   :  { %7497 = vmatprep.subr.bf16.mxu1 %v10188_v37  ;;  %v11109_v37 = vsub.s32 0, %v9226_v52 }
0x1ab2   :  { %5230 = vmatmul.mubr.f32.gmra.mrb[66].mxu1 %v10321_v4 }
0x1ab3   :  { %5235 = vmatprep.mubr.f32.mxu1 %v8443_v0  ;;  %7499 = vmatpush1.bf16.msra.mxu1 %v10198_v18  ;;  %v5433_v18 = vrot.slane %v3164_v14, %v11109_v37 }
0x1ab6   :  { %5237 = vmatmul.mubr.f32.gmra.mrb[68].mxu1 %v10356_v38 }
0x1ab7   :  { %5242 = vmatprep.mubr.f32.mxu1 %v8443_v0 }
0x1aba   :  { %5244 = vmatmul.mubr.f32.gmra.mrb[70].mxu1 %v10379_v16 }
0x1abb   :  { %5249 = vmatprep.mubr.f32.mxu1 %v8443_v0 }
0x1abe   :  { %5251 = vmatmul.mubr.f32.gmra.mrb[72].mxu1 %v10400_v17 }
0x1abf   :  { %5256 = vmatprep.mubr.f32.mxu1 %v8443_v0 }
0x1ac2   :  { %5258 = vmatmul.mubr.f32.gmra.mrb[74].mxu1 %v10411_v45 }
0x1ac3   :  { %5263 = vmatprep.mubr.f32.mxu1 %v8443_v0 }
0x1ac6   :  { %5265 = vmatmul.mubr.f32.gmra.mrb[76].mxu1 %v10424_v31 }
0x1ac7   :  { %5270 = vmatprep.mubr.f32.mxu1 %v8443_v0 }
0x1aca   :  { %5272 = vmatmul.mubr.f32.gmra.mrb[78].mxu1 %v10435_v36 }
0x1acb   :  { %5358 = vmatprep.mubr.f32.mxu1 %v8443_v0 }
0x1ace   :  { %5360 = vmatmul.mubr.f32.vlgmr.msra.gmra.mrb[60].mxu1 %v10201_v61  ;;  %v11110_v61 = vsub.s32 1, %v9226_v52 }
0x1acf   :  { %5365 = vmatprep.mubr.f32.mxu1 %v8443_v0 }
0x1ad2   :  { %5367 = vmatmul.mubr.f32.gmra.mrb[62].mxu1 %v10212_v54  ;;  %v5437_v54 = vrot.slane %v3164_v14, %v11110_v61 }
0x1ad3   :  { %5372 = vmatprep.mubr.f32.mxu1 %v8443_v0 }
0x1ad6   :  { %5374 = vmatmul.mubr.f32.gmra.mrb[64].mxu1 %v10263_v7 }
0x1ad7   :  { %5379 = vmatprep.mubr.f32.mxu1 %v8443_v0 }
0x1ada   :  { %5381 = vmatmul.mubr.f32.gmra.mrb[66].mxu1 %v10321_v4 }
0x1adb   :  { %5386 = vmatprep.mubr.f32.mxu1 %v8443_v0 }
0x1ade   :  { %5388 = vmatmul.mubr.f32.gmra.mrb[68].mxu1 %v10356_v38 }
0x1adf   :  { %5393 = vmatprep.mubr.f32.mxu1 %v8443_v0 }
0x1ae2   :  { %5395 = vmatmul.mubr.f32.gmra.mrb[70].mxu1 %v10379_v16 }
0x1ae3   :  { %5400 = vmatprep.mubr.f32.mxu1 %v8443_v0 }
0x1ae6   :  { %5402 = vmatmul.mubr.f32.gmra.mrb[72].mxu1 %v10400_v17 }
0x1ae7   :  { %5407 = vmatprep.mubr.f32.mxu1 %v8443_v0 }
0x1aea   :  { %5409 = vmatmul.mubr.f32.gmra.mrb[74].mxu1 %v10411_v45 }
0x1aeb   :  { %5414 = vmatprep.mubr.f32.mxu1 %v8443_v0 }
0x1aee   :  { %5416 = vmatmul.mubr.f32.gmra.mrb[76].mxu1 %v10424_v31 }
0x1aef   :  { %5421 = vmatprep.mubr.f32.mxu1 %v8443_v0 }
0x1af2   :  { %5423 = vmatmul.mubr.f32.gmra.mrb[78].mxu1 %v10435_v36 }
0x1b10   :  { %v5557_v51 = vpop.f32.mrb[20].mxu0 }
0x1b11   :  { %v5559_v44 = vpop.f32.mrb[21].mxu0 }
0x1b12   :  { %v5561_v57 = vpop.f32.mrb[22].mxu0 }
0x1b13   :  { %v5562_v26 = vpop.f32.mrb[23].mxu0 }
0x1ba1   :  { %v5361_v7 = vpop.f32.mrb[60].mxu1 }
0x1ba2   :  { %v5440_v38 = vadd.f32 %v5433_v18, %v5361_v7  ;;  %v5363_v4 = vpop.f32.mrb[61].mxu1 }
0x1ba3   :  { %v5441_v49 = vadd.f32 %v5437_v54, %v5363_v4 }
0x1ba4   :  { %v5564_v16 = vadd.f32 %v5557_v51, %v5440_v38  ;;  %v5482_v38 = vld [vmem:[%s10992_s2] sm:$0xff] }
0x1ba5   :  { %v5565_v40 = vadd.f32 %v5559_v44, %v5441_v49  ;;  %v5368_v2 = vpop.f32.mrb[62].mxu1  ;;  %vm5596_vm12 = vcmp.gt.f32.partialorder %v5482_v38, 0.5 }
0x1ba6   :  { %v10669_v12 = vadd.f32 %v5433_v18, %v5368_v2  ;;  %v5370_v17 = vpop.f32.mrb[63].mxu1  ;;  %v7053_v9 = vmul.f32 -1.442695, %v5564_v16 }
0x1ba7   :  { %8181 = vtanh.f32 %v5565_v40  ;;  %v10671_v60 = vadd.f32 %v5437_v54, %v5370_v17 }
0x1ba8   :  { %8183 = vpow2.f32 %v7053_v9 }
0x1ba9   :  { %v5375_v23 = vpop.f32.mrb[64].mxu1 }
0x1baa   :  { %v10673_v45 = vadd.f32 %v5433_v18, %v5375_v23  ;;  %v5377_v50 = vpop.f32.mrb[65].mxu1 }
0x1bab   :  { %v10675_v48 = vadd.f32 %v5437_v54, %v5377_v50 }
0x1bad   :  { %v5382_v52 = vpop.f32.mrb[66].mxu1 }
0x1bae   :  { %v10677_v31 = vadd.f32 %v5433_v18, %v5382_v52  ;;  %v5384_v11 = vpop.f32.mrb[67].mxu1 }
0x1baf   :  { %v10679_v46 = vadd.f32 %v5437_v54, %v5384_v11 }
0x1bb1   :  { %v8182_v36 = vpop.eup %8181  ;;  %v5389_v21 = vpop.f32.mrb[68].mxu1 }
0x1bb2   :  { %v10681_v39 = vadd.f32 %v5433_v18, %v5389_v21  ;;  %5581 = vrot.lane.b32.xlu0 %v8182_v36, %s8445_s5  ;;  %v5391_v20 = vpop.f32.mrb[69].mxu1  ;;  %v8184_v33 = vpop.eup %8183 }
0x1bb3   :  { %v10684_v59 = vadd.f32 %v5437_v54, %v5391_v20  ;;  %v5572_v51 = vadd.f32 1.0, %v8184_v33 }
0x1bb5   :  { %v5396_v34 = vpop.f32.mrb[70].mxu1  ;;  %8185 = vrcp.f32 %v5572_v51 }
0x1bb6   :  { %v10686_v19 = vadd.f32 %v5433_v18, %v5396_v34  ;;  %v5398_v30 = vpop.f32.mrb[71].mxu1 }
0x1bb7   :  { %v10688_v28 = vadd.f32 %v5437_v54, %v5398_v30 }
0x1bb9   :  { %v5403_v27 = vpop.f32.mrb[72].mxu1 }
0x1bba   :  { %v10690_v32 = vadd.f32 %v5433_v18, %v5403_v27  ;;  %v5405_v29 = vpop.f32.mrb[73].mxu1 }
0x1bbb   :  { %v10692_v62 = vadd.f32 %v5437_v54, %v5405_v29 }
0x1bbd   :  { %v5410_v42 = vpop.f32.mrb[74].mxu1 }
0x1bbe   :  { %v10694_v58 = vadd.f32 %v5433_v18, %v5410_v42  ;;  %v5412_v41 = vpop.f32.mrb[75].mxu1 }
0x1bbf   :  { %v10696_v6 = vadd.f32 %v5437_v54, %v5412_v41  ;;  %v8186_v44 = vpop.eup %8185 }
0x1bc0   :  { %v5579_v14 = vmul.f32 0.0, %v8186_v44 }
0x1bc1   :  { %v5417_v5 = vpop.f32.mrb[76].mxu1 }
0x1bc2   :  { %v10698_v56 = vadd.f32 %v5433_v18, %v5417_v5  ;;  %v5419_v24 = vpop.f32.mrb[77].mxu1 }
0x1bc3   :  { %v10700_v10 = vadd.f32 %v5437_v54, %v5419_v24 }
0x1bc5   :  { %v5424_v25 = vpop.f32.mrb[78].mxu1 }
0x1bc6   :  { %v10702_v43 = vadd.f32 %v5433_v18, %v5424_v25  ;;  %v5426_v8 = vpop.f32.mrb[79].mxu1 }
0x1bc7   :  { %v10704_v53 = vadd.f32 %v5437_v54, %v5426_v8  ;;  %v7054_v54 = vmul.f32 -1.442695, %v5565_v40 }
0x1c24   :  { %v5582_v57 = vpop.permute.xlu0 %5581 }
0x1c25   :  { %v5584_v26 = vmul.f32 %v8186_v44, %v5582_v57  ;;  %v7055_v44 = vld [vmem:[%s10992_s2 + $0x8] sm:$0xff] }
0x1c26   :  { %vm5687_vm13 = vcmp.gt.f32.partialorder %v7055_v44, 0.5 }
0x1c27   :  { %5586 = vrot.lane.b32.xlu1 %v5584_v26, %s8445_s5 }
0x1c99   :  { %v5587_v37 = vpop.permute.xlu1 %5586 }
0x1c9a   :  { %v5589_v61 = vadd.f32 %v5587_v37, %v5579_v14 }
0x1c9c   :  { %8187 = vtanh.f32 %v5589_v61  ;;  %5599 = vrot.lane.b32.xlu1 %v5589_v61, %s8445_s5 }
0x1c9d   :  { %8189 = vpow2.f32 %v7054_v54 }
0x1ca6   :  { %v8188_v18 = vpop.eup %8187 }
0x1ca7   :  { %5592 = vrot.lane.b32.xlu0 %v8188_v18, %s8445_s5  ;;  %v8190_v7 = vpop.eup %8189 }
0x1ca8   :  { %v5573_v4 = vadd.f32 1.0, %v8190_v7 }
0x1caa   :  { %8191 = vrcp.f32 %v5573_v4 }
0x1cb4   :  { %v8192_v2 = vpop.eup %8191 }
0x1d0e   :  { %v5600_v49 = vpop.permute.xlu1 %5599 }
0x1d0f   :  { %v5602_v16 = vsel %vm5596_vm12, %v5600_v49, 0.0 }
0x1d10   :  { %5667 = vrot.lane.b32.xlu1 %v5602_v16, %s8445_s5 }
0x1d19   :  { %v5593_v17 = vpop.permute.xlu0 %5592 }
0x1d1a   :  { %v5595_v23 = vmul.f32 %v8192_v2, %v5593_v17 }
0x1d1c   :  { %v5597_v50 = vsel %vm5596_vm12, %v5595_v23, 0.0 }
0x1d1d   :  { %v5606_v52 = vpack.c.bf16 %v5597_v50, %v5597_v50 }
0x1d1f   :  { %7056 = vmatmul.mubr.msk.bf16.vlgmr.msra.gmra.mrb[24].mxu0 %vm2160_vm2, %v5606_v52 }
0x1d20   :  { %5702 = vmatpush1.bf16.msra.mxu0 %v10457_v35  ;;  %5733 = vmatprep.mubr.bf16.mxu0 %v11085_v63 }
0x1d21   :  { %5703 = vmatprep.subr.bf16.mxu0 %v10473_v22 }
0x1d24   :  { %5704 = vmatpush1.bf16.msra.mxu0 %v10475_v3 }
0x1d25   :  { %5705 = vmatprep.subr.bf16.mxu0 %v10489_v55 }
0x1d28   :  { %5706 = vmatpush1.bf16.msra.mxu0 %v10492_v47 }
0x1d29   :  { %5707 = vmatprep.subr.bf16.mxu0 %v10502_v1 }
0x1d2c   :  { %5708 = vmatpush1.bf16.msra.mxu0 %v10504_v15 }
0x1d2d   :  { %5792 = vmatprep.subr.bf16.mxu0 %v10455_v13 }
0x1df2   :  { %v5644_v40 = vpop.f32.mrb[24].mxu0 }
0x1df3   :  { %v5651_v11 = vadd.f32 %v5644_v40, %v10669_v12  ;;  %v5646_v36 = vpop.f32.mrb[25].mxu0  ;;  %v5668_v12 = vpop.permute.xlu1 %5667 }
0x1df4   :  { %v5652_v21 = vadd.f32 %v5646_v36, %v10671_v60  ;;  %v5648_v20 = vpop.f32.mrb[26].mxu0 }
0x1df5   :  { %v5649_v34 = vpop.f32.mrb[27].mxu0  ;;  %v7057_v27 = vmul.f32 -1.442695, %v5651_v11 }
0x1df6   :  { %8193 = vtanh.f32 %v5652_v21  ;;  %v7058_v33 = vmul.f32 -1.442695, %v5652_v21 }
0x1df7   :  { %8195 = vpow2.f32 %v7057_v27 }
0x1e00   :  { %v8194_v30 = vpop.eup %8193 }
0x1e01   :  { %5672 = vrot.lane.b32.xlu0 %v8194_v30, %s8445_s5  ;;  %v8196_v29 = vpop.eup %8195 }
0x1e02   :  { %v5659_v42 = vadd.f32 1.0, %v8196_v29 }
0x1e04   :  { %8197 = vrcp.f32 %v5659_v42  ;;  %v7059_v42 = vld [vmem:[%s10992_s2 + $0x10] sm:$0xff] }
0x1e05   :  { %vm5778_vm14 = vcmp.gt.f32.partialorder %v7059_v42, 0.5 }
0x1e0e   :  { %v8198_v41 = vpop.eup %8197 }
0x1e0f   :  { %v5670_v25 = vmul.f32 %v8198_v41, %v5668_v12 }
0x1e73   :  { %v5673_v5 = vpop.permute.xlu0 %5672 }
0x1e74   :  { %v5675_v24 = vmul.f32 %v8198_v41, %v5673_v5 }
0x1e76   :  { %5677 = vrot.lane.b32.xlu0 %v5675_v24, %s8445_s5 }
0x1ee8   :  { %v5678_v8 = vpop.permute.xlu0 %5677 }
0x1ee9   :  { %v5680_v60 = vadd.f32 %v5678_v8, %v5670_v25 }
0x1eeb   :  { %8199 = vtanh.f32 %v5680_v60  ;;  %5690 = vrot.lane.b32.xlu0 %v5680_v60, %s8445_s5 }
0x1eec   :  { %8201 = vpow2.f32 %v7058_v33 }
0x1ef5   :  { %v8200_v9 = vpop.eup %8199 }
0x1ef6   :  { %5683 = vrot.lane.b32.xlu1 %v8200_v9, %s8445_s5  ;;  %v8202_v51 = vpop.eup %8201 }
0x1ef7   :  { %v5660_v57 = vadd.f32 1.0, %v8202_v51 }
0x1ef9   :  { %8203 = vrcp.f32 %v5660_v57 }
0x1f03   :  { %v8204_v37 = vpop.eup %8203 }
0x1f5d   :  { %v5691_v26 = vpop.permute.xlu0 %5690 }
0x1f5e   :  { %v5693_v14 = vsel %vm5687_vm13, %v5691_v26, %v5602_v16 }
0x1f5f   :  { %5758 = vrot.lane.b32.xlu0 %v5693_v14, %s8445_s5 }
0x1f68   :  { %v5684_v61 = vpop.permute.xlu1 %5683 }
0x1f69   :  { %v5686_v18 = vmul.f32 %v8204_v37, %v5684_v61 }
0x1f6b   :  { %v5688_v54 = vsel %vm5687_vm13, %v5686_v18, %v5597_v50 }
0x1f6c   :  { %v5697_v7 = vpack.c.bf16 %v5688_v54, %v5688_v54 }
0x1f6e   :  { %7060 = vmatmul.mubr.msk.bf16.vlgmr.msra.gmra.mrb[28].mxu0 %vm2160_vm2, %v5697_v7 }
0x1f6f   :  { %5793 = vmatpush1.bf16.msra.mxu0 %v10457_v35  ;;  %5824 = vmatprep.mubr.bf16.mxu0 %v11085_v63 }
0x1f70   :  { %5794 = vmatprep.subr.bf16.mxu0 %v10473_v22 }
0x1f73   :  { %5795 = vmatpush1.bf16.msra.mxu0 %v10475_v3 }
0x1f74   :  { %5796 = vmatprep.subr.bf16.mxu0 %v10489_v55 }
0x1f77   :  { %5797 = vmatpush1.bf16.msra.mxu0 %v10492_v47 }
0x1f78   :  { %5798 = vmatprep.subr.bf16.mxu0 %v10502_v1 }
0x1f7b   :  { %5799 = vmatpush1.bf16.msra.mxu0 %v10504_v15 }
0x1f7c   :  { %5883 = vmatprep.subr.bf16.mxu0 %v10455_v13 }
0x2041   :  { %v5735_v38 = vpop.f32.mrb[28].mxu0 }
0x2042   :  { %v5742_v4 = vadd.f32 %v5735_v38, %v10673_v45  ;;  %v5737_v49 = vpop.f32.mrb[29].mxu0  ;;  %v5759_v45 = vpop.permute.xlu0 %5758 }
0x2043   :  { %v5743_v16 = vadd.f32 %v5737_v49, %v10675_v48  ;;  %v5739_v2 = vpop.f32.mrb[30].mxu0 }
0x2044   :  { %v5740_v17 = vpop.f32.mrb[31].mxu0  ;;  %v7061_v50 = vmul.f32 -1.442695, %v5742_v4 }
0x2045   :  { %8205 = vtanh.f32 %v5743_v16  ;;  %v7062_v27 = vmul.f32 -1.442695, %v5743_v16 }
0x2046   :  { %8207 = vpow2.f32 %v7061_v50  ;;  %v7063_v50 = vld [vmem:[%s10992_s2 + $0x18] sm:$0xff] }
0x2047   :  { %vm5869_vm15 = vcmp.gt.f32.partialorder %v7063_v50, 0.5 }
0x204f   :  { %v8206_v23 = vpop.eup %8205 }
0x2050   :  { %5763 = vrot.lane.b32.xlu1 %v8206_v23, %s8445_s5  ;;  %v8208_v52 = vpop.eup %8207 }
0x2051   :  { %v5750_v40 = vadd.f32 1.0, %v8208_v52 }
0x2053   :  { %8209 = vrcp.f32 %v5750_v40 }
0x205d   :  { %v8210_v11 = vpop.eup %8209 }
0x205e   :  { %v5761_v20 = vmul.f32 %v8210_v11, %v5759_v45 }
0x20c2   :  { %v5764_v36 = vpop.permute.xlu1 %5763 }
0x20c3   :  { %v5766_v21 = vmul.f32 %v8210_v11, %v5764_v36 }
0x20c5   :  { %5768 = vrot.lane.b32.xlu1 %v5766_v21, %s8445_s5 }
0x2137   :  { %v5769_v34 = vpop.permute.xlu1 %5768 }
0x2138   :  { %v5771_v48 = vadd.f32 %v5769_v34, %v5761_v20 }
0x213a   :  { %8211 = vtanh.f32 %v5771_v48  ;;  %5781 = vrot.lane.b32.xlu1 %v5771_v48, %s8445_s5 }
0x213b   :  { %8213 = vpow2.f32 %v7062_v27 }
0x2144   :  { %v8212_v30 = vpop.eup %8211 }
0x2145   :  { %5774 = vrot.lane.b32.xlu0 %v8212_v30, %s8445_s5  ;;  %v8214_v29 = vpop.eup %8213 }
0x2146   :  { %v5751_v41 = vadd.f32 1.0, %v8214_v29 }
0x2148   :  { %8215 = vrcp.f32 %v5751_v41 }
0x2152   :  { %v8216_v12 = vpop.eup %8215 }
0x21ac   :  { %v5782_v5 = vpop.permute.xlu1 %5781 }
0x21ad   :  { %v5784_v24 = vsel %vm5778_vm14, %v5782_v5, %v5693_v14 }
0x21ae   :  { %5849 = vrot.lane.b32.xlu1 %v5784_v24, %s8445_s5 }
0x21b7   :  { %v5775_v25 = vpop.permute.xlu0 %5774 }
0x21b8   :  { %v5777_v8 = vmul.f32 %v8216_v12, %v5775_v25 }
0x21ba   :  { %v5779_v60 = vsel %vm5778_vm14, %v5777_v8, %v5688_v54 }
0x21bb   :  { %v5788_v9 = vpack.c.bf16 %v5779_v60, %v5779_v60 }
0x21bd   :  { %7064 = vmatmul.mubr.msk.bf16.vlgmr.msra.gmra.mrb[32].mxu0 %vm2160_vm2, %v5788_v9 }
0x21be   :  { %5884 = vmatpush1.bf16.msra.mxu0 %v10457_v35  ;;  %5915 = vmatprep.mubr.bf16.mxu0 %v11085_v63 }
0x21bf   :  { %5885 = vmatprep.subr.bf16.mxu0 %v10473_v22 }
0x21c2   :  { %5886 = vmatpush1.bf16.msra.mxu0 %v10475_v3 }
0x21c3   :  { %5887 = vmatprep.subr.bf16.mxu0 %v10489_v55 }
0x21c6   :  { %5888 = vmatpush1.bf16.msra.mxu0 %v10492_v47 }
0x21c7   :  { %5889 = vmatprep.subr.bf16.mxu0 %v10502_v1 }
0x21ca   :  { %5890 = vmatpush1.bf16.msra.mxu0 %v10504_v15 }
0x21cb   :  { %5974 = vmatprep.subr.bf16.mxu0 %v10455_v13 }
0x2290   :  { %v5826_v33 = vpop.f32.mrb[32].mxu0 }
0x2291   :  { %v5833_v51 = vadd.f32 %v5826_v33, %v10677_v31  ;;  %v5828_v44 = vpop.f32.mrb[33].mxu0  ;;  %v5850_v31 = vpop.permute.xlu1 %5849 }
0x2292   :  { %v5834_v57 = vadd.f32 %v5828_v44, %v10679_v46  ;;  %v5830_v26 = vpop.f32.mrb[34].mxu0 }
0x2293   :  { %v5831_v14 = vpop.f32.mrb[35].mxu0  ;;  %v7065_v61 = vmul.f32 -1.442695, %v5833_v51 }
0x2294   :  { %8217 = vtanh.f32 %v5834_v57  ;;  %v7066_v17 = vmul.f32 -1.442695, %v5834_v57  ;;  %v7067_v14 = vld [vmem:[%s10992_s2 + $0x20] sm:$0xff] }
0x2295   :  { %8219 = vpow2.f32 %v7065_v61  ;;  %vm5960_vm0 = vcmp.gt.f32.partialorder %v7067_v14, 0.5 }
0x229e   :  { %v8218_v37 = vpop.eup %8217 }
0x229f   :  { %5854 = vrot.lane.b32.xlu0 %v8218_v37, %s8445_s5  ;;  %v8220_v18 = vpop.eup %8219 }
0x22a0   :  { %v5841_v54 = vadd.f32 1.0, %v8220_v18 }
0x22a2   :  { %8221 = vrcp.f32 %v5841_v54 }
0x22ac   :  { %v8222_v7 = vpop.eup %8221 }
0x22ad   :  { %v5852_v49 = vmul.f32 %v8222_v7, %v5850_v31 }
0x2311   :  { %v5855_v38 = vpop.permute.xlu0 %5854 }
0x2312   :  { %v5857_v4 = vmul.f32 %v8222_v7, %v5855_v38 }
0x2314   :  { %5859 = vrot.lane.b32.xlu0 %v5857_v4, %s8445_s5 }
0x2386   :  { %v5860_v16 = vpop.permute.xlu0 %5859 }
0x2387   :  { %v5862_v46 = vadd.f32 %v5860_v16, %v5852_v49 }
0x2389   :  { %8223 = vtanh.f32 %v5862_v46  ;;  %5872 = vrot.lane.b32.xlu0 %v5862_v46, %s8445_s5 }
0x238a   :  { %8225 = vpow2.f32 %v7066_v17 }
0x2393   :  { %v8224_v2 = vpop.eup %8223 }
0x2394   :  { %5865 = vrot.lane.b32.xlu1 %v8224_v2, %s8445_s5  ;;  %v8226_v23 = vpop.eup %8225 }
0x2395   :  { %v5842_v52 = vadd.f32 1.0, %v8226_v23 }
0x2397   :  { %8227 = vrcp.f32 %v5842_v52 }
0x23a1   :  { %v8228_v36 = vpop.eup %8227 }
0x23fb   :  { %v5873_v40 = vpop.permute.xlu0 %5872 }
0x23fc   :  { %v5875_v11 = vsel %vm5869_vm15, %v5873_v40, %v5784_v24 }
0x23fd   :  { %5940 = vrot.lane.b32.xlu0 %v5875_v11, %s8445_s5 }
0x2406   :  { %v5866_v21 = vpop.permute.xlu1 %5865 }
0x2407   :  { %v5868_v45 = vmul.f32 %v8228_v36, %v5866_v21 }
0x2409   :  { %v5870_v20 = vsel %vm5869_vm15, %v5868_v45, %v5779_v60 }
0x240a   :  { %v5879_v34 = vpack.c.bf16 %v5870_v20, %v5870_v20 }
0x240c   :  { %7068 = vmatmul.mubr.msk.bf16.vlgmr.msra.gmra.mrb[36].mxu0 %vm2160_vm2, %v5879_v34 }
0x240d   :  { %5975 = vmatpush1.bf16.msra.mxu0 %v10457_v35  ;;  %6006 = vmatprep.mubr.bf16.mxu0 %v11085_v63 }
0x240e   :  { %5976 = vmatprep.subr.bf16.mxu0 %v10473_v22 }
0x2411   :  { %5977 = vmatpush1.bf16.msra.mxu0 %v10475_v3 }
0x2412   :  { %5978 = vmatprep.subr.bf16.mxu0 %v10489_v55 }
0x2415   :  { %5979 = vmatpush1.bf16.msra.mxu0 %v10492_v47 }
0x2416   :  { %5980 = vmatprep.subr.bf16.mxu0 %v10502_v1 }
0x2419   :  { %5981 = vmatpush1.bf16.msra.mxu0 %v10504_v15 }
0x241a   :  { %6065 = vmatprep.subr.bf16.mxu0 %v10455_v13 }
0x24df   :  { %v5917_v48 = vpop.f32.mrb[36].mxu0 }
0x24e0   :  { %v5924_v30 = vadd.f32 %v5917_v48, %v10681_v39  ;;  %v5919_v27 = vpop.f32.mrb[37].mxu0  ;;  %v5941_v39 = vpop.permute.xlu0 %5940 }
0x24e1   :  { %v5925_v29 = vadd.f32 %v5919_v27, %v10684_v59  ;;  %v5921_v42 = vpop.f32.mrb[38].mxu0 }
0x24e2   :  { %v5922_v41 = vpop.f32.mrb[39].mxu0  ;;  %v7069_v24 = vmul.f32 -1.442695, %v5924_v30  ;;  %v7071_v30 = vld [vmem:[%s10992_s2 + $0x28] sm:$0xff] }
0x24e3   :  { %8229 = vtanh.f32 %v5925_v29  ;;  %v7070_v57 = vmul.f32 -1.442695, %v5925_v29  ;;  %vm6051_vm1 = vcmp.gt.f32.partialorder %v7071_v30, 0.5 }
0x24e4   :  { %8231 = vpow2.f32 %v7069_v24 }
0x24ed   :  { %v8230_v5 = vpop.eup %8229 }
0x24ee   :  { %5945 = vrot.lane.b32.xlu1 %v8230_v5, %s8445_s5  ;;  %v8232_v12 = vpop.eup %8231 }
0x24ef   :  { %v5932_v25 = vadd.f32 1.0, %v8232_v12 }
0x24f1   :  { %8233 = vrcp.f32 %v5932_v25 }
0x24fb   :  { %v8234_v8 = vpop.eup %8233 }
0x24fc   :  { %v5943_v33 = vmul.f32 %v8234_v8, %v5941_v39 }
0x2560   :  { %v5946_v60 = vpop.permute.xlu1 %5945 }
0x2561   :  { %v5948_v9 = vmul.f32 %v8234_v8, %v5946_v60  ;;  %v10814_v8 = vld [vmem:[#allocation10] ss:$8 sps:$4 sm:$0xff]   ;;  %v8310_v60 = vld [vmem:[#allocation10 + $0x4] ss:$8 sps:$4 sm:$0xff]  }
0x2563   :  { %5950 = vrot.lane.b32.xlu1 %v5948_v9, %s8445_s5 }
0x25d5   :  { %v5951_v51 = vpop.permute.xlu1 %5950 }
0x25d6   :  { %v5953_v59 = vadd.f32 %v5951_v51, %v5943_v33 }
0x25d8   :  { %8235 = vtanh.f32 %v5953_v59  ;;  %5963 = vrot.lane.b32.xlu1 %v5953_v59, %s8445_s5 }
0x25d9   :  { %8237 = vpow2.f32 %v7070_v57 }
0x25e2   :  { %v8236_v44 = vpop.eup %8235 }
0x25e3   :  { %5956 = vrot.lane.b32.xlu0 %v8236_v44, %s8445_s5  ;;  %v8238_v26 = vpop.eup %8237 }
0x25e4   :  { %v5933_v37 = vadd.f32 1.0, %v8238_v26 }
0x25e6   :  { %8239 = vrcp.f32 %v5933_v37 }
0x25f0   :  { %v8240_v54 = vpop.eup %8239 }
0x264a   :  { %v5964_v61 = vpop.permute.xlu1 %5963 }
0x264b   :  { %v5966_v18 = vsel %vm5960_vm0, %v5964_v61, %v5875_v11 }
0x264c   :  { %6031 = vrot.lane.b32.xlu1 %v5966_v18, %s8445_s5 }
0x2655   :  { %v5957_v7 = vpop.permute.xlu0 %5956 }
0x2656   :  { %v5959_v38 = vmul.f32 %v8240_v54, %v5957_v7  ;;  %v7075_v54 = vld [vmem:[%s10992_s2 + $0x30] sm:$0xff] }
0x2657   :  { %vm6142_vm3 = vcmp.gt.f32.partialorder %v7075_v54, 0.5 }
0x2658   :  { %v5961_v4 = vsel %vm5960_vm0, %v5959_v38, %v5870_v20 }
0x2659   :  { %v5970_v31 = vpack.c.bf16 %v5961_v4, %v5961_v4 }
0x265b   :  { %7072 = vmatmul.mubr.msk.bf16.vlgmr.msra.gmra.mrb[40].mxu0 %vm2160_vm2, %v5970_v31 }
0x265c   :  { %6066 = vmatpush1.bf16.msra.mxu0 %v10457_v35  ;;  %6097 = vmatprep.mubr.bf16.mxu0 %v11085_v63 }
0x265d   :  { %6067 = vmatprep.subr.bf16.mxu0 %v10473_v22 }
0x2660   :  { %6068 = vmatpush1.bf16.msra.mxu0 %v10475_v3 }
0x2661   :  { %6069 = vmatprep.subr.bf16.mxu0 %v10489_v55 }
0x2664   :  { %6070 = vmatpush1.bf16.msra.mxu0 %v10492_v47 }
0x2665   :  { %6071 = vmatprep.subr.bf16.mxu0 %v10502_v1 }
0x2668   :  { %6072 = vmatpush1.bf16.msra.mxu0 %v10504_v15 }
0x2669   :  { %6156 = vmatprep.subr.bf16.mxu0 %v10455_v13 }
0x272e   :  { %v6008_v49 = vpop.f32.mrb[40].mxu0 }
0x272f   :  { %v6015_v16 = vadd.f32 %v6008_v49, %v10686_v19  ;;  %v6010_v35 = vpop.f32.mrb[41].mxu0  ;;  %v6032_v19 = vpop.permute.xlu1 %6031 }
0x2730   :  { %v6016_v46 = vadd.f32 %v6010_v35, %v10688_v28  ;;  %v6012_v2 = vpop.f32.mrb[42].mxu0 }
0x2731   :  { %v6013_v17 = vpop.f32.mrb[43].mxu0  ;;  %v7073_v50 = vmul.f32 -1.442695, %v6015_v16  ;;  %v8311_v2 = vld [vmem:[#allocation10 + $0x14] ss:$8 sps:$4 sm:$0xff]  }
0x2732   :  { %8241 = vtanh.f32 %v6016_v46  ;;  %v7074_v34 = vmul.f32 -1.442695, %v6016_v46  ;;  %v8312_v17 = vld [vmem:[#allocation10 + $0x10] ss:$8 sps:$4 sm:$0xff]  }
0x2733   :  { %8243 = vpow2.f32 %v7073_v50  ;;  %v8314_v50 = vld [vmem:[#allocation10 + $0x20] ss:$8 sps:$4 sm:$0xff]  }
0x273c   :  { %v8242_v23 = vpop.eup %8241 }
0x273d   :  { %6036 = vrot.lane.b32.xlu0 %v8242_v23, %s8445_s5  ;;  %v8244_v52 = vpop.eup %8243  ;;  %v8313_v23 = vld [vmem:[#allocation10 + $0x24] ss:$8 sps:$4 sm:$0xff]  }
0x273e   :  { %v6023_v40 = vadd.f32 1.0, %v8244_v52  ;;  %v8315_v52 = vld [vmem:[#allocation10 + $0x34] ss:$8 sps:$4 sm:$0xff]  }
0x2740   :  { %8245 = vrcp.f32 %v6023_v40  ;;  %v8316_v40 = vld [vmem:[#allocation10 + $0x30] ss:$8 sps:$4 sm:$0xff]  }
0x274a   :  { %v8246_v11 = vpop.eup %8245 }
0x274b   :  { %v6034_v21 = vmul.f32 %v8246_v11, %v6032_v19 }
0x27af   :  { %v6037_v36 = vpop.permute.xlu0 %6036 }
0x27b0   :  { %v6039_v13 = vmul.f32 %v8246_v11, %v6037_v36 }
0x27b2   :  { %6041 = vrot.lane.b32.xlu0 %v6039_v13, %s8445_s5 }
0x2824   :  { %v6042_v45 = vpop.permute.xlu0 %6041 }
0x2825   :  { %v6044_v28 = vadd.f32 %v6042_v45, %v6034_v21 }
0x2827   :  { %8247 = vtanh.f32 %v6044_v28  ;;  %6054 = vrot.lane.b32.xlu0 %v6044_v28, %s8445_s5 }
0x2828   :  { %8249 = vpow2.f32 %v7074_v34 }
0x2831   :  { %v8248_v20 = vpop.eup %8247 }
0x2832   :  { %6047 = vrot.lane.b32.xlu1 %v8248_v20, %s8445_s5  ;;  %v8250_v48 = vpop.eup %8249 }
0x2833   :  { %v6024_v27 = vadd.f32 1.0, %v8250_v48 }
0x2835   :  { %8251 = vrcp.f32 %v6024_v27 }
0x283f   :  { %v8252_v41 = vpop.eup %8251 }
0x2899   :  { %v6055_v29 = vpop.permute.xlu0 %6054 }
0x289a   :  { %v6057_v42 = vsel %vm6051_vm1, %v6055_v29, %v5966_v18 }
0x289b   :  { %6122 = vrot.lane.b32.xlu0 %v6057_v42, %s8445_s5 }
0x28a4   :  { %v6048_v5 = vpop.permute.xlu1 %6047 }
0x28a5   :  { %v6050_v24 = vmul.f32 %v8252_v41, %v6048_v5 }
0x28a7   :  { %v6052_v12 = vsel %vm6051_vm1, %v6050_v24, %v5961_v4 }
0x28a8   :  { %v6061_v25 = vpack.c.bf16 %v6052_v12, %v6052_v12 }
0x28aa   :  { %7076 = vmatmul.mubr.msk.bf16.vlgmr.msra.gmra.mrb[44].mxu0 %vm2160_vm2, %v6061_v25  ;;  %v7079_v25 = vld [vmem:[%s10992_s2 + $0x38] sm:$0xff] }
0x28ab   :  { %6157 = vmatpush1.bf16.msra.mxu0 %v10814_v8  ;;  %6188 = vmatprep.mubr.bf16.mxu0 %v11085_v63  ;;  %vm6233_vm4 = vcmp.gt.f32.partialorder %v7079_v25, 0.5 }
0x28ac   :  { %6158 = vmatprep.subr.bf16.mxu0 %v10473_v22 }
0x28af   :  { %6159 = vmatpush1.bf16.msra.mxu0 %v10475_v3 }
0x28b0   :  { %6160 = vmatprep.subr.bf16.mxu0 %v10489_v55 }
0x28b3   :  { %6161 = vmatpush1.bf16.msra.mxu0 %v10492_v47 }
0x28b4   :  { %6162 = vmatprep.subr.bf16.mxu0 %v10502_v1 }
0x28b7   :  { %6163 = vmatpush1.bf16.msra.mxu0 %v10504_v15 }
0x28b8   :  { %6247 = vmatprep.subr.bf16.mxu0 %v8310_v60 }
0x297d   :  { %v6099_v9 = vpop.f32.mrb[44].mxu0 }
0x297e   :  { %v6106_v39 = vadd.f32 %v6099_v9, %v10690_v32  ;;  %v6101_v33 = vpop.f32.mrb[45].mxu0  ;;  %v6123_v32 = vpop.permute.xlu0 %6122 }
0x297f   :  { %v6107_v51 = vadd.f32 %v6101_v33, %v10692_v62  ;;  %v6103_v59 = vpop.f32.mrb[46].mxu0 }
0x2980   :  { %v6104_v22 = vpop.f32.mrb[47].mxu0  ;;  %v7077_v55 = vmul.f32 -1.442695, %v6106_v39 }
0x2981   :  { %8253 = vtanh.f32 %v6107_v51  ;;  %v7078_v61 = vmul.f32 -1.442695, %v6107_v51 }
0x2982   :  { %8255 = vpow2.f32 %v7077_v55 }
0x298b   :  { %v8254_v3 = vpop.eup %8253 }
0x298c   :  { %6127 = vrot.lane.b32.xlu1 %v8254_v3, %s8445_s5  ;;  %v8256_v47 = vpop.eup %8255 }
0x298d   :  { %v6114_v1 = vadd.f32 1.0, %v8256_v47 }
0x298f   :  { %8257 = vrcp.f32 %v6114_v1 }
0x2999   :  { %v8258_v15 = vpop.eup %8257 }
0x299a   :  { %v6125_v26 = vmul.f32 %v8258_v15, %v6123_v32 }
0x29fe   :  { %v6128_v44 = vpop.permute.xlu1 %6127 }
0x29ff   :  { %v6130_v57 = vmul.f32 %v8258_v15, %v6128_v44 }
0x2a01   :  { %6132 = vrot.lane.b32.xlu1 %v6130_v57, %s8445_s5 }
0x2a73   :  { %v6133_v14 = vpop.permute.xlu1 %6132 }
0x2a74   :  { %v6135_v62 = vadd.f32 %v6133_v14, %v6125_v26 }
0x2a76   :  { %8259 = vtanh.f32 %v6135_v62  ;;  %6145 = vrot.lane.b32.xlu1 %v6135_v62, %s8445_s5 }
0x2a77   :  { %8261 = vpow2.f32 %v7078_v61 }
0x2a80   :  { %v8260_v37 = vpop.eup %8259 }
0x2a81   :  { %6138 = vrot.lane.b32.xlu0 %v8260_v37, %s8445_s5  ;;  %v8262_v18 = vpop.eup %8261 }
0x2a82   :  { %v6115_v7 = vadd.f32 1.0, %v8262_v18 }
0x2a84   :  { %8263 = vrcp.f32 %v6115_v7 }
0x2a8e   :  { %v8264_v31 = vpop.eup %8263 }
0x2ae8   :  { %v6146_v38 = vpop.permute.xlu1 %6145 }
0x2ae9   :  { %v6148_v4 = vsel %vm6142_vm3, %v6146_v38, %v6057_v42 }
0x2aea   :  { %6213 = vrot.lane.b32.xlu1 %v6148_v4, %s8445_s5 }
0x2af3   :  { %v6139_v49 = vpop.permute.xlu0 %6138 }
0x2af4   :  { %v6141_v16 = vmul.f32 %v8264_v31, %v6139_v49 }
0x2af6   :  { %v6143_v35 = vsel %vm6142_vm3, %v6141_v16, %v6052_v12 }
0x2af7   :  { %v6152_v46 = vpack.c.bf16 %v6143_v35, %v6143_v35 }
0x2af9   :  { %7080 = vmatmul.mubr.msk.bf16.vlgmr.msra.gmra.mrb[48].mxu0 %vm2160_vm2, %v6152_v46 }
0x2afa   :  { %6248 = vmatpush1.bf16.msra.mxu0 %v10814_v8  ;;  %6279 = vmatprep.mubr.bf16.mxu0 %v11085_v63 }
0x2afb   :  { %6249 = vmatprep.subr.bf16.mxu0 %v8311_v2 }
0x2afe   :  { %6250 = vmatpush1.bf16.msra.mxu0 %v8312_v17 }
0x2aff   :  { %6251 = vmatprep.subr.bf16.mxu0 %v8313_v23 }
0x2b02   :  { %6252 = vmatpush1.bf16.msra.mxu0 %v8314_v50 }
0x2b03   :  { %6253 = vmatprep.subr.bf16.mxu0 %v8315_v52 }
0x2b06   :  { %6254 = vmatpush1.bf16.msra.mxu0 %v8316_v40 }
0x2b07   :  { %6338 = vmatprep.subr.bf16.mxu0 %v8310_v60 }
0x2bcc   :  { %v6190_v11 = vpop.f32.mrb[48].mxu0 }
0x2bcd   :  { %v6197_v36 = vadd.f32 %v6190_v11, %v10694_v58  ;;  %v6192_v13 = vpop.f32.mrb[49].mxu0  ;;  %v6214_v58 = vpop.permute.xlu1 %6213 }
0x2bce   :  { %v6198_v19 = vadd.f32 %v6192_v13, %v10696_v6  ;;  %v6194_v21 = vpop.f32.mrb[50].mxu0 }
0x2bcf   :  { %v6195_v45 = vpop.f32.mrb[51].mxu0  ;;  %v7081_v20 = vmul.f32 -1.442695, %v6197_v36 }
0x2bd0   :  { %8265 = vtanh.f32 %v6198_v19  ;;  %v7082_v24 = vmul.f32 -1.442695, %v6198_v19 }
0x2bd1   :  { %8267 = vpow2.f32 %v7081_v20 }
0x2bda   :  { %v8266_v28 = vpop.eup %8265 }
0x2bdb   :  { %6218 = vrot.lane.b32.xlu0 %v8266_v28, %s8445_s5  ;;  %v8268_v34 = vpop.eup %8267 }
0x2bdc   :  { %v6205_v48 = vadd.f32 1.0, %v8268_v34 }
0x2bde   :  { %8269 = vrcp.f32 %v6205_v48 }
0x2be8   :  { %v8270_v30 = vpop.eup %8269 }
0x2be9   :  { %v6216_v42 = vmul.f32 %v8270_v30, %v6214_v58 }
0x2c4d   :  { %v6219_v27 = vpop.permute.xlu0 %6218 }
0x2c4e   :  { %v6221_v29 = vmul.f32 %v8270_v30, %v6219_v27  ;;  %v8446_v30 = vmov 0.0|0.0  }
0x2c50   :  { %6223 = vrot.lane.b32.xlu0 %v6221_v29, %s8445_s5 }
0x2cc2   :  { %v6224_v41 = vpop.permute.xlu0 %6223 }
0x2cc3   :  { %v6226_v6 = vadd.f32 %v6224_v41, %v6216_v42 }
0x2cc5   :  { %8271 = vtanh.f32 %v6226_v6  ;;  %6236 = vrot.lane.b32.xlu0 %v6226_v6, %s8445_s5 }
0x2cc6   :  { %8273 = vpow2.f32 %v7082_v24  ;;  %v6420_v24 = vld [vmem:[#allocation11 + $0x18] sm:$0xff] }
0x2ccf   :  { %v8272_v5 = vpop.eup %8271 }
0x2cd0   :  { %6229 = vrot.lane.b32.xlu1 %v8272_v5, %s8445_s5  ;;  %v8274_v12 = vpop.eup %8273  ;;  %v6419_v5 = vld [vmem:[#allocation11 + $0x10] sm:$0xff] }
0x2cd1   :  { %v6206_v60 = vadd.f32 1.0, %v8274_v12  ;;  %v6442_v25 = vand.u32 4294901760, %v6419_v5 }
0x2cd3   :  { %8275 = vrcp.f32 %v6206_v60  ;;  %v6445_v60 = vand.u32 4294901760, %v6420_v24 }
0x2cdd   :  { %v8276_v33 = vpop.eup %8275 }
0x2d37   :  { %v6237_v9 = vpop.permute.xlu0 %6236 }
0x2d38   :  { %v6239_v39 = vsel %vm6233_vm4, %v6237_v9, %v6148_v4  ;;  %v7083_v4 = vld [vmem:[%s10992_s2 + $0x40] sm:$0xff] }
0x2d39   :  { %6304 = vrot.lane.b32.xlu0 %v6239_v39, %s8445_s5  ;;  %vm6324_vm5 = vcmp.gt.f32.partialorder %v7083_v4, 0.5 }
0x2d42   :  { %v6230_v51 = vpop.permute.xlu1 %6229 }
0x2d43   :  { %v6232_v59 = vmul.f32 %v8276_v33, %v6230_v51  ;;  %v10881_v33 = vpack.c.bf16 %v6445_v60, %v6442_v25  ;;  %v6421_v51 = vld [vmem:[#allocation11 + $0x20] sm:$0xff] }
0x2d45   :  { %v6234_v22 = vsel %vm6233_vm4, %v6232_v59, %v6143_v35  ;;  %v6422_v59 = vld [vmem:[#allocation11 + $0x28] sm:$0xff] }
0x2d46   :  { %v6243_v3 = vpack.c.bf16 %v6234_v22, %v6234_v22 }
0x2d48   :  { %7084 = vmatmul.mubr.msk.bf16.vlgmr.msra.gmra.mrb[52].mxu0 %vm2160_vm2, %v6243_v3  ;;  %v6451_v3 = vand.u32 4294901760, %v6422_v59 }
0x2d49   :  { %6339 = vmatpush1.bf16.msra.mxu0 %v10814_v8  ;;  %6370 = vmatprep.mubr.bf16.mxu0 %v11085_v63 }
0x2d4a   :  { %6340 = vmatprep.subr.bf16.mxu0 %v8311_v2 }
0x2d4d   :  { %6341 = vmatpush1.bf16.msra.mxu0 %v8312_v17 }
0x2d4e   :  { %6342 = vmatprep.subr.bf16.mxu0 %v8313_v23 }
0x2d51   :  { %6343 = vmatpush1.bf16.msra.mxu0 %v8314_v50 }
0x2d52   :  { %6344 = vmatprep.subr.bf16.mxu0 %v8315_v52 }
0x2d55   :  { %6345 = vmatpush1.bf16.msra.mxu0 %v8316_v40 }
0x2d56   :  { %7500 = vmatprep.subr.bf16.mxu0 %v8446_v30 }
0x2e1b   :  { %v6281_v55 = vpop.f32.mrb[52].mxu0 }
0x2e1c   :  { %v6288_v47 = vadd.f32 %v6281_v55, %v10698_v56  ;;  %v6283_v1 = vpop.f32.mrb[53].mxu0  ;;  %v6305_v56 = vpop.permute.xlu0 %6304 }
0x2e1d   :  { %v6289_v15 = vadd.f32 %v6283_v1, %v10700_v10  ;;  %v6285_v44 = vpop.f32.mrb[54].mxu0  ;;  %v6424_v1 = vld [vmem:[#allocation11 + $0x38] sm:$0xff] }
0x2e1e   :  { %v6286_v57 = vpop.f32.mrb[55].mxu0  ;;  %v7085_v8 = vmul.f32 -1.442695, %v6288_v47  ;;  %v6423_v47 = vld [vmem:[#allocation11 + $0x30] sm:$0xff]  ;;  %v10889_v44 = vsub.f32 %v6420_v24, %v6445_v60 }
0x2e1f   :  { %8277 = vtanh.f32 %v6289_v15  ;;  %v7086_v7 = vmul.f32 -1.442695, %v6289_v15  ;;  %v10887_v15 = vsub.f32 %v6419_v5, %v6442_v25 }
0x2e20   :  { %8279 = vpow2.f32 %v7085_v8  ;;  %v6454_v8 = vand.u32 4294901760, %v6423_v47 }
0x2e29   :  { %v8278_v32 = vpop.eup %8277 }
0x2e2a   :  { %6309 = vrot.lane.b32.xlu1 %v8278_v32, %s8445_s5  ;;  %v8280_v63 = vpop.eup %8279  ;;  %v10894_v32 = vsub.f32 %v6422_v59, %v6451_v3 }
0x2e2b   :  { %v6296_v26 = vadd.f32 1.0, %v8280_v63  ;;  %v6457_v63 = vand.u32 4294901760, %v6424_v1 }
0x2e2d   :  { %8281 = vrcp.f32 %v6296_v26 }
0x2e37   :  { %v8282_v14 = vpop.eup %8281 }
0x2e38   :  { %v6307_v61 = vmul.f32 %v8282_v14, %v6305_v56  ;;  %v10905_v56 = vsub.f32 %v6424_v1, %v6457_v63 }
0x2e9c   :  { %v6310_v62 = vpop.permute.xlu1 %6309 }
0x2e9d   :  { %v6312_v37 = vmul.f32 %v8282_v14, %v6310_v62  ;;  %v10901_v62 = vpack.c.bf16 %v6457_v63, %v6454_v8 }
0x2e9f   :  { %6314 = vrot.lane.b32.xlu1 %v6312_v37, %s8445_s5  ;;  %v10903_v37 = vsub.f32 %v6423_v47, %v6454_v8 }
0x2f11   :  { %v6315_v18 = vpop.permute.xlu1 %6314 }
0x2f12   :  { %v6317_v10 = vadd.f32 %v6315_v18, %v6307_v61 }
0x2f14   :  { %8283 = vtanh.f32 %v6317_v10  ;;  %6327 = vrot.lane.b32.xlu1 %v6317_v10, %s8445_s5 }
0x2f15   :  { %8285 = vpow2.f32 %v7086_v7  ;;  %v6542_v7 = vand.u32 4294901760, %v10889_v44 }
0x2f1e   :  { %v8284_v54 = vpop.eup %8283 }
0x2f1f   :  { %6320 = vrot.lane.b32.xlu0 %v8284_v54, %s8445_s5  ;;  %v8286_v38 = vpop.eup %8285  ;;  %v6535_v54 = vand.u32 4294901760, %v10887_v15 }
0x2f20   :  { %v6297_v31 = vadd.f32 1.0, %v8286_v38 }
0x2f21   :  { %v7552_v24 = vpack.c.bf16 %v6542_v7, %v6535_v54 }
0x2f22   :  { %8287 = vrcp.f32 %v6297_v31  ;;  %v6536_v31 = vsub.f32 %v10887_v15, %v6535_v54 }
0x2f2c   :  { %v8288_v35 = vpop.eup %8287 }
0x2f86   :  { %v6328_v49 = vpop.permute.xlu1 %6327 }
0x2f87   :  { %v6330_v16 = vsel %vm6324_vm5, %v6328_v49, %v6239_v39  ;;  %v6543_v49 = vsub.f32 %v10889_v44, %v6542_v7 }
0x2f88   :  { %6395 = vrot.lane.b32.xlu1 %v6330_v16, %s8445_s5 }
0x2f91   :  { %v6321_v46 = vpop.permute.xlu0 %6320 }
0x2f92   :  { %v6323_v2 = vmul.f32 %v8288_v35, %v6321_v46  ;;  %v6537_v35 = vand.u32 4294901760, %v6536_v31  ;;  %v6544_v46 = vand.u32 4294901760, %v6543_v49 }
0x2f94   :  { %v10860_v17 = vsel %vm6324_vm5, %v6323_v2, %v6234_v22  ;;  %v6448_v22 = vand.u32 4294901760, %v6421_v51 }
0x2f95   :  { %v6334_v23 = vpack.c.bf16 %v10860_v17, %v10860_v17 }
0x2f96   :  { %v10885_v55 = vpack.c.bf16 %v6451_v3, %v6448_v22  ;;  %v10892_v57 = vsub.f32 %v6421_v51, %v6448_v22 }
0x2f97   :  { %7088 = vmatmul.mubr.msk.bf16.vlgmr.msra.gmra.mrb[56].mxu0 %vm2160_vm2, %v6334_v23  ;;  %v6556_v23 = vand.u32 4294901760, %v10894_v32 }
0x2f98   :  { %7162 = vmatprep.mubr.msk.f32.mxu0 %vm8447_vm6, %v8443_v0  ;;  %v6549_v2 = vand.u32 4294901760, %v10892_v57 }
0x2ffa   :  { %v6396_v6 = vpop.permute.xlu1 %6395 }
0x306a   :  { %v6372_v50 = vpop.f32.mrb[56].mxu0 }
0x306b   :  { %v6379_v52 = vadd.f32 %v6372_v50, %v10702_v43  ;;  %v6374_v40 = vpop.f32.mrb[57].mxu0  ;;  %v6417_v43 = vld [vmem:[#allocation11] sm:$0xff]  ;;  %v7516_v50 = vpack.c.bf16 %v6544_v46, %v6537_v35 }
0x306c   :  { %v10867_v11 = vadd.f32 %v6374_v40, %v10704_v53  ;;  %v6376_v36 = vpop.f32.mrb[58].mxu0  ;;  %v6418_v53 = vld [vmem:[#allocation11 + $0x8] sm:$0xff]  ;;  %v6436_v27 = vand.u32 4294901760, %v6417_v43  ;;  %v6557_v40 = vsub.f32 %v10894_v32, %v6556_v23 }
0x306d   :  { %v6377_v13 = vpop.f32.mrb[59].mxu0  ;;  %v7089_v21 = vmul.f32 -1.442695, %v6379_v52  ;;  %v6439_v29 = vand.u32 4294901760, %v6418_v53  ;;  %v6550_v52 = vsub.f32 %v10892_v57, %v6549_v2 }
0x306e   :  { %8289 = vtanh.f32 %v10867_v11  ;;  %v10875_v42 = vsub.f32 %v6417_v43, %v6436_v27  ;;  %v6558_v13 = vand.u32 4294901760, %v6557_v40  ;;  %v7090_v60 = vmul.f32 -1.442695, %v10867_v11 }
0x306f   :  { %8291 = vpow2.f32 %v7089_v21  ;;  %v10873_v58 = vpack.c.bf16 %v6439_v29, %v6436_v27  ;;  %v10877_v41 = vsub.f32 %v6418_v53, %v6439_v29  ;;  %v6551_v36 = vand.u32 4294901760, %v6550_v52 }
0x3070   :  { %v6521_v26 = vand.u32 4294901760, %v10875_v42  ;;  %v6570_v21 = vand.u32 4294901760, %v10905_v56  ;;  %v7528_v27 = vpack.c.bf16 %v10889_v44, %v10887_v15  ;;  %v7531_v29 = vpack.c.bf16 %v10894_v32, %v10892_v57 }
0x3071   :  { %7502 = vmatpush3.bf16.msra.mxu0 %v10873_v58  ;;  %v6528_v14 = vand.u32 4294901760, %v10877_v41  ;;  %v7525_v53 = vpack.c.bf16 %v10877_v41, %v10875_v42 }
0x3072   :  { %7503 = vmatprep.subr.bf16.mxu0 %v8446_v30  ;;  %v6522_v61 = vsub.f32 %v10875_v42, %v6521_v26  ;;  %v7087_v42 = vld [vmem:[%s10992_s2 + $0x48] sm:$0xff] }
0x3073   :  { %v6529_v18 = vsub.f32 %v10877_v41, %v6528_v14  ;;  %v7549_v5 = vpack.c.bf16 %v6528_v14, %v6521_v26  ;;  %vm6415_vm7 = vcmp.gt.f32.partialorder %v7087_v42, 0.5 }
0x3074   :  { %v6523_v10 = vand.u32 4294901760, %v6522_v61 }
0x3075   :  { %7505 = vmatpush3.bf16.msra.mxu0 %v10881_v33  ;;  %v6530_v4 = vand.u32 4294901760, %v6529_v18 }
0x3076   :  { %7506 = vmatprep.subr.bf16.mxu0 %v8446_v30 }
0x3077   :  { %v7513_v16 = vpack.c.bf16 %v6530_v4, %v6523_v10 }
0x3078   :  { %v8290_v19 = vpop.eup %8289 }
0x3079   :  { %6400 = vrot.lane.b32.xlu0 %v8290_v19, %s8445_s5  ;;  %v8292_v45 = vpop.eup %8291  ;;  %7508 = vmatpush3.bf16.msra.mxu0 %v10885_v55  ;;  %v6563_v19 = vand.u32 4294901760, %v10903_v37 }
0x307a   :  { %v6387_v28 = vadd.f32 1.0, %v8292_v45  ;;  %7509 = vmatprep.subr.bf16.mxu0 %v8446_v30  ;;  %v7519_v45 = vpack.c.bf16 %v6558_v13, %v6551_v36 }
0x307b   :  { %v7558_v25 = vpack.c.bf16 %v6570_v21, %v6563_v19 }
0x307c   :  { %8293 = vrcp.f32 %v6387_v28  ;;  %v6564_v28 = vsub.f32 %v10903_v37, %v6563_v19 }
0x307d   :  { %7511 = vmatpush3.bf16.msra.mxu0 %v10901_v62 }
0x307e   :  { %7512 = vmatprep.subr.bf16.mxu0 %v8446_v30 }
0x3086   :  { %v8294_v20 = vpop.eup %8293 }
0x3087   :  { %v6398_v12 = vmul.f32 %v8294_v20, %v6396_v6  ;;  %v7534_v6 = vpack.c.bf16 %v10905_v56, %v10903_v37 }
0x30eb   :  { %v6401_v34 = vpop.permute.xlu0 %6400 }
0x30ec   :  { %v6403_v48 = vmul.f32 %v8294_v20, %v6401_v34  ;;  %v6571_v20 = vsub.f32 %v10905_v56, %v6570_v21  ;;  %v6565_v34 = vand.u32 4294901760, %v6564_v28 }
0x30ee   :  { %6405 = vrot.lane.b32.xlu0 %v6403_v48, %s8445_s5  ;;  %v6572_v48 = vand.u32 4294901760, %v6571_v20 }
0x30f0   :  { %v7522_v43 = vpack.c.bf16 %v6572_v48, %v6565_v34 }
0x3160   :  { %v6406_v9 = vpop.permute.xlu0 %6405 }
0x3161   :  { %v6408_v39 = vadd.f32 %v6406_v9, %v6398_v12  ;;  %v7555_v12 = vpack.c.bf16 %v6556_v23, %v6549_v2 }
0x3163   :  { %8295 = vtanh.f32 %v6408_v39 }
0x3164   :  { %8297 = vpow2.f32 %v7090_v60 }
0x316d   :  { %v8296_v38 = vpop.eup %8295 }
0x316e   :  { %6411 = vrot.lane.b32.xlu1 %v8296_v38, %s8445_s5  ;;  %v8298_v9 = vpop.eup %8297 }
0x316f   :  { %v6388_v39 = vadd.f32 1.0, %v8298_v9 }
0x3171   :  { %8299 = vrcp.f32 %v6388_v39 }
0x317b   :  { %v8300_v41 = vpop.eup %8299 }
0x31e0   :  { %v6412_v51 = vpop.permute.xlu1 %6411 }
0x31e1   :  { %v6414_v59 = vmul.f32 %v8300_v41, %v6412_v51 }
0x31e3   :  { %v6416_v22 = vsel %vm6415_vm7, %v6414_v59, %v10860_v17  ;;  %v7091_v17 = vld [vmem:[%s11002_s12] ss:$0 sm:$0xff] }
0x31e4   :  { %v6433_v3 = vsel %vm2160_vm2, %v6416_v22, 0 }
0x31e5   :  { %v6508_v47 = vand.u32 4294901760, %v6433_v3 }
0x31e7   :  { %v6509_v1 = vsub.f32 %v6433_v3, %v6508_v47 }
0x31e9   :  { %v6510_v15 = vand.u32 4294901760, %v6509_v1 }
0x31eb   :  { %v6511_v11 = vsub.f32 %v6509_v1, %v6510_v15 }
0x31ed   :  { %v6512_v44 = vand.u32 4294901760, %v6511_v11 }
0x31ef   :  { %7163 = vmatmul.mubr.f32.vlgmr.msra.gmra.mrb[60].mxu0 %v6512_v44 }
0x31f0   :  { %7514 = vmatpush3.bf16.msra.mxu0 %v7513_v16  ;;  %7181 = vmatprep.mubr.msk.f32.mxu0 %vm8447_vm6, %v8443_v0 }
0x31f1   :  { %7515 = vmatprep.subr.bf16.mxu0 %v8446_v30 }
0x31f4   :  { %7517 = vmatpush3.bf16.msra.mxu0 %v7516_v50 }
0x31f5   :  { %7518 = vmatprep.subr.bf16.mxu0 %v8446_v30 }
0x31f8   :  { %7520 = vmatpush3.bf16.msra.mxu0 %v7519_v45 }
0x31f9   :  { %7521 = vmatprep.subr.bf16.mxu0 %v8446_v30 }
0x31fc   :  { %7523 = vmatpush3.bf16.msra.mxu0 %v7522_v43 }
0x31fd   :  { %7524 = vmatprep.subr.bf16.mxu0 %v8446_v30 }
0x31ff   :  { %7182 = vmatmul.mubr.f32.vlgmr.msra.gmra.mrb[60].mxu0 %v6508_v47 }
0x3200   :  { %7526 = vmatpush3.bf16.msra.mxu0 %v7525_v53  ;;  %7200 = vmatprep.mubr.msk.f32.mxu0 %vm8447_vm6, %v8443_v0 }
0x3201   :  { %7527 = vmatprep.subr.bf16.mxu0 %v8446_v30 }
0x3204   :  { %7529 = vmatpush3.bf16.msra.mxu0 %v7528_v27 }
0x3205   :  { %7530 = vmatprep.subr.bf16.mxu0 %v8446_v30 }
0x3208   :  { %7532 = vmatpush3.bf16.msra.mxu0 %v7531_v29 }
0x3209   :  { %7533 = vmatprep.subr.bf16.mxu0 %v8446_v30 }
0x320c   :  { %7535 = vmatpush3.bf16.msra.mxu0 %v7534_v6 }
0x320d   :  { %7536 = vmatprep.subr.bf16.mxu0 %v8446_v30 }
0x320f   :  { %7201 = vmatmul.mubr.f32.vlgmr.msra.gmra.mrb[60].mxu0 %v6509_v1 }
0x3210   :  { %7538 = vmatpush3.bf16.msra.mxu0 %v10873_v58  ;;  %7219 = vmatprep.mubr.msk.f32.mxu0 %vm8447_vm6, %v8443_v0 }
0x3211   :  { %7539 = vmatprep.subr.bf16.mxu0 %v8446_v30 }
0x3214   :  { %7541 = vmatpush3.bf16.msra.mxu0 %v10881_v33 }
0x3215   :  { %7542 = vmatprep.subr.bf16.mxu0 %v8446_v30 }
0x3218   :  { %7544 = vmatpush3.bf16.msra.mxu0 %v10885_v55 }
0x3219   :  { %7545 = vmatprep.subr.bf16.mxu0 %v8446_v30 }
0x321c   :  { %7547 = vmatpush3.bf16.msra.mxu0 %v10901_v62 }
0x321d   :  { %7548 = vmatprep.subr.bf16.mxu0 %v8446_v30 }
0x321f   :  { %7220 = vmatmul.mubr.f32.vlgmr.msra.gmra.mrb[60].mxu0 %v6510_v15 }
0x3220   :  { %7550 = vmatpush3.bf16.msra.mxu0 %v7549_v5  ;;  %7238 = vmatprep.mubr.msk.f32.mxu0 %vm8447_vm6, %v8443_v0 }
0x3221   :  { %7551 = vmatprep.subr.bf16.mxu0 %v8446_v30 }
0x3224   :  { %7553 = vmatpush3.bf16.msra.mxu0 %v7552_v24 }
0x3225   :  { %7554 = vmatprep.subr.bf16.mxu0 %v8446_v30 }
0x3228   :  { %7556 = vmatpush3.bf16.msra.mxu0 %v7555_v12 }
0x3229   :  { %7557 = vmatprep.subr.bf16.mxu0 %v8446_v30 }
0x322c   :  { %7559 = vmatpush3.bf16.msra.mxu0 %v7558_v25 }
0x322d   :  { %7560 = vmatprep.subr.bf16.mxu0 %v8446_v30 }
0x322f   :  { %7239 = vmatmul.mubr.f32.vlgmr.msra.gmra.mrb[60].mxu0 %v6508_v47 }
0x3230   :  { %7562 = vmatpush3.bf16.msra.mxu0 %v10873_v58  ;;  %7257 = vmatprep.mubr.msk.f32.mxu0 %vm8447_vm6, %v8443_v0 }
0x3231   :  { %7563 = vmatprep.subr.bf16.mxu0 %v8446_v30 }
0x3234   :  { %7565 = vmatpush3.bf16.msra.mxu0 %v10881_v33 }
0x3235   :  { %7566 = vmatprep.subr.bf16.mxu0 %v8446_v30 }
0x3238   :  { %7568 = vmatpush3.bf16.msra.mxu0 %v10885_v55 }
0x3239   :  { %7569 = vmatprep.subr.bf16.mxu0 %v8446_v30 }
0x323c   :  { %7571 = vmatpush3.bf16.msra.mxu0 %v10901_v62 }
0x323f   :  { %7258 = vmatmul.mubr.f32.vlgmr.msra.gmra.mrb[60].mxu0 %v6508_v47 }
0x3312   :  { %v6968_v0 = vpop.f32.mrb[60].mxu0 }
0x3313   :  { %v7592_v58 = vadd.f32 %v7091_v17, %v6968_v0  ;;  %v7259_v57 = vpop.f32.mrb[61].mxu0 }
0x3315   :  { %6972 = vst [vmem:[#allocation13] sm:$0xff] %v7592_v58 }
0x3316   :  { %8416 = shalt.err (!%p8413_p8)
}
0x3317   :  { %s8417_s7 = scalar_lea.hbm %s11003_s13, 128 }
0x3318   :  { %p8418_p9 = scmp.ne.s32.totalorder %s11003_s13, %s8417_s7  ;;  %p8421_p10 = scmp.lt.u32.totalorder %s8417_s7, %s11003_s13 }
0x331a   :  { %p8423_p11 = pnand %p8421_p10, %p8418_p9 }
0x331c   :  { %8426 = shalt.err (!%p8423_p11)
}
0x331d   :  { %6982 = dma.vmem_to_hbm [thread:$0]  %s6980_s4, 128, %s11003_s13, [#allocation7]  }
0x331e   :  { %8433 = dma.done.wait [#allocation7], 128  }
0x331f   :  { %8434 = vsyncadd [#allocation7], 4294967168 }
0x3320   :  { %6986 = vsyncpa [#allocation6], 1 }
0x3321   :  { %6987 = vsyncpa [#allocation9], 1 }
0x3322   :  { %6988 = vsyncpa [#allocation12], 1 }
0x3323   :  { %6989 = vsyncpa [#allocation7], 1 }

</bundles_post_ra>
